<compile_context>
chip_gen: v6e
topology: v6e:2x2x1
jax: 0.10.0
libtpu: 0.0.40
codegen_flags: <defaults>
</compile_context>

<pallas_src>
import math
import numpy as np
import jax
import jax.numpy as jnp
from jax.experimental import pallas as pl
from jax.experimental.pallas import tpu as pltpu

_K = 5  # Conv5x5


def _conv5x5_kernel(w_ref, b_ref, x_ref, out_ref):
    # w_ref  : SMEM (C_out*C_in*25,) f32  -- OIHW weights, flattened
    # b_ref  : SMEM (C_out,)          f32
    # x_ref  : VMEM (1, C_in, H+4, W+4)   -- padded input for this batch elem
    # out_ref: VMEM (1, 1, H, W)          -- one output-channel spatial tile
    _, c_in, _, _ = x_ref.shape
    h, w = out_ref.shape[2], out_ref.shape[3]

    co = pl.program_id(1)
    base = co * (c_in * _K * _K)

    acc = jnp.zeros((h, w), jnp.float32)
    # Fully-unrolled 5x5 x C_in scalar-times-tile multiply-adds.  Weights are
    # scalar reads from SMEM; the shifted-window slices are static VMEM loads
    # from the padded image block.  Pure VPU work that hides under the DMA.
    for ci in range(c_in):
        for kh in range(_K):
            for kw in range(_K):
                coef = w_ref[base + (ci * _K + kh) * _K + kw]
                acc = acc + coef * x_ref[0, ci, kh:kh + h, kw:kw + w]

    # Direct store (no concatenate / intermediate buffer), bias added as a
    # scalar broadcast.
    out_ref[0, 0] = acc + b_ref[co]


def conv5x5(x, weight, bias, *, use_refl=True):
    """x: (B, C_in, H, W) f32, weight: (C_out, C_in, 5, 5), bias: (C_out,).

    Returns (B, C_out, H, W), matching the PyTorch Conv5x5 module.
    """
    B, C_in, H, W = x.shape
    C_out = weight.shape[0]
    assert weight.shape == (C_out, C_in, _K, _K)

    # ReflectionPad2d(2) / ZeroPad2d(2) equivalent (cheap wrapper-side prep).
    pad_mode = "reflect" if use_refl else "constant"
    x_pad = jnp.pad(x.astype(jnp.float32),
                    ((0, 0), (0, 0), (2, 2), (2, 2)), mode=pad_mode)
    Hp, Wp = H + 4, W + 4

    w_flat = weight.reshape(-1).astype(jnp.float32)   # (C_out*C_in*25,)
    bias = bias.astype(jnp.float32)                   # (C_out,)

    return pl.pallas_call(
        _conv5x5_kernel,
        out_shape=jax.ShapeDtypeStruct((B, C_out, H, W), jnp.float32),
        grid_spec=pltpu.PrefetchScalarGridSpec(
            num_scalar_prefetch=0,
            grid=(B, C_out),   # C_out innermost -> padded-image block reused
            in_specs=[
                # Tiny params: whole arrays in SMEM, read as scalars.
                pl.BlockSpec(memory_space=pltpu.MemorySpace.SMEM),   # weights
                pl.BlockSpec(memory_space=pltpu.MemorySpace.SMEM),   # bias
                # Full padded image for batch b (constant across co).
                pl.BlockSpec((1, C_in, Hp, Wp), lambda b, co: (b, 0, 0, 0)),
            ],
            out_specs=pl.BlockSpec((1, 1, H, W), lambda b, co: (b, co, 0, 0)),
        ),
        compiler_params=pltpu.CompilerParams(
            dimension_semantics=("parallel", "parallel")),
    )(w_flat, bias, x_pad)


def conv5x5_ref(x, weight, bias, *, use_refl=True):
    """Pure-JAX reference mirroring the PyTorch forward (pad + 5x5 conv)."""
    pad_mode = "reflect" if use_refl else "constant"
    x_pad = jnp.pad(x, ((0, 0), (0, 0), (2, 2), (2, 2)), mode=pad_mode)
    out = jax.lax.conv_general_dilated(
        x_pad, weight, window_strides=(1, 1), padding="VALID",
        dimension_numbers=("NCHW", "OIHW", "NCHW"),
        precision=jax.lax.Precision.HIGHEST)
    return out + bias[None, :, None, None]


if __name__ == "__main__":
    batch, in_channels, out_channels, height, width = 2, 4, 8, 16, 16

    key = jax.random.PRNGKey(0)
    kx, kw, kb = jax.random.split(key, 3)

    x = jax.random.normal(kx, (batch, in_channels, height, width),
                          dtype=jnp.float32)

    # PyTorch-style Conv2d init range.
    bound = 1.0 / math.sqrt(in_channels * _K * _K)
    weight = jax.random.uniform(kw, (out_channels, in_channels, _K, _K),
                                dtype=jnp.float32, minval=-bound, maxval=bound)
    bias = jax.random.uniform(kb, (out_channels,), dtype=jnp.float32,
                              minval=-bound, maxval=bound)

    out = conv5x5(x, weight, bias, use_refl=True)
    out = jax.block_until_ready(out)

    expected = conv5x5_ref(x, weight, bias, use_refl=True)
    assert out.shape == (batch, out_channels, height, width)
    np.testing.assert_allclose(np.asarray(out), np.asarray(expected),
                               rtol=1e-4, atol=1e-4)
    print("KERNEL_OK")
</pallas_src>

<mosaic_0001>
module attributes {stable_mosaic.version = 11 : i64} {
  func.func @_conv5x5_kernel(%arg0: i32, %arg1: i32, %arg2: memref<800xf32, #tpu.memory_space<smem>>, %arg3: memref<8xf32, #tpu.memory_space<smem>>, %arg4: memref<1x4x20x20xf32, #tpu.memory_space<vmem>>, %arg5: memref<1x1x16x16xf32, #tpu.memory_space<vmem>>) attributes {dimension_semantics = [#tpu.dimension_semantics<parallel>, #tpu.dimension_semantics<parallel>], iteration_bounds = array<i64: 2, 8>, scalar_prefetch = 0 : i64, scratch_operands = 0 : i64, tpu.core_type = #tpu.core_type<tc>, window_params = [{transform_indices = @transform_0, window_bounds = array<i64: 800>}, {transform_indices = @transform_1, window_bounds = array<i64: 8>}, {transform_indices = @transform_2, window_bounds = array<i64: 1, 4, 20, 20>}, {transform_indices = @transform_3, window_bounds = array<i64: 1, 1, 16, 16>}]} {
    %c100_i32 = arith.constant 100 : i32
    %0 = arith.muli %arg1, %c100_i32 : i32
    %cst = arith.constant 0.000000e+00 : f32
    %1 = vector.broadcast %cst : f32 to vector<16x16xf32>
    %c0_i32 = arith.constant 0 : i32
    %2 = arith.addi %0, %c0_i32 : i32
    %c0_i32_0 = arith.constant 0 : i32
    %3 = arith.addi %2, %c0_i32_0 : i32
    %4 = arith.index_cast %3 : i32 to index
    %5 = memref.load %arg2[%4] : memref<800xf32, #tpu.memory_space<smem>>
    %c0 = arith.constant 0 : index
    %c0_1 = arith.constant 0 : index
    %c0_2 = arith.constant 0 : index
    %c0_3 = arith.constant 0 : index
    %6 = vector.load %arg4[%c0, %c0_1, %c0_2, %c0_3] : memref<1x4x20x20xf32, #tpu.memory_space<vmem>>, vector<1x1x16x16xf32>
    %7 = vector.shape_cast %6 : vector<1x1x16x16xf32> to vector<16x16xf32>
    %8 = vector.broadcast %5 : f32 to vector<16x16xf32>
    %9 = arith.mulf %8, %7 : vector<16x16xf32>
    %10 = arith.addf %1, %9 : vector<16x16xf32>
    %c0_i32_4 = arith.constant 0 : i32
    %11 = arith.addi %0, %c0_i32_4 : i32
    %c1_i32 = arith.constant 1 : i32
    %12 = arith.addi %11, %c1_i32 : i32
    %13 = arith.index_cast %12 : i32 to index
    %14 = memref.load %arg2[%13] : memref<800xf32, #tpu.memory_space<smem>>
    %c0_5 = arith.constant 0 : index
    %c0_6 = arith.constant 0 : index
    %c0_7 = arith.constant 0 : index
    %c1 = arith.constant 1 : index
    %15 = vector.load %arg4[%c0_5, %c0_6, %c0_7, %c1] : memref<1x4x20x20xf32, #tpu.memory_space<vmem>>, vector<1x1x16x16xf32>
    %16 = vector.shape_cast %15 : vector<1x1x16x16xf32> to vector<16x16xf32>
    %17 = vector.broadcast %14 : f32 to vector<16x16xf32>
    %18 = arith.mulf %17, %16 : vector<16x16xf32>
    %19 = arith.addf %10, %18 : vector<16x16xf32>
    %c0_i32_8 = arith.constant 0 : i32
    %20 = arith.addi %0, %c0_i32_8 : i32
    %c2_i32 = arith.constant 2 : i32
    %21 = arith.addi %20, %c2_i32 : i32
    %22 = arith.index_cast %21 : i32 to index
    %23 = memref.load %arg2[%22] : memref<800xf32, #tpu.memory_space<smem>>
    %c0_9 = arith.constant 0 : index
    %c0_10 = arith.constant 0 : index
    %c0_11 = arith.constant 0 : index
    %c2 = arith.constant 2 : index
    %24 = vector.load %arg4[%c0_9, %c0_10, %c0_11, %c2] : memref<1x4x20x20xf32, #tpu.memory_space<vmem>>, vector<1x1x16x16xf32>
    %25 = vector.shape_cast %24 : vector<1x1x16x16xf32> to vector<16x16xf32>
    %26 = vector.broadcast %23 : f32 to vector<16x16xf32>
    %27 = arith.mulf %26, %25 : vector<16x16xf32>
    %28 = arith.addf %19, %27 : vector<16x16xf32>
    %c0_i32_12 = arith.constant 0 : i32
    %29 = arith.addi %0, %c0_i32_12 : i32
    %c3_i32 = arith.constant 3 : i32
    %30 = arith.addi %29, %c3_i32 : i32
    %31 = arith.index_cast %30 : i32 to index
    %32 = memref.load %arg2[%31] : memref<800xf32, #tpu.memory_space<smem>>
    %c0_13 = arith.constant 0 : index
    %c0_14 = arith.constant 0 : index
    %c0_15 = arith.constant 0 : index
    %c3 = arith.constant 3 : index
    %33 = vector.load %arg4[%c0_13, %c0_14, %c0_15, %c3] : memref<1x4x20x20xf32, #tpu.memory_space<vmem>>, vector<1x1x16x16xf32>
    %34 = vector.shape_cast %33 : vector<1x1x16x16xf32> to vector<16x16xf32>
    %35 = vector.broadcast %32 : f32 to vector<16x16xf32>
    %36 = arith.mulf %35, %34 : vector<16x16xf32>
    %37 = arith.addf %28, %36 : vector<16x16xf32>
    %c0_i32_16 = arith.constant 0 : i32
    %38 = arith.addi %0, %c0_i32_16 : i32
    %c4_i32 = arith.constant 4 : i32
    %39 = arith.addi %38, %c4_i32 : i32
    %40 = arith.index_cast %39 : i32 to index
    %41 = memref.load %arg2[%40] : memref<800xf32, #tpu.memory_space<smem>>
    %c0_17 = arith.constant 0 : index
    %c0_18 = arith.constant 0 : index
    %c0_19 = arith.constant 0 : index
    %c4 = arith.constant 4 : index
    %42 = vector.load %arg4[%c0_17, %c0_18, %c0_19, %c4] : memref<1x4x20x20xf32, #tpu.memory_space<vmem>>, vector<1x1x16x16xf32>
    %43 = vector.shape_cast %42 : vector<1x1x16x16xf32> to vector<16x16xf32>
    %44 = vector.broadcast %41 : f32 to vector<16x16xf32>
    %45 = arith.mulf %44, %43 : vector<16x16xf32>
    %46 = arith.addf %37, %45 : vector<16x16xf32>
    %c5_i32 = arith.constant 5 : i32
    %47 = arith.addi %0, %c5_i32 : i32
    %c0_i32_20 = arith.constant 0 : i32
    %48 = arith.addi %47, %c0_i32_20 : i32
    %49 = arith.index_cast %48 : i32 to index
    %50 = memref.load %arg2[%49] : memref<800xf32, #tpu.memory_space<smem>>
    %c0_21 = arith.constant 0 : index
    %c0_22 = arith.constant 0 : index
    %c1_23 = arith.constant 1 : index
    %c0_24 = arith.constant 0 : index
    %51 = vector.load %arg4[%c0_21, %c0_22, %c1_23, %c0_24] : memref<1x4x20x20xf32, #tpu.memory_space<vmem>>, vector<1x1x16x16xf32>
    %52 = vector.shape_cast %51 : vector<1x1x16x16xf32> to vector<16x16xf32>
    %53 = vector.broadcast %50 : f32 to vector<16x16xf32>
    %54 = arith.mulf %53, %52 : vector<16x16xf32>
    %55 = arith.addf %46, %54 : vector<16x16xf32>
    %c5_i32_25 = arith.constant 5 : i32
    %56 = arith.addi %0, %c5_i32_25 : i32
    %c1_i32_26 = arith.constant 1 : i32
    %57 = arith.addi %56, %c1_i32_26 : i32
    %58 = arith.index_cast %57 : i32 to index
    %59 = memref.load %arg2[%58] : memref<800xf32, #tpu.memory_space<smem>>
    %c0_27 = arith.constant 0 : index
    %c0_28 = arith.constant 0 : index
    %c1_29 = arith.constant 1 : index
    %c1_30 = arith.constant 1 : index
    %60 = vector.load %arg4[%c0_27, %c0_28, %c1_29, %c1_30] : memref<1x4x20x20xf32, #tpu.memory_space<vmem>>, vector<1x1x16x16xf32>
    %61 = vector.shape_cast %60 : vector<1x1x16x16xf32> to vector<16x16xf32>
    %62 = vector.broadcast %59 : f32 to vector<16x16xf32>
    %63 = arith.mulf %62, %61 : vector<16x16xf32>
    %64 = arith.addf %55, %63 : vector<16x16xf32>
    %c5_i32_31 = arith.constant 5 : i32
    %65 = arith.addi %0, %c5_i32_31 : i32
    %c2_i32_32 = arith.constant 2 : i32
    %66 = arith.addi %65, %c2_i32_32 : i32
    %67 = arith.index_cast %66 : i32 to index
    %68 = memref.load %arg2[%67] : memref<800xf32, #tpu.memory_space<smem>>
    %c0_33 = arith.constant 0 : index
    %c0_34 = arith.constant 0 : index
    %c1_35 = arith.constant 1 : index
    %c2_36 = arith.constant 2 : index
    %69 = vector.load %arg4[%c0_33, %c0_34, %c1_35, %c2_36] : memref<1x4x20x20xf32, #tpu.memory_space<vmem>>, vector<1x1x16x16xf32>
    %70 = vector.shape_cast %69 : vector<1x1x16x16xf32> to vector<16x16xf32>
    %71 = vector.broadcast %68 : f32 to vector<16x16xf32>
    %72 = arith.mulf %71, %70 : vector<16x16xf32>
    %73 = arith.addf %64, %72 : vector<16x16xf32>
    %c5_i32_37 = arith.constant 5 : i32
    %74 = arith.addi %0, %c5_i32_37 : i32
    %c3_i32_38 = arith.constant 3 : i32
    %75 = arith.addi %74, %c3_i32_38 : i32
    %76 = arith.index_cast %75 : i32 to index
    %77 = memref.load %arg2[%76] : memref<800xf32, #tpu.memory_space<smem>>
    %c0_39 = arith.constant 0 : index
    %c0_40 = arith.constant 0 : index
    %c1_41 = arith.constant 1 : index
    %c3_42 = arith.constant 3 : index
    %78 = vector.load %arg4[%c0_39, %c0_40, %c1_41, %c3_42] : memref<1x4x20x20xf32, #tpu.memory_space<vmem>>, vector<1x1x16x16xf32>
    %79 = vector.shape_cast %78 : vector<1x1x16x16xf32> to vector<16x16xf32>
    %80 = vector.broadcast %77 : f32 to vector<16x16xf32>
    %81 = arith.mulf %80, %79 : vector<16x16xf32>
    %82 = arith.addf %73, %81 : vector<16x16xf32>
    %c5_i32_43 = arith.constant 5 : i32
    %83 = arith.addi %0, %c5_i32_43 : i32
    %c4_i32_44 = arith.constant 4 : i32
    %84 = arith.addi %83, %c4_i32_44 : i32
    %85 = arith.index_cast %84 : i32 to index
    %86 = memref.load %arg2[%85] : memref<800xf32, #tpu.memory_space<smem>>
    %c0_45 = arith.constant 0 : index
    %c0_46 = arith.constant 0 : index
    %c1_47 = arith.constant 1 : index
    %c4_48 = arith.constant 4 : index
    %87 = vector.load %arg4[%c0_45, %c0_46, %c1_47, %c4_48] : memref<1x4x20x20xf32, #tpu.memory_space<vmem>>, vector<1x1x16x16xf32>
    %88 = vector.shape_cast %87 : vector<1x1x16x16xf32> to vector<16x16xf32>
    %89 = vector.broadcast %86 : f32 to vector<16x16xf32>
    %90 = arith.mulf %89, %88 : vector<16x16xf32>
    %91 = arith.addf %82, %90 : vector<16x16xf32>
    %c10_i32 = arith.constant 10 : i32
    %92 = arith.addi %0, %c10_i32 : i32
    %c0_i32_49 = arith.constant 0 : i32
    %93 = arith.addi %92, %c0_i32_49 : i32
    %94 = arith.index_cast %93 : i32 to index
    %95 = memref.load %arg2[%94] : memref<800xf32, #tpu.memory_space<smem>>
    %c0_50 = arith.constant 0 : index
    %c0_51 = arith.constant 0 : index
    %c2_52 = arith.constant 2 : index
    %c0_53 = arith.constant 0 : index
    %96 = vector.load %arg4[%c0_50, %c0_51, %c2_52, %c0_53] : memref<1x4x20x20xf32, #tpu.memory_space<vmem>>, vector<1x1x16x16xf32>
    %97 = vector.shape_cast %96 : vector<1x1x16x16xf32> to vector<16x16xf32>
    %98 = vector.broadcast %95 : f32 to vector<16x16xf32>
    %99 = arith.mulf %98, %97 : vector<16x16xf32>
    %100 = arith.addf %91, %99 : vector<16x16xf32>
    %c10_i32_54 = arith.constant 10 : i32
    %101 = arith.addi %0, %c10_i32_54 : i32
    %c1_i32_55 = arith.constant 1 : i32
    %102 = arith.addi %101, %c1_i32_55 : i32
    %103 = arith.index_cast %102 : i32 to index
    %104 = memref.load %arg2[%103] : memref<800xf32, #tpu.memory_space<smem>>
    %c0_56 = arith.constant 0 : index
    %c0_57 = arith.constant 0 : index
    %c2_58 = arith.constant 2 : index
    %c1_59 = arith.constant 1 : index
    %105 = vector.load %arg4[%c0_56, %c0_57, %c2_58, %c1_59] : memref<1x4x20x20xf32, #tpu.memory_space<vmem>>, vector<1x1x16x16xf32>
    %106 = vector.shape_cast %105 : vector<1x1x16x16xf32> to vector<16x16xf32>
    %107 = vector.broadcast %104 : f32 to vector<16x16xf32>
    %108 = arith.mulf %107, %106 : vector<16x16xf32>
    %109 = arith.addf %100, %108 : vector<16x16xf32>
    %c10_i32_60 = arith.constant 10 : i32
    %110 = arith.addi %0, %c10_i32_60 : i32
    %c2_i32_61 = arith.constant 2 : i32
    %111 = arith.addi %110, %c2_i32_61 : i32
    %112 = arith.index_cast %111 : i32 to index
    %113 = memref.load %arg2[%112] : memref<800xf32, #tpu.memory_space<smem>>
    %c0_62 = arith.constant 0 : index
    %c0_63 = arith.constant 0 : index
    %c2_64 = arith.constant 2 : index
    %c2_65 = arith.constant 2 : index
    %114 = vector.load %arg4[%c0_62, %c0_63, %c2_64, %c2_65] : memref<1x4x20x20xf32, #tpu.memory_space<vmem>>, vector<1x1x16x16xf32>
    %115 = vector.shape_cast %114 : vector<1x1x16x16xf32> to vector<16x16xf32>
    %116 = vector.broadcast %113 : f32 to vector<16x16xf32>
    %117 = arith.mulf %116, %115 : vector<16x16xf32>
    %118 = arith.addf %109, %117 : vector<16x16xf32>
    %c10_i32_66 = arith.constant 10 : i32
    %119 = arith.addi %0, %c10_i32_66 : i32
    %c3_i32_67 = arith.constant 3 : i32
    %120 = arith.addi %119, %c3_i32_67 : i32
    %121 = arith.index_cast %120 : i32 to index
    %122 = memref.load %arg2[%121] : memref<800xf32, #tpu.memory_space<smem>>
    %c0_68 = arith.constant 0 : index
    %c0_69 = arith.constant 0 : index
    %c2_70 = arith.constant 2 : index
    %c3_71 = arith.constant 3 : index
    %123 = vector.load %arg4[%c0_68, %c0_69, %c2_70, %c3_71] : memref<1x4x20x20xf32, #tpu.memory_space<vmem>>, vector<1x1x16x16xf32>
    %124 = vector.shape_cast %123 : vector<1x1x16x16xf32> to vector<16x16xf32>
    %125 = vector.broadcast %122 : f32 to vector<16x16xf32>
    %126 = arith.mulf %125, %124 : vector<16x16xf32>
    %127 = arith.addf %118, %126 : vector<16x16xf32>
    %c10_i32_72 = arith.constant 10 : i32
    %128 = arith.addi %0, %c10_i32_72 : i32
    %c4_i32_73 = arith.constant 4 : i32
    %129 = arith.addi %128, %c4_i32_73 : i32
    %130 = arith.index_cast %129 : i32 to index
    %131 = memref.load %arg2[%130] : memref<800xf32, #tpu.memory_space<smem>>
    %c0_74 = arith.constant 0 : index
    %c0_75 = arith.constant 0 : index
    %c2_76 = arith.constant 2 : index
    %c4_77 = arith.constant 4 : index
    %132 = vector.load %arg4[%c0_74, %c0_75, %c2_76, %c4_77] : memref<1x4x20x20xf32, #tpu.memory_space<vmem>>, vector<1x1x16x16xf32>
    %133 = vector.shape_cast %132 : vector<1x1x16x16xf32> to vector<16x16xf32>
    %134 = vector.broadcast %131 : f32 to vector<16x16xf32>
    %135 = arith.mulf %134, %133 : vector<16x16xf32>
    %136 = arith.addf %127, %135 : vector<16x16xf32>
    %c15_i32 = arith.constant 15 : i32
    %137 = arith.addi %0, %c15_i32 : i32
    %c0_i32_78 = arith.constant 0 : i32
    %138 = arith.addi %137, %c0_i32_78 : i32
    %139 = arith.index_cast %138 : i32 to index
    %140 = memref.load %arg2[%139] : memref<800xf32, #tpu.memory_space<smem>>
    %c0_79 = arith.constant 0 : index
    %c0_80 = arith.constant 0 : index
    %c3_81 = arith.constant 3 : index
    %c0_82 = arith.constant 0 : index
    %141 = vector.load %arg4[%c0_79, %c0_80, %c3_81, %c0_82] : memref<1x4x20x20xf32, #tpu.memory_space<vmem>>, vector<1x1x16x16xf32>
    %142 = vector.shape_cast %141 : vector<1x1x16x16xf32> to vector<16x16xf32>
    %143 = vector.broadcast %140 : f32 to vector<16x16xf32>
    %144 = arith.mulf %143, %142 : vector<16x16xf32>
    %145 = arith.addf %136, %144 : vector<16x16xf32>
    %c15_i32_83 = arith.constant 15 : i32
    %146 = arith.addi %0, %c15_i32_83 : i32
    %c1_i32_84 = arith.constant 1 : i32
    %147 = arith.addi %146, %c1_i32_84 : i32
    %148 = arith.index_cast %147 : i32 to index
    %149 = memref.load %arg2[%148] : memref<800xf32, #tpu.memory_space<smem>>
    %c0_85 = arith.constant 0 : index
    %c0_86 = arith.constant 0 : index
    %c3_87 = arith.constant 3 : index
    %c1_88 = arith.constant 1 : index
    %150 = vector.load %arg4[%c0_85, %c0_86, %c3_87, %c1_88] : memref<1x4x20x20xf32, #tpu.memory_space<vmem>>, vector<1x1x16x16xf32>
    %151 = vector.shape_cast %150 : vector<1x1x16x16xf32> to vector<16x16xf32>
    %152 = vector.broadcast %149 : f32 to vector<16x16xf32>
    %153 = arith.mulf %152, %151 : vector<16x16xf32>
    %154 = arith.addf %145, %153 : vector<16x16xf32>
    %c15_i32_89 = arith.constant 15 : i32
    %155 = arith.addi %0, %c15_i32_89 : i32
    %c2_i32_90 = arith.constant 2 : i32
    %156 = arith.addi %155, %c2_i32_90 : i32
    %157 = arith.index_cast %156 : i32 to index
    %158 = memref.load %arg2[%157] : memref<800xf32, #tpu.memory_space<smem>>
    %c0_91 = arith.constant 0 : index
    %c0_92 = arith.constant 0 : index
    %c3_93 = arith.constant 3 : index
    %c2_94 = arith.constant 2 : index
    %159 = vector.load %arg4[%c0_91, %c0_92, %c3_93, %c2_94] : memref<1x4x20x20xf32, #tpu.memory_space<vmem>>, vector<1x1x16x16xf32>
    %160 = vector.shape_cast %159 : vector<1x1x16x16xf32> to vector<16x16xf32>
    %161 = vector.broadcast %158 : f32 to vector<16x16xf32>
    %162 = arith.mulf %161, %160 : vector<16x16xf32>
    %163 = arith.addf %154, %162 : vector<16x16xf32>
    %c15_i32_95 = arith.constant 15 : i32
    %164 = arith.addi %0, %c15_i32_95 : i32
    %c3_i32_96 = arith.constant 3 : i32
    %165 = arith.addi %164, %c3_i32_96 : i32
    %166 = arith.index_cast %165 : i32 to index
    %167 = memref.load %arg2[%166] : memref<800xf32, #tpu.memory_space<smem>>
    %c0_97 = arith.constant 0 : index
    %c0_98 = arith.constant 0 : index
    %c3_99 = arith.constant 3 : index
    %c3_100 = arith.constant 3 : index
    %168 = vector.load %arg4[%c0_97, %c0_98, %c3_99, %c3_100] : memref<1x4x20x20xf32, #tpu.memory_space<vmem>>, vector<1x1x16x16xf32>
    %169 = vector.shape_cast %168 : vector<1x1x16x16xf32> to vector<16x16xf32>
    %170 = vector.broadcast %167 : f32 to vector<16x16xf32>
    %171 = arith.mulf %170, %169 : vector<16x16xf32>
    %172 = arith.addf %163, %171 : vector<16x16xf32>
    %c15_i32_101 = arith.constant 15 : i32
    %173 = arith.addi %0, %c15_i32_101 : i32
    %c4_i32_102 = arith.constant 4 : i32
    %174 = arith.addi %173, %c4_i32_102 : i32
    %175 = arith.index_cast %174 : i32 to index
    %176 = memref.load %arg2[%175] : memref<800xf32, #tpu.memory_space<smem>>
    %c0_103 = arith.constant 0 : index
    %c0_104 = arith.constant 0 : index
    %c3_105 = arith.constant 3 : index
    %c4_106 = arith.constant 4 : index
    %177 = vector.load %arg4[%c0_103, %c0_104, %c3_105, %c4_106] : memref<1x4x20x20xf32, #tpu.memory_space<vmem>>, vector<1x1x16x16xf32>
    %178 = vector.shape_cast %177 : vector<1x1x16x16xf32> to vector<16x16xf32>
    %179 = vector.broadcast %176 : f32 to vector<16x16xf32>
    %180 = arith.mulf %179, %178 : vector<16x16xf32>
    %181 = arith.addf %172, %180 : vector<16x16xf32>
    %c20_i32 = arith.constant 20 : i32
    %182 = arith.addi %0, %c20_i32 : i32
    %c0_i32_107 = arith.constant 0 : i32
    %183 = arith.addi %182, %c0_i32_107 : i32
    %184 = arith.index_cast %183 : i32 to index
    %185 = memref.load %arg2[%184] : memref<800xf32, #tpu.memory_space<smem>>
    %c0_108 = arith.constant 0 : index
    %c0_109 = arith.constant 0 : index
    %c4_110 = arith.constant 4 : index
    %c0_111 = arith.constant 0 : index
    %186 = vector.load %arg4[%c0_108, %c0_109, %c4_110, %c0_111] : memref<1x4x20x20xf32, #tpu.memory_space<vmem>>, vector<1x1x16x16xf32>
    %187 = vector.shape_cast %186 : vector<1x1x16x16xf32> to vector<16x16xf32>
    %188 = vector.broadcast %185 : f32 to vector<16x16xf32>
    %189 = arith.mulf %188, %187 : vector<16x16xf32>
    %190 = arith.addf %181, %189 : vector<16x16xf32>
    %c20_i32_112 = arith.constant 20 : i32
    %191 = arith.addi %0, %c20_i32_112 : i32
    %c1_i32_113 = arith.constant 1 : i32
    %192 = arith.addi %191, %c1_i32_113 : i32
    %193 = arith.index_cast %192 : i32 to index
    %194 = memref.load %arg2[%193] : memref<800xf32, #tpu.memory_space<smem>>
    %c0_114 = arith.constant 0 : index
    %c0_115 = arith.constant 0 : index
    %c4_116 = arith.constant 4 : index
    %c1_117 = arith.constant 1 : index
    %195 = vector.load %arg4[%c0_114, %c0_115, %c4_116, %c1_117] : memref<1x4x20x20xf32, #tpu.memory_space<vmem>>, vector<1x1x16x16xf32>
    %196 = vector.shape_cast %195 : vector<1x1x16x16xf32> to vector<16x16xf32>
    %197 = vector.broadcast %194 : f32 to vector<16x16xf32>
    %198 = arith.mulf %197, %196 : vector<16x16xf32>
    %199 = arith.addf %190, %198 : vector<16x16xf32>
    %c20_i32_118 = arith.constant 20 : i32
    %200 = arith.addi %0, %c20_i32_118 : i32
    %c2_i32_119 = arith.constant 2 : i32
    %201 = arith.addi %200, %c2_i32_119 : i32
    %202 = arith.index_cast %201 : i32 to index
    %203 = memref.load %arg2[%202] : memref<800xf32, #tpu.memory_space<smem>>
    %c0_120 = arith.constant 0 : index
    %c0_121 = arith.constant 0 : index
    %c4_122 = arith.constant 4 : index
    %c2_123 = arith.constant 2 : index
    %204 = vector.load %arg4[%c0_120, %c0_121, %c4_122, %c2_123] : memref<1x4x20x20xf32, #tpu.memory_space<vmem>>, vector<1x1x16x16xf32>
    %205 = vector.shape_cast %204 : vector<1x1x16x16xf32> to vector<16x16xf32>
    %206 = vector.broadcast %203 : f32 to vector<16x16xf32>
    %207 = arith.mulf %206, %205 : vector<16x16xf32>
    %208 = arith.addf %199, %207 : vector<16x16xf32>
    %c20_i32_124 = arith.constant 20 : i32
    %209 = arith.addi %0, %c20_i32_124 : i32
    %c3_i32_125 = arith.constant 3 : i32
    %210 = arith.addi %209, %c3_i32_125 : i32
    %211 = arith.index_cast %210 : i32 to index
    %212 = memref.load %arg2[%211] : memref<800xf32, #tpu.memory_space<smem>>
    %c0_126 = arith.constant 0 : index
    %c0_127 = arith.constant 0 : index
    %c4_128 = arith.constant 4 : index
    %c3_129 = arith.constant 3 : index
    %213 = vector.load %arg4[%c0_126, %c0_127, %c4_128, %c3_129] : memref<1x4x20x20xf32, #tpu.memory_space<vmem>>, vector<1x1x16x16xf32>
    %214 = vector.shape_cast %213 : vector<1x1x16x16xf32> to vector<16x16xf32>
    %215 = vector.broadcast %212 : f32 to vector<16x16xf32>
    %216 = arith.mulf %215, %214 : vector<16x16xf32>
    %217 = arith.addf %208, %216 : vector<16x16xf32>
    %c20_i32_130 = arith.constant 20 : i32
    %218 = arith.addi %0, %c20_i32_130 : i32
    %c4_i32_131 = arith.constant 4 : i32
    %219 = arith.addi %218, %c4_i32_131 : i32
    %220 = arith.index_cast %219 : i32 to index
    %221 = memref.load %arg2[%220] : memref<800xf32, #tpu.memory_space<smem>>
    %c0_132 = arith.constant 0 : index
    %c0_133 = arith.constant 0 : index
    %c4_134 = arith.constant 4 : index
    %c4_135 = arith.constant 4 : index
    %222 = vector.load %arg4[%c0_132, %c0_133, %c4_134, %c4_135] : memref<1x4x20x20xf32, #tpu.memory_space<vmem>>, vector<1x1x16x16xf32>
    %223 = vector.shape_cast %222 : vector<1x1x16x16xf32> to vector<16x16xf32>
    %224 = vector.broadcast %221 : f32 to vector<16x16xf32>
    %225 = arith.mulf %224, %223 : vector<16x16xf32>
    %226 = arith.addf %217, %225 : vector<16x16xf32>
    %c25_i32 = arith.constant 25 : i32
    %227 = arith.addi %0, %c25_i32 : i32
    %c0_i32_136 = arith.constant 0 : i32
    %228 = arith.addi %227, %c0_i32_136 : i32
    %229 = arith.index_cast %228 : i32 to index
    %230 = memref.load %arg2[%229] : memref<800xf32, #tpu.memory_space<smem>>
    %c0_137 = arith.constant 0 : index
    %c1_138 = arith.constant 1 : index
    %c0_139 = arith.constant 0 : index
    %c0_140 = arith.constant 0 : index
    %231 = vector.load %arg4[%c0_137, %c1_138, %c0_139, %c0_140] : memref<1x4x20x20xf32, #tpu.memory_space<vmem>>, vector<1x1x16x16xf32>
    %232 = vector.shape_cast %231 : vector<1x1x16x16xf32> to vector<16x16xf32>
    %233 = vector.broadcast %230 : f32 to vector<16x16xf32>
    %234 = arith.mulf %233, %232 : vector<16x16xf32>
    %235 = arith.addf %226, %234 : vector<16x16xf32>
    %c25_i32_141 = arith.constant 25 : i32
    %236 = arith.addi %0, %c25_i32_141 : i32
    %c1_i32_142 = arith.constant 1 : i32
    %237 = arith.addi %236, %c1_i32_142 : i32
    %238 = arith.index_cast %237 : i32 to index
    %239 = memref.load %arg2[%238] : memref<800xf32, #tpu.memory_space<smem>>
    %c0_143 = arith.constant 0 : index
    %c1_144 = arith.constant 1 : index
    %c0_145 = arith.constant 0 : index
    %c1_146 = arith.constant 1 : index
    %240 = vector.load %arg4[%c0_143, %c1_144, %c0_145, %c1_146] : memref<1x4x20x20xf32, #tpu.memory_space<vmem>>, vector<1x1x16x16xf32>
    %241 = vector.shape_cast %240 : vector<1x1x16x16xf32> to vector<16x16xf32>
    %242 = vector.broadcast %239 : f32 to vector<16x16xf32>
    %243 = arith.mulf %242, %241 : vector<16x16xf32>
    %244 = arith.addf %235, %243 : vector<16x16xf32>
    %c25_i32_147 = arith.constant 25 : i32
    %245 = arith.addi %0, %c25_i32_147 : i32
    %c2_i32_148 = arith.constant 2 : i32
    %246 = arith.addi %245, %c2_i32_148 : i32
    %247 = arith.index_cast %246 : i32 to index
    %248 = memref.load %arg2[%247] : memref<800xf32, #tpu.memory_space<smem>>
    %c0_149 = arith.constant 0 : index
    %c1_150 = arith.constant 1 : index
    %c0_151 = arith.constant 0 : index
    %c2_152 = arith.constant 2 : index
    %249 = vector.load %arg4[%c0_149, %c1_150, %c0_151, %c2_152] : memref<1x4x20x20xf32, #tpu.memory_space<vmem>>, vector<1x1x16x16xf32>
    %250 = vector.shape_cast %249 : vector<1x1x16x16xf32> to vector<16x16xf32>
    %251 = vector.broadcast %248 : f32 to vector<16x16xf32>
    %252 = arith.mulf %251, %250 : vector<16x16xf32>
    %253 = arith.addf %244, %252 : vector<16x16xf32>
    %c25_i32_153 = arith.constant 25 : i32
    %254 = arith.addi %0, %c25_i32_153 : i32
    %c3_i32_154 = arith.constant 3 : i32
    %255 = arith.addi %254, %c3_i32_154 : i32
    %256 = arith.index_cast %255 : i32 to index
    %257 = memref.load %arg2[%256] : memref<800xf32, #tpu.memory_space<smem>>
    %c0_155 = arith.constant 0 : index
    %c1_156 = arith.constant 1 : index
    %c0_157 = arith.constant 0 : index
    %c3_158 = arith.constant 3 : index
    %258 = vector.load %arg4[%c0_155, %c1_156, %c0_157, %c3_158] : memref<1x4x20x20xf32, #tpu.memory_space<vmem>>, vector<1x1x16x16xf32>
    %259 = vector.shape_cast %258 : vector<1x1x16x16xf32> to vector<16x16xf32>
    %260 = vector.broadcast %257 : f32 to vector<16x16xf32>
    %261 = arith.mulf %260, %259 : vector<16x16xf32>
    %262 = arith.addf %253, %261 : vector<16x16xf32>
    %c25_i32_159 = arith.constant 25 : i32
    %263 = arith.addi %0, %c25_i32_159 : i32
    %c4_i32_160 = arith.constant 4 : i32
    %264 = arith.addi %263, %c4_i32_160 : i32
    %265 = arith.index_cast %264 : i32 to index
    %266 = memref.load %arg2[%265] : memref<800xf32, #tpu.memory_space<smem>>
    %c0_161 = arith.constant 0 : index
    %c1_162 = arith.constant 1 : index
    %c0_163 = arith.constant 0 : index
    %c4_164 = arith.constant 4 : index
    %267 = vector.load %arg4[%c0_161, %c1_162, %c0_163, %c4_164] : memref<1x4x20x20xf32, #tpu.memory_space<vmem>>, vector<1x1x16x16xf32>
    %268 = vector.shape_cast %267 : vector<1x1x16x16xf32> to vector<16x16xf32>
    %269 = vector.broadcast %266 : f32 to vector<16x16xf32>
    %270 = arith.mulf %269, %268 : vector<16x16xf32>
    %271 = arith.addf %262, %270 : vector<16x16xf32>
    %c30_i32 = arith.constant 30 : i32
    %272 = arith.addi %0, %c30_i32 : i32
    %c0_i32_165 = arith.constant 0 : i32
    %273 = arith.addi %272, %c0_i32_165 : i32
    %274 = arith.index_cast %273 : i32 to index
    %275 = memref.load %arg2[%274] : memref<800xf32, #tpu.memory_space<smem>>
    %c0_166 = arith.constant 0 : index
    %c1_167 = arith.constant 1 : index
    %c1_168 = arith.constant 1 : index
    %c0_169 = arith.constant 0 : index
    %276 = vector.load %arg4[%c0_166, %c1_167, %c1_168, %c0_169] : memref<1x4x20x20xf32, #tpu.memory_space<vmem>>, vector<1x1x16x16xf32>
    %277 = vector.shape_cast %276 : vector<1x1x16x16xf32> to vector<16x16xf32>
    %278 = vector.broadcast %275 : f32 to vector<16x16xf32>
    %279 = arith.mulf %278, %277 : vector<16x16xf32>
    %280 = arith.addf %271, %279 : vector<16x16xf32>
    %c30_i32_170 = arith.constant 30 : i32
    %281 = arith.addi %0, %c30_i32_170 : i32
    %c1_i32_171 = arith.constant 1 : i32
    %282 = arith.addi %281, %c1_i32_171 : i32
    %283 = arith.index_cast %282 : i32 to index
    %284 = memref.load %arg2[%283] : memref<800xf32, #tpu.memory_space<smem>>
    %c0_172 = arith.constant 0 : index
    %c1_173 = arith.constant 1 : index
    %c1_174 = arith.constant 1 : index
    %c1_175 = arith.constant 1 : index
    %285 = vector.load %arg4[%c0_172, %c1_173, %c1_174, %c1_175] : memref<1x4x20x20xf32, #tpu.memory_space<vmem>>, vector<1x1x16x16xf32>
    %286 = vector.shape_cast %285 : vector<1x1x16x16xf32> to vector<16x16xf32>
    %287 = vector.broadcast %284 : f32 to vector<16x16xf32>
    %288 = arith.mulf %287, %286 : vector<16x16xf32>
    %289 = arith.addf %280, %288 : vector<16x16xf32>
    %c30_i32_176 = arith.constant 30 : i32
    %290 = arith.addi %0, %c30_i32_176 : i32
    %c2_i32_177 = arith.constant 2 : i32
    %291 = arith.addi %290, %c2_i32_177 : i32
    %292 = arith.index_cast %291 : i32 to index
    %293 = memref.load %arg2[%292] : memref<800xf32, #tpu.memory_space<smem>>
    %c0_178 = arith.constant 0 : index
    %c1_179 = arith.constant 1 : index
    %c1_180 = arith.constant 1 : index
    %c2_181 = arith.constant 2 : index
    %294 = vector.load %arg4[%c0_178, %c1_179, %c1_180, %c2_181] : memref<1x4x20x20xf32, #tpu.memory_space<vmem>>, vector<1x1x16x16xf32>
    %295 = vector.shape_cast %294 : vector<1x1x16x16xf32> to vector<16x16xf32>
    %296 = vector.broadcast %293 : f32 to vector<16x16xf32>
    %297 = arith.mulf %296, %295 : vector<16x16xf32>
    %298 = arith.addf %289, %297 : vector<16x16xf32>
    %c30_i32_182 = arith.constant 30 : i32
    %299 = arith.addi %0, %c30_i32_182 : i32
    %c3_i32_183 = arith.constant 3 : i32
    %300 = arith.addi %299, %c3_i32_183 : i32
    %301 = arith.index_cast %300 : i32 to index
    %302 = memref.load %arg2[%301] : memref<800xf32, #tpu.memory_space<smem>>
    %c0_184 = arith.constant 0 : index
    %c1_185 = arith.constant 1 : index
    %c1_186 = arith.constant 1 : index
    %c3_187 = arith.constant 3 : index
    %303 = vector.load %arg4[%c0_184, %c1_185, %c1_186, %c3_187] : memref<1x4x20x20xf32, #tpu.memory_space<vmem>>, vector<1x1x16x16xf32>
    %304 = vector.shape_cast %303 : vector<1x1x16x16xf32> to vector<16x16xf32>
    %305 = vector.broadcast %302 : f32 to vector<16x16xf32>
    %306 = arith.mulf %305, %304 : vector<16x16xf32>
    %307 = arith.addf %298, %306 : vector<16x16xf32>
    %c30_i32_188 = arith.constant 30 : i32
    %308 = arith.addi %0, %c30_i32_188 : i32
    %c4_i32_189 = arith.constant 4 : i32
    %309 = arith.addi %308, %c4_i32_189 : i32
    %310 = arith.index_cast %309 : i32 to index
    %311 = memref.load %arg2[%310] : memref<800xf32, #tpu.memory_space<smem>>
    %c0_190 = arith.constant 0 : index
    %c1_191 = arith.constant 1 : index
    %c1_192 = arith.constant 1 : index
    %c4_193 = arith.constant 4 : index
    %312 = vector.load %arg4[%c0_190, %c1_191, %c1_192, %c4_193] : memref<1x4x20x20xf32, #tpu.memory_space<vmem>>, vector<1x1x16x16xf32>
    %313 = vector.shape_cast %312 : vector<1x1x16x16xf32> to vector<16x16xf32>
    %314 = vector.broadcast %311 : f32 to vector<16x16xf32>
    %315 = arith.mulf %314, %313 : vector<16x16xf32>
    %316 = arith.addf %307, %315 : vector<16x16xf32>
    %c35_i32 = arith.constant 35 : i32
    %317 = arith.addi %0, %c35_i32 : i32
    %c0_i32_194 = arith.constant 0 : i32
    %318 = arith.addi %317, %c0_i32_194 : i32
    %319 = arith.index_cast %318 : i32 to index
    %320 = memref.load %arg2[%319] : memref<800xf32, #tpu.memory_space<smem>>
    %c0_195 = arith.constant 0 : index
    %c1_196 = arith.constant 1 : index
    %c2_197 = arith.constant 2 : index
    %c0_198 = arith.constant 0 : index
    %321 = vector.load %arg4[%c0_195, %c1_196, %c2_197, %c0_198] : memref<1x4x20x20xf32, #tpu.memory_space<vmem>>, vector<1x1x16x16xf32>
    %322 = vector.shape_cast %321 : vector<1x1x16x16xf32> to vector<16x16xf32>
    %323 = vector.broadcast %320 : f32 to vector<16x16xf32>
    %324 = arith.mulf %323, %322 : vector<16x16xf32>
    %325 = arith.addf %316, %324 : vector<16x16xf32>
    %c35_i32_199 = arith.constant 35 : i32
    %326 = arith.addi %0, %c35_i32_199 : i32
    %c1_i32_200 = arith.constant 1 : i32
    %327 = arith.addi %326, %c1_i32_200 : i32
    %328 = arith.index_cast %327 : i32 to index
    %329 = memref.load %arg2[%328] : memref<800xf32, #tpu.memory_space<smem>>
    %c0_201 = arith.constant 0 : index
    %c1_202 = arith.constant 1 : index
    %c2_203 = arith.constant 2 : index
    %c1_204 = arith.constant 1 : index
    %330 = vector.load %arg4[%c0_201, %c1_202, %c2_203, %c1_204] : memref<1x4x20x20xf32, #tpu.memory_space<vmem>>, vector<1x1x16x16xf32>
    %331 = vector.shape_cast %330 : vector<1x1x16x16xf32> to vector<16x16xf32>
    %332 = vector.broadcast %329 : f32 to vector<16x16xf32>
    %333 = arith.mulf %332, %331 : vector<16x16xf32>
    %334 = arith.addf %325, %333 : vector<16x16xf32>
    %c35_i32_205 = arith.constant 35 : i32
    %335 = arith.addi %0, %c35_i32_205 : i32
    %c2_i32_206 = arith.constant 2 : i32
    %336 = arith.addi %335, %c2_i32_206 : i32
    %337 = arith.index_cast %336 : i32 to index
    %338 = memref.load %arg2[%337] : memref<800xf32, #tpu.memory_space<smem>>
    %c0_207 = arith.constant 0 : index
    %c1_208 = arith.constant 1 : index
    %c2_209 = arith.constant 2 : index
    %c2_210 = arith.constant 2 : index
    %339 = vector.load %arg4[%c0_207, %c1_208, %c2_209, %c2_210] : memref<1x4x20x20xf32, #tpu.memory_space<vmem>>, vector<1x1x16x16xf32>
    %340 = vector.shape_cast %339 : vector<1x1x16x16xf32> to vector<16x16xf32>
    %341 = vector.broadcast %338 : f32 to vector<16x16xf32>
    %342 = arith.mulf %341, %340 : vector<16x16xf32>
    %343 = arith.addf %334, %342 : vector<16x16xf32>
    %c35_i32_211 = arith.constant 35 : i32
    %344 = arith.addi %0, %c35_i32_211 : i32
    %c3_i32_212 = arith.constant 3 : i32
    %345 = arith.addi %344, %c3_i32_212 : i32
    %346 = arith.index_cast %345 : i32 to index
    %347 = memref.load %arg2[%346] : memref<800xf32, #tpu.memory_space<smem>>
    %c0_213 = arith.constant 0 : index
    %c1_214 = arith.constant 1 : index
    %c2_215 = arith.constant 2 : index
    %c3_216 = arith.constant 3 : index
    %348 = vector.load %arg4[%c0_213, %c1_214, %c2_215, %c3_216] : memref<1x4x20x20xf32, #tpu.memory_space<vmem>>, vector<1x1x16x16xf32>
    %349 = vector.shape_cast %348 : vector<1x1x16x16xf32> to vector<16x16xf32>
    %350 = vector.broadcast %347 : f32 to vector<16x16xf32>
    %351 = arith.mulf %350, %349 : vector<16x16xf32>
    %352 = arith.addf %343, %351 : vector<16x16xf32>
    %c35_i32_217 = arith.constant 35 : i32
    %353 = arith.addi %0, %c35_i32_217 : i32
    %c4_i32_218 = arith.constant 4 : i32
    %354 = arith.addi %353, %c4_i32_218 : i32
    %355 = arith.index_cast %354 : i32 to index
    %356 = memref.load %arg2[%355] : memref<800xf32, #tpu.memory_space<smem>>
    %c0_219 = arith.constant 0 : index
    %c1_220 = arith.constant 1 : index
    %c2_221 = arith.constant 2 : index
    %c4_222 = arith.constant 4 : index
    %357 = vector.load %arg4[%c0_219, %c1_220, %c2_221, %c4_222] : memref<1x4x20x20xf32, #tpu.memory_space<vmem>>, vector<1x1x16x16xf32>
    %358 = vector.shape_cast %357 : vector<1x1x16x16xf32> to vector<16x16xf32>
    %359 = vector.broadcast %356 : f32 to vector<16x16xf32>
    %360 = arith.mulf %359, %358 : vector<16x16xf32>
    %361 = arith.addf %352, %360 : vector<16x16xf32>
    %c40_i32 = arith.constant 40 : i32
    %362 = arith.addi %0, %c40_i32 : i32
    %c0_i32_223 = arith.constant 0 : i32
    %363 = arith.addi %362, %c0_i32_223 : i32
    %364 = arith.index_cast %363 : i32 to index
    %365 = memref.load %arg2[%364] : memref<800xf32, #tpu.memory_space<smem>>
    %c0_224 = arith.constant 0 : index
    %c1_225 = arith.constant 1 : index
    %c3_226 = arith.constant 3 : index
    %c0_227 = arith.constant 0 : index
    %366 = vector.load %arg4[%c0_224, %c1_225, %c3_226, %c0_227] : memref<1x4x20x20xf32, #tpu.memory_space<vmem>>, vector<1x1x16x16xf32>
    %367 = vector.shape_cast %366 : vector<1x1x16x16xf32> to vector<16x16xf32>
    %368 = vector.broadcast %365 : f32 to vector<16x16xf32>
    %369 = arith.mulf %368, %367 : vector<16x16xf32>
    %370 = arith.addf %361, %369 : vector<16x16xf32>
    %c40_i32_228 = arith.constant 40 : i32
    %371 = arith.addi %0, %c40_i32_228 : i32
    %c1_i32_229 = arith.constant 1 : i32
    %372 = arith.addi %371, %c1_i32_229 : i32
    %373 = arith.index_cast %372 : i32 to index
    %374 = memref.load %arg2[%373] : memref<800xf32, #tpu.memory_space<smem>>
    %c0_230 = arith.constant 0 : index
    %c1_231 = arith.constant 1 : index
    %c3_232 = arith.constant 3 : index
    %c1_233 = arith.constant 1 : index
    %375 = vector.load %arg4[%c0_230, %c1_231, %c3_232, %c1_233] : memref<1x4x20x20xf32, #tpu.memory_space<vmem>>, vector<1x1x16x16xf32>
    %376 = vector.shape_cast %375 : vector<1x1x16x16xf32> to vector<16x16xf32>
    %377 = vector.broadcast %374 : f32 to vector<16x16xf32>
    %378 = arith.mulf %377, %376 : vector<16x16xf32>
    %379 = arith.addf %370, %378 : vector<16x16xf32>
    %c40_i32_234 = arith.constant 40 : i32
    %380 = arith.addi %0, %c40_i32_234 : i32
    %c2_i32_235 = arith.constant 2 : i32
    %381 = arith.addi %380, %c2_i32_235 : i32
    %382 = arith.index_cast %381 : i32 to index
    %383 = memref.load %arg2[%382] : memref<800xf32, #tpu.memory_space<smem>>
    %c0_236 = arith.constant 0 : index
    %c1_237 = arith.constant 1 : index
    %c3_238 = arith.constant 3 : index
    %c2_239 = arith.constant 2 : index
    %384 = vector.load %arg4[%c0_236, %c1_237, %c3_238, %c2_239] : memref<1x4x20x20xf32, #tpu.memory_space<vmem>>, vector<1x1x16x16xf32>
    %385 = vector.shape_cast %384 : vector<1x1x16x16xf32> to vector<16x16xf32>
    %386 = vector.broadcast %383 : f32 to vector<16x16xf32>
    %387 = arith.mulf %386, %385 : vector<16x16xf32>
    %388 = arith.addf %379, %387 : vector<16x16xf32>
    %c40_i32_240 = arith.constant 40 : i32
    %389 = arith.addi %0, %c40_i32_240 : i32
    %c3_i32_241 = arith.constant 3 : i32
    %390 = arith.addi %389, %c3_i32_241 : i32
    %391 = arith.index_cast %390 : i32 to index
    %392 = memref.load %arg2[%391] : memref<800xf32, #tpu.memory_space<smem>>
    %c0_242 = arith.constant 0 : index
    %c1_243 = arith.constant 1 : index
    %c3_244 = arith.constant 3 : index
    %c3_245 = arith.constant 3 : index
    %393 = vector.load %arg4[%c0_242, %c1_243, %c3_244, %c3_245] : memref<1x4x20x20xf32, #tpu.memory_space<vmem>>, vector<1x1x16x16xf32>
    %394 = vector.shape_cast %393 : vector<1x1x16x16xf32> to vector<16x16xf32>
    %395 = vector.broadcast %392 : f32 to vector<16x16xf32>
    %396 = arith.mulf %395, %394 : vector<16x16xf32>
    %397 = arith.addf %388, %396 : vector<16x16xf32>
    %c40_i32_246 = arith.constant 40 : i32
    %398 = arith.addi %0, %c40_i32_246 : i32
    %c4_i32_247 = arith.constant 4 : i32
    %399 = arith.addi %398, %c4_i32_247 : i32
    %400 = arith.index_cast %399 : i32 to index
    %401 = memref.load %arg2[%400] : memref<800xf32, #tpu.memory_space<smem>>
    %c0_248 = arith.constant 0 : index
    %c1_249 = arith.constant 1 : index
    %c3_250 = arith.constant 3 : index
    %c4_251 = arith.constant 4 : index
    %402 = vector.load %arg4[%c0_248, %c1_249, %c3_250, %c4_251] : memref<1x4x20x20xf32, #tpu.memory_space<vmem>>, vector<1x1x16x16xf32>
    %403 = vector.shape_cast %402 : vector<1x1x16x16xf32> to vector<16x16xf32>
    %404 = vector.broadcast %401 : f32 to vector<16x16xf32>
    %405 = arith.mulf %404, %403 : vector<16x16xf32>
    %406 = arith.addf %397, %405 : vector<16x16xf32>
    %c45_i32 = arith.constant 45 : i32
    %407 = arith.addi %0, %c45_i32 : i32
    %c0_i32_252 = arith.constant 0 : i32
    %408 = arith.addi %407, %c0_i32_252 : i32
    %409 = arith.index_cast %408 : i32 to index
    %410 = memref.load %arg2[%409] : memref<800xf32, #tpu.memory_space<smem>>
    %c0_253 = arith.constant 0 : index
    %c1_254 = arith.constant 1 : index
    %c4_255 = arith.constant 4 : index
    %c0_256 = arith.constant 0 : index
    %411 = vector.load %arg4[%c0_253, %c1_254, %c4_255, %c0_256] : memref<1x4x20x20xf32, #tpu.memory_space<vmem>>, vector<1x1x16x16xf32>
    %412 = vector.shape_cast %411 : vector<1x1x16x16xf32> to vector<16x16xf32>
    %413 = vector.broadcast %410 : f32 to vector<16x16xf32>
    %414 = arith.mulf %413, %412 : vector<16x16xf32>
    %415 = arith.addf %406, %414 : vector<16x16xf32>
    %c45_i32_257 = arith.constant 45 : i32
    %416 = arith.addi %0, %c45_i32_257 : i32
    %c1_i32_258 = arith.constant 1 : i32
    %417 = arith.addi %416, %c1_i32_258 : i32
    %418 = arith.index_cast %417 : i32 to index
    %419 = memref.load %arg2[%418] : memref<800xf32, #tpu.memory_space<smem>>
    %c0_259 = arith.constant 0 : index
    %c1_260 = arith.constant 1 : index
    %c4_261 = arith.constant 4 : index
    %c1_262 = arith.constant 1 : index
    %420 = vector.load %arg4[%c0_259, %c1_260, %c4_261, %c1_262] : memref<1x4x20x20xf32, #tpu.memory_space<vmem>>, vector<1x1x16x16xf32>
    %421 = vector.shape_cast %420 : vector<1x1x16x16xf32> to vector<16x16xf32>
    %422 = vector.broadcast %419 : f32 to vector<16x16xf32>
    %423 = arith.mulf %422, %421 : vector<16x16xf32>
    %424 = arith.addf %415, %423 : vector<16x16xf32>
    %c45_i32_263 = arith.constant 45 : i32
    %425 = arith.addi %0, %c45_i32_263 : i32
    %c2_i32_264 = arith.constant 2 : i32
    %426 = arith.addi %425, %c2_i32_264 : i32
    %427 = arith.index_cast %426 : i32 to index
    %428 = memref.load %arg2[%427] : memref<800xf32, #tpu.memory_space<smem>>
    %c0_265 = arith.constant 0 : index
    %c1_266 = arith.constant 1 : index
    %c4_267 = arith.constant 4 : index
    %c2_268 = arith.constant 2 : index
    %429 = vector.load %arg4[%c0_265, %c1_266, %c4_267, %c2_268] : memref<1x4x20x20xf32, #tpu.memory_space<vmem>>, vector<1x1x16x16xf32>
    %430 = vector.shape_cast %429 : vector<1x1x16x16xf32> to vector<16x16xf32>
    %431 = vector.broadcast %428 : f32 to vector<16x16xf32>
    %432 = arith.mulf %431, %430 : vector<16x16xf32>
    %433 = arith.addf %424, %432 : vector<16x16xf32>
    %c45_i32_269 = arith.constant 45 : i32
    %434 = arith.addi %0, %c45_i32_269 : i32
    %c3_i32_270 = arith.constant 3 : i32
    %435 = arith.addi %434, %c3_i32_270 : i32
    %436 = arith.index_cast %435 : i32 to index
    %437 = memref.load %arg2[%436] : memref<800xf32, #tpu.memory_space<smem>>
    %c0_271 = arith.constant 0 : index
    %c1_272 = arith.constant 1 : index
    %c4_273 = arith.constant 4 : index
    %c3_274 = arith.constant 3 : index
    %438 = vector.load %arg4[%c0_271, %c1_272, %c4_273, %c3_274] : memref<1x4x20x20xf32, #tpu.memory_space<vmem>>, vector<1x1x16x16xf32>
    %439 = vector.shape_cast %438 : vector<1x1x16x16xf32> to vector<16x16xf32>
    %440 = vector.broadcast %437 : f32 to vector<16x16xf32>
    %441 = arith.mulf %440, %439 : vector<16x16xf32>
    %442 = arith.addf %433, %441 : vector<16x16xf32>
    %c45_i32_275 = arith.constant 45 : i32
    %443 = arith.addi %0, %c45_i32_275 : i32
    %c4_i32_276 = arith.constant 4 : i32
    %444 = arith.addi %443, %c4_i32_276 : i32
    %445 = arith.index_cast %444 : i32 to index
    %446 = memref.load %arg2[%445] : memref<800xf32, #tpu.memory_space<smem>>
    %c0_277 = arith.constant 0 : index
    %c1_278 = arith.constant 1 : index
    %c4_279 = arith.constant 4 : index
    %c4_280 = arith.constant 4 : index
    %447 = vector.load %arg4[%c0_277, %c1_278, %c4_279, %c4_280] : memref<1x4x20x20xf32, #tpu.memory_space<vmem>>, vector<1x1x16x16xf32>
    %448 = vector.shape_cast %447 : vector<1x1x16x16xf32> to vector<16x16xf32>
    %449 = vector.broadcast %446 : f32 to vector<16x16xf32>
    %450 = arith.mulf %449, %448 : vector<16x16xf32>
    %451 = arith.addf %442, %450 : vector<16x16xf32>
    %c50_i32 = arith.constant 50 : i32
    %452 = arith.addi %0, %c50_i32 : i32
    %c0_i32_281 = arith.constant 0 : i32
    %453 = arith.addi %452, %c0_i32_281 : i32
    %454 = arith.index_cast %453 : i32 to index
    %455 = memref.load %arg2[%454] : memref<800xf32, #tpu.memory_space<smem>>
    %c0_282 = arith.constant 0 : index
    %c2_283 = arith.constant 2 : index
    %c0_284 = arith.constant 0 : index
    %c0_285 = arith.constant 0 : index
    %456 = vector.load %arg4[%c0_282, %c2_283, %c0_284, %c0_285] : memref<1x4x20x20xf32, #tpu.memory_space<vmem>>, vector<1x1x16x16xf32>
    %457 = vector.shape_cast %456 : vector<1x1x16x16xf32> to vector<16x16xf32>
    %458 = vector.broadcast %455 : f32 to vector<16x16xf32>
    %459 = arith.mulf %458, %457 : vector<16x16xf32>
    %460 = arith.addf %451, %459 : vector<16x16xf32>
    %c50_i32_286 = arith.constant 50 : i32
    %461 = arith.addi %0, %c50_i32_286 : i32
    %c1_i32_287 = arith.constant 1 : i32
    %462 = arith.addi %461, %c1_i32_287 : i32
    %463 = arith.index_cast %462 : i32 to index
    %464 = memref.load %arg2[%463] : memref<800xf32, #tpu.memory_space<smem>>
    %c0_288 = arith.constant 0 : index
    %c2_289 = arith.constant 2 : index
    %c0_290 = arith.constant 0 : index
    %c1_291 = arith.constant 1 : index
    %465 = vector.load %arg4[%c0_288, %c2_289, %c0_290, %c1_291] : memref<1x4x20x20xf32, #tpu.memory_space<vmem>>, vector<1x1x16x16xf32>
    %466 = vector.shape_cast %465 : vector<1x1x16x16xf32> to vector<16x16xf32>
    %467 = vector.broadcast %464 : f32 to vector<16x16xf32>
    %468 = arith.mulf %467, %466 : vector<16x16xf32>
    %469 = arith.addf %460, %468 : vector<16x16xf32>
    %c50_i32_292 = arith.constant 50 : i32
    %470 = arith.addi %0, %c50_i32_292 : i32
    %c2_i32_293 = arith.constant 2 : i32
    %471 = arith.addi %470, %c2_i32_293 : i32
    %472 = arith.index_cast %471 : i32 to index
    %473 = memref.load %arg2[%472] : memref<800xf32, #tpu.memory_space<smem>>
    %c0_294 = arith.constant 0 : index
    %c2_295 = arith.constant 2 : index
    %c0_296 = arith.constant 0 : index
    %c2_297 = arith.constant 2 : index
    %474 = vector.load %arg4[%c0_294, %c2_295, %c0_296, %c2_297] : memref<1x4x20x20xf32, #tpu.memory_space<vmem>>, vector<1x1x16x16xf32>
    %475 = vector.shape_cast %474 : vector<1x1x16x16xf32> to vector<16x16xf32>
    %476 = vector.broadcast %473 : f32 to vector<16x16xf32>
    %477 = arith.mulf %476, %475 : vector<16x16xf32>
    %478 = arith.addf %469, %477 : vector<16x16xf32>
    %c50_i32_298 = arith.constant 50 : i32
    %479 = arith.addi %0, %c50_i32_298 : i32
    %c3_i32_299 = arith.constant 3 : i32
    %480 = arith.addi %479, %c3_i32_299 : i32
    %481 = arith.index_cast %480 : i32 to index
    %482 = memref.load %arg2[%481] : memref<800xf32, #tpu.memory_space<smem>>
    %c0_300 = arith.constant 0 : index
    %c2_301 = arith.constant 2 : index
    %c0_302 = arith.constant 0 : index
    %c3_303 = arith.constant 3 : index
    %483 = vector.load %arg4[%c0_300, %c2_301, %c0_302, %c3_303] : memref<1x4x20x20xf32, #tpu.memory_space<vmem>>, vector<1x1x16x16xf32>
    %484 = vector.shape_cast %483 : vector<1x1x16x16xf32> to vector<16x16xf32>
    %485 = vector.broadcast %482 : f32 to vector<16x16xf32>
    %486 = arith.mulf %485, %484 : vector<16x16xf32>
    %487 = arith.addf %478, %486 : vector<16x16xf32>
    %c50_i32_304 = arith.constant 50 : i32
    %488 = arith.addi %0, %c50_i32_304 : i32
    %c4_i32_305 = arith.constant 4 : i32
    %489 = arith.addi %488, %c4_i32_305 : i32
    %490 = arith.index_cast %489 : i32 to index
    %491 = memref.load %arg2[%490] : memref<800xf32, #tpu.memory_space<smem>>
    %c0_306 = arith.constant 0 : index
    %c2_307 = arith.constant 2 : index
    %c0_308 = arith.constant 0 : index
    %c4_309 = arith.constant 4 : index
    %492 = vector.load %arg4[%c0_306, %c2_307, %c0_308, %c4_309] : memref<1x4x20x20xf32, #tpu.memory_space<vmem>>, vector<1x1x16x16xf32>
    %493 = vector.shape_cast %492 : vector<1x1x16x16xf32> to vector<16x16xf32>
    %494 = vector.broadcast %491 : f32 to vector<16x16xf32>
    %495 = arith.mulf %494, %493 : vector<16x16xf32>
    %496 = arith.addf %487, %495 : vector<16x16xf32>
    %c55_i32 = arith.constant 55 : i32
    %497 = arith.addi %0, %c55_i32 : i32
    %c0_i32_310 = arith.constant 0 : i32
    %498 = arith.addi %497, %c0_i32_310 : i32
    %499 = arith.index_cast %498 : i32 to index
    %500 = memref.load %arg2[%499] : memref<800xf32, #tpu.memory_space<smem>>
    %c0_311 = arith.constant 0 : index
    %c2_312 = arith.constant 2 : index
    %c1_313 = arith.constant 1 : index
    %c0_314 = arith.constant 0 : index
    %501 = vector.load %arg4[%c0_311, %c2_312, %c1_313, %c0_314] : memref<1x4x20x20xf32, #tpu.memory_space<vmem>>, vector<1x1x16x16xf32>
    %502 = vector.shape_cast %501 : vector<1x1x16x16xf32> to vector<16x16xf32>
    %503 = vector.broadcast %500 : f32 to vector<16x16xf32>
    %504 = arith.mulf %503, %502 : vector<16x16xf32>
    %505 = arith.addf %496, %504 : vector<16x16xf32>
    %c55_i32_315 = arith.constant 55 : i32
    %506 = arith.addi %0, %c55_i32_315 : i32
    %c1_i32_316 = arith.constant 1 : i32
    %507 = arith.addi %506, %c1_i32_316 : i32
    %508 = arith.index_cast %507 : i32 to index
    %509 = memref.load %arg2[%508] : memref<800xf32, #tpu.memory_space<smem>>
    %c0_317 = arith.constant 0 : index
    %c2_318 = arith.constant 2 : index
    %c1_319 = arith.constant 1 : index
    %c1_320 = arith.constant 1 : index
    %510 = vector.load %arg4[%c0_317, %c2_318, %c1_319, %c1_320] : memref<1x4x20x20xf32, #tpu.memory_space<vmem>>, vector<1x1x16x16xf32>
    %511 = vector.shape_cast %510 : vector<1x1x16x16xf32> to vector<16x16xf32>
    %512 = vector.broadcast %509 : f32 to vector<16x16xf32>
    %513 = arith.mulf %512, %511 : vector<16x16xf32>
    %514 = arith.addf %505, %513 : vector<16x16xf32>
    %c55_i32_321 = arith.constant 55 : i32
    %515 = arith.addi %0, %c55_i32_321 : i32
    %c2_i32_322 = arith.constant 2 : i32
    %516 = arith.addi %515, %c2_i32_322 : i32
    %517 = arith.index_cast %516 : i32 to index
    %518 = memref.load %arg2[%517] : memref<800xf32, #tpu.memory_space<smem>>
    %c0_323 = arith.constant 0 : index
    %c2_324 = arith.constant 2 : index
    %c1_325 = arith.constant 1 : index
    %c2_326 = arith.constant 2 : index
    %519 = vector.load %arg4[%c0_323, %c2_324, %c1_325, %c2_326] : memref<1x4x20x20xf32, #tpu.memory_space<vmem>>, vector<1x1x16x16xf32>
    %520 = vector.shape_cast %519 : vector<1x1x16x16xf32> to vector<16x16xf32>
    %521 = vector.broadcast %518 : f32 to vector<16x16xf32>
    %522 = arith.mulf %521, %520 : vector<16x16xf32>
    %523 = arith.addf %514, %522 : vector<16x16xf32>
    %c55_i32_327 = arith.constant 55 : i32
    %524 = arith.addi %0, %c55_i32_327 : i32
    %c3_i32_328 = arith.constant 3 : i32
    %525 = arith.addi %524, %c3_i32_328 : i32
    %526 = arith.index_cast %525 : i32 to index
    %527 = memref.load %arg2[%526] : memref<800xf32, #tpu.memory_space<smem>>
    %c0_329 = arith.constant 0 : index
    %c2_330 = arith.constant 2 : index
    %c1_331 = arith.constant 1 : index
    %c3_332 = arith.constant 3 : index
    %528 = vector.load %arg4[%c0_329, %c2_330, %c1_331, %c3_332] : memref<1x4x20x20xf32, #tpu.memory_space<vmem>>, vector<1x1x16x16xf32>
    %529 = vector.shape_cast %528 : vector<1x1x16x16xf32> to vector<16x16xf32>
    %530 = vector.broadcast %527 : f32 to vector<16x16xf32>
    %531 = arith.mulf %530, %529 : vector<16x16xf32>
    %532 = arith.addf %523, %531 : vector<16x16xf32>
    %c55_i32_333 = arith.constant 55 : i32
    %533 = arith.addi %0, %c55_i32_333 : i32
    %c4_i32_334 = arith.constant 4 : i32
    %534 = arith.addi %533, %c4_i32_334 : i32
    %535 = arith.index_cast %534 : i32 to index
    %536 = memref.load %arg2[%535] : memref<800xf32, #tpu.memory_space<smem>>
    %c0_335 = arith.constant 0 : index
    %c2_336 = arith.constant 2 : index
    %c1_337 = arith.constant 1 : index
    %c4_338 = arith.constant 4 : index
    %537 = vector.load %arg4[%c0_335, %c2_336, %c1_337, %c4_338] : memref<1x4x20x20xf32, #tpu.memory_space<vmem>>, vector<1x1x16x16xf32>
    %538 = vector.shape_cast %537 : vector<1x1x16x16xf32> to vector<16x16xf32>
    %539 = vector.broadcast %536 : f32 to vector<16x16xf32>
    %540 = arith.mulf %539, %538 : vector<16x16xf32>
    %541 = arith.addf %532, %540 : vector<16x16xf32>
    %c60_i32 = arith.constant 60 : i32
    %542 = arith.addi %0, %c60_i32 : i32
    %c0_i32_339 = arith.constant 0 : i32
    %543 = arith.addi %542, %c0_i32_339 : i32
    %544 = arith.index_cast %543 : i32 to index
    %545 = memref.load %arg2[%544] : memref<800xf32, #tpu.memory_space<smem>>
    %c0_340 = arith.constant 0 : index
    %c2_341 = arith.constant 2 : index
    %c2_342 = arith.constant 2 : index
    %c0_343 = arith.constant 0 : index
    %546 = vector.load %arg4[%c0_340, %c2_341, %c2_342, %c0_343] : memref<1x4x20x20xf32, #tpu.memory_space<vmem>>, vector<1x1x16x16xf32>
    %547 = vector.shape_cast %546 : vector<1x1x16x16xf32> to vector<16x16xf32>
    %548 = vector.broadcast %545 : f32 to vector<16x16xf32>
    %549 = arith.mulf %548, %547 : vector<16x16xf32>
    %550 = arith.addf %541, %549 : vector<16x16xf32>
    %c60_i32_344 = arith.constant 60 : i32
    %551 = arith.addi %0, %c60_i32_344 : i32
    %c1_i32_345 = arith.constant 1 : i32
    %552 = arith.addi %551, %c1_i32_345 : i32
    %553 = arith.index_cast %552 : i32 to index
    %554 = memref.load %arg2[%553] : memref<800xf32, #tpu.memory_space<smem>>
    %c0_346 = arith.constant 0 : index
    %c2_347 = arith.constant 2 : index
    %c2_348 = arith.constant 2 : index
    %c1_349 = arith.constant 1 : index
    %555 = vector.load %arg4[%c0_346, %c2_347, %c2_348, %c1_349] : memref<1x4x20x20xf32, #tpu.memory_space<vmem>>, vector<1x1x16x16xf32>
    %556 = vector.shape_cast %555 : vector<1x1x16x16xf32> to vector<16x16xf32>
    %557 = vector.broadcast %554 : f32 to vector<16x16xf32>
    %558 = arith.mulf %557, %556 : vector<16x16xf32>
    %559 = arith.addf %550, %558 : vector<16x16xf32>
    %c60_i32_350 = arith.constant 60 : i32
    %560 = arith.addi %0, %c60_i32_350 : i32
    %c2_i32_351 = arith.constant 2 : i32
    %561 = arith.addi %560, %c2_i32_351 : i32
    %562 = arith.index_cast %561 : i32 to index
    %563 = memref.load %arg2[%562] : memref<800xf32, #tpu.memory_space<smem>>
    %c0_352 = arith.constant 0 : index
    %c2_353 = arith.constant 2 : index
    %c2_354 = arith.constant 2 : index
    %c2_355 = arith.constant 2 : index
    %564 = vector.load %arg4[%c0_352, %c2_353, %c2_354, %c2_355] : memref<1x4x20x20xf32, #tpu.memory_space<vmem>>, vector<1x1x16x16xf32>
    %565 = vector.shape_cast %564 : vector<1x1x16x16xf32> to vector<16x16xf32>
    %566 = vector.broadcast %563 : f32 to vector<16x16xf32>
    %567 = arith.mulf %566, %565 : vector<16x16xf32>
    %568 = arith.addf %559, %567 : vector<16x16xf32>
    %c60_i32_356 = arith.constant 60 : i32
    %569 = arith.addi %0, %c60_i32_356 : i32
    %c3_i32_357 = arith.constant 3 : i32
    %570 = arith.addi %569, %c3_i32_357 : i32
    %571 = arith.index_cast %570 : i32 to index
    %572 = memref.load %arg2[%571] : memref<800xf32, #tpu.memory_space<smem>>
    %c0_358 = arith.constant 0 : index
    %c2_359 = arith.constant 2 : index
    %c2_360 = arith.constant 2 : index
    %c3_361 = arith.constant 3 : index
    %573 = vector.load %arg4[%c0_358, %c2_359, %c2_360, %c3_361] : memref<1x4x20x20xf32, #tpu.memory_space<vmem>>, vector<1x1x16x16xf32>
    %574 = vector.shape_cast %573 : vector<1x1x16x16xf32> to vector<16x16xf32>
    %575 = vector.broadcast %572 : f32 to vector<16x16xf32>
    %576 = arith.mulf %575, %574 : vector<16x16xf32>
    %577 = arith.addf %568, %576 : vector<16x16xf32>
    %c60_i32_362 = arith.constant 60 : i32
    %578 = arith.addi %0, %c60_i32_362 : i32
    %c4_i32_363 = arith.constant 4 : i32
    %579 = arith.addi %578, %c4_i32_363 : i32
    %580 = arith.index_cast %579 : i32 to index
    %581 = memref.load %arg2[%580] : memref<800xf32, #tpu.memory_space<smem>>
    %c0_364 = arith.constant 0 : index
    %c2_365 = arith.constant 2 : index
    %c2_366 = arith.constant 2 : index
    %c4_367 = arith.constant 4 : index
    %582 = vector.load %arg4[%c0_364, %c2_365, %c2_366, %c4_367] : memref<1x4x20x20xf32, #tpu.memory_space<vmem>>, vector<1x1x16x16xf32>
    %583 = vector.shape_cast %582 : vector<1x1x16x16xf32> to vector<16x16xf32>
    %584 = vector.broadcast %581 : f32 to vector<16x16xf32>
    %585 = arith.mulf %584, %583 : vector<16x16xf32>
    %586 = arith.addf %577, %585 : vector<16x16xf32>
    %c65_i32 = arith.constant 65 : i32
    %587 = arith.addi %0, %c65_i32 : i32
    %c0_i32_368 = arith.constant 0 : i32
    %588 = arith.addi %587, %c0_i32_368 : i32
    %589 = arith.index_cast %588 : i32 to index
    %590 = memref.load %arg2[%589] : memref<800xf32, #tpu.memory_space<smem>>
    %c0_369 = arith.constant 0 : index
    %c2_370 = arith.constant 2 : index
    %c3_371 = arith.constant 3 : index
    %c0_372 = arith.constant 0 : index
    %591 = vector.load %arg4[%c0_369, %c2_370, %c3_371, %c0_372] : memref<1x4x20x20xf32, #tpu.memory_space<vmem>>, vector<1x1x16x16xf32>
    %592 = vector.shape_cast %591 : vector<1x1x16x16xf32> to vector<16x16xf32>
    %593 = vector.broadcast %590 : f32 to vector<16x16xf32>
    %594 = arith.mulf %593, %592 : vector<16x16xf32>
    %595 = arith.addf %586, %594 : vector<16x16xf32>
    %c65_i32_373 = arith.constant 65 : i32
    %596 = arith.addi %0, %c65_i32_373 : i32
    %c1_i32_374 = arith.constant 1 : i32
    %597 = arith.addi %596, %c1_i32_374 : i32
    %598 = arith.index_cast %597 : i32 to index
    %599 = memref.load %arg2[%598] : memref<800xf32, #tpu.memory_space<smem>>
    %c0_375 = arith.constant 0 : index
    %c2_376 = arith.constant 2 : index
    %c3_377 = arith.constant 3 : index
    %c1_378 = arith.constant 1 : index
    %600 = vector.load %arg4[%c0_375, %c2_376, %c3_377, %c1_378] : memref<1x4x20x20xf32, #tpu.memory_space<vmem>>, vector<1x1x16x16xf32>
    %601 = vector.shape_cast %600 : vector<1x1x16x16xf32> to vector<16x16xf32>
    %602 = vector.broadcast %599 : f32 to vector<16x16xf32>
    %603 = arith.mulf %602, %601 : vector<16x16xf32>
    %604 = arith.addf %595, %603 : vector<16x16xf32>
    %c65_i32_379 = arith.constant 65 : i32
    %605 = arith.addi %0, %c65_i32_379 : i32
    %c2_i32_380 = arith.constant 2 : i32
    %606 = arith.addi %605, %c2_i32_380 : i32
    %607 = arith.index_cast %606 : i32 to index
    %608 = memref.load %arg2[%607] : memref<800xf32, #tpu.memory_space<smem>>
    %c0_381 = arith.constant 0 : index
    %c2_382 = arith.constant 2 : index
    %c3_383 = arith.constant 3 : index
    %c2_384 = arith.constant 2 : index
    %609 = vector.load %arg4[%c0_381, %c2_382, %c3_383, %c2_384] : memref<1x4x20x20xf32, #tpu.memory_space<vmem>>, vector<1x1x16x16xf32>
    %610 = vector.shape_cast %609 : vector<1x1x16x16xf32> to vector<16x16xf32>
    %611 = vector.broadcast %608 : f32 to vector<16x16xf32>
    %612 = arith.mulf %611, %610 : vector<16x16xf32>
    %613 = arith.addf %604, %612 : vector<16x16xf32>
    %c65_i32_385 = arith.constant 65 : i32
    %614 = arith.addi %0, %c65_i32_385 : i32
    %c3_i32_386 = arith.constant 3 : i32
    %615 = arith.addi %614, %c3_i32_386 : i32
    %616 = arith.index_cast %615 : i32 to index
    %617 = memref.load %arg2[%616] : memref<800xf32, #tpu.memory_space<smem>>
    %c0_387 = arith.constant 0 : index
    %c2_388 = arith.constant 2 : index
    %c3_389 = arith.constant 3 : index
    %c3_390 = arith.constant 3 : index
    %618 = vector.load %arg4[%c0_387, %c2_388, %c3_389, %c3_390] : memref<1x4x20x20xf32, #tpu.memory_space<vmem>>, vector<1x1x16x16xf32>
    %619 = vector.shape_cast %618 : vector<1x1x16x16xf32> to vector<16x16xf32>
    %620 = vector.broadcast %617 : f32 to vector<16x16xf32>
    %621 = arith.mulf %620, %619 : vector<16x16xf32>
    %622 = arith.addf %613, %621 : vector<16x16xf32>
    %c65_i32_391 = arith.constant 65 : i32
    %623 = arith.addi %0, %c65_i32_391 : i32
    %c4_i32_392 = arith.constant 4 : i32
    %624 = arith.addi %623, %c4_i32_392 : i32
    %625 = arith.index_cast %624 : i32 to index
    %626 = memref.load %arg2[%625] : memref<800xf32, #tpu.memory_space<smem>>
    %c0_393 = arith.constant 0 : index
    %c2_394 = arith.constant 2 : index
    %c3_395 = arith.constant 3 : index
    %c4_396 = arith.constant 4 : index
    %627 = vector.load %arg4[%c0_393, %c2_394, %c3_395, %c4_396] : memref<1x4x20x20xf32, #tpu.memory_space<vmem>>, vector<1x1x16x16xf32>
    %628 = vector.shape_cast %627 : vector<1x1x16x16xf32> to vector<16x16xf32>
    %629 = vector.broadcast %626 : f32 to vector<16x16xf32>
    %630 = arith.mulf %629, %628 : vector<16x16xf32>
    %631 = arith.addf %622, %630 : vector<16x16xf32>
    %c70_i32 = arith.constant 70 : i32
    %632 = arith.addi %0, %c70_i32 : i32
    %c0_i32_397 = arith.constant 0 : i32
    %633 = arith.addi %632, %c0_i32_397 : i32
    %634 = arith.index_cast %633 : i32 to index
    %635 = memref.load %arg2[%634] : memref<800xf32, #tpu.memory_space<smem>>
    %c0_398 = arith.constant 0 : index
    %c2_399 = arith.constant 2 : index
    %c4_400 = arith.constant 4 : index
    %c0_401 = arith.constant 0 : index
    %636 = vector.load %arg4[%c0_398, %c2_399, %c4_400, %c0_401] : memref<1x4x20x20xf32, #tpu.memory_space<vmem>>, vector<1x1x16x16xf32>
    %637 = vector.shape_cast %636 : vector<1x1x16x16xf32> to vector<16x16xf32>
    %638 = vector.broadcast %635 : f32 to vector<16x16xf32>
    %639 = arith.mulf %638, %637 : vector<16x16xf32>
    %640 = arith.addf %631, %639 : vector<16x16xf32>
    %c70_i32_402 = arith.constant 70 : i32
    %641 = arith.addi %0, %c70_i32_402 : i32
    %c1_i32_403 = arith.constant 1 : i32
    %642 = arith.addi %641, %c1_i32_403 : i32
    %643 = arith.index_cast %642 : i32 to index
    %644 = memref.load %arg2[%643] : memref<800xf32, #tpu.memory_space<smem>>
    %c0_404 = arith.constant 0 : index
    %c2_405 = arith.constant 2 : index
    %c4_406 = arith.constant 4 : index
    %c1_407 = arith.constant 1 : index
    %645 = vector.load %arg4[%c0_404, %c2_405, %c4_406, %c1_407] : memref<1x4x20x20xf32, #tpu.memory_space<vmem>>, vector<1x1x16x16xf32>
    %646 = vector.shape_cast %645 : vector<1x1x16x16xf32> to vector<16x16xf32>
    %647 = vector.broadcast %644 : f32 to vector<16x16xf32>
    %648 = arith.mulf %647, %646 : vector<16x16xf32>
    %649 = arith.addf %640, %648 : vector<16x16xf32>
    %c70_i32_408 = arith.constant 70 : i32
    %650 = arith.addi %0, %c70_i32_408 : i32
    %c2_i32_409 = arith.constant 2 : i32
    %651 = arith.addi %650, %c2_i32_409 : i32
    %652 = arith.index_cast %651 : i32 to index
    %653 = memref.load %arg2[%652] : memref<800xf32, #tpu.memory_space<smem>>
    %c0_410 = arith.constant 0 : index
    %c2_411 = arith.constant 2 : index
    %c4_412 = arith.constant 4 : index
    %c2_413 = arith.constant 2 : index
    %654 = vector.load %arg4[%c0_410, %c2_411, %c4_412, %c2_413] : memref<1x4x20x20xf32, #tpu.memory_space<vmem>>, vector<1x1x16x16xf32>
    %655 = vector.shape_cast %654 : vector<1x1x16x16xf32> to vector<16x16xf32>
    %656 = vector.broadcast %653 : f32 to vector<16x16xf32>
    %657 = arith.mulf %656, %655 : vector<16x16xf32>
    %658 = arith.addf %649, %657 : vector<16x16xf32>
    %c70_i32_414 = arith.constant 70 : i32
    %659 = arith.addi %0, %c70_i32_414 : i32
    %c3_i32_415 = arith.constant 3 : i32
    %660 = arith.addi %659, %c3_i32_415 : i32
    %661 = arith.index_cast %660 : i32 to index
    %662 = memref.load %arg2[%661] : memref<800xf32, #tpu.memory_space<smem>>
    %c0_416 = arith.constant 0 : index
    %c2_417 = arith.constant 2 : index
    %c4_418 = arith.constant 4 : index
    %c3_419 = arith.constant 3 : index
    %663 = vector.load %arg4[%c0_416, %c2_417, %c4_418, %c3_419] : memref<1x4x20x20xf32, #tpu.memory_space<vmem>>, vector<1x1x16x16xf32>
    %664 = vector.shape_cast %663 : vector<1x1x16x16xf32> to vector<16x16xf32>
    %665 = vector.broadcast %662 : f32 to vector<16x16xf32>
    %666 = arith.mulf %665, %664 : vector<16x16xf32>
    %667 = arith.addf %658, %666 : vector<16x16xf32>
    %c70_i32_420 = arith.constant 70 : i32
    %668 = arith.addi %0, %c70_i32_420 : i32
    %c4_i32_421 = arith.constant 4 : i32
    %669 = arith.addi %668, %c4_i32_421 : i32
    %670 = arith.index_cast %669 : i32 to index
    %671 = memref.load %arg2[%670] : memref<800xf32, #tpu.memory_space<smem>>
    %c0_422 = arith.constant 0 : index
    %c2_423 = arith.constant 2 : index
    %c4_424 = arith.constant 4 : index
    %c4_425 = arith.constant 4 : index
    %672 = vector.load %arg4[%c0_422, %c2_423, %c4_424, %c4_425] : memref<1x4x20x20xf32, #tpu.memory_space<vmem>>, vector<1x1x16x16xf32>
    %673 = vector.shape_cast %672 : vector<1x1x16x16xf32> to vector<16x16xf32>
    %674 = vector.broadcast %671 : f32 to vector<16x16xf32>
    %675 = arith.mulf %674, %673 : vector<16x16xf32>
    %676 = arith.addf %667, %675 : vector<16x16xf32>
    %c75_i32 = arith.constant 75 : i32
    %677 = arith.addi %0, %c75_i32 : i32
    %c0_i32_426 = arith.constant 0 : i32
    %678 = arith.addi %677, %c0_i32_426 : i32
    %679 = arith.index_cast %678 : i32 to index
    %680 = memref.load %arg2[%679] : memref<800xf32, #tpu.memory_space<smem>>
    %c0_427 = arith.constant 0 : index
    %c3_428 = arith.constant 3 : index
    %c0_429 = arith.constant 0 : index
    %c0_430 = arith.constant 0 : index
    %681 = vector.load %arg4[%c0_427, %c3_428, %c0_429, %c0_430] : memref<1x4x20x20xf32, #tpu.memory_space<vmem>>, vector<1x1x16x16xf32>
    %682 = vector.shape_cast %681 : vector<1x1x16x16xf32> to vector<16x16xf32>
    %683 = vector.broadcast %680 : f32 to vector<16x16xf32>
    %684 = arith.mulf %683, %682 : vector<16x16xf32>
    %685 = arith.addf %676, %684 : vector<16x16xf32>
    %c75_i32_431 = arith.constant 75 : i32
    %686 = arith.addi %0, %c75_i32_431 : i32
    %c1_i32_432 = arith.constant 1 : i32
    %687 = arith.addi %686, %c1_i32_432 : i32
    %688 = arith.index_cast %687 : i32 to index
    %689 = memref.load %arg2[%688] : memref<800xf32, #tpu.memory_space<smem>>
    %c0_433 = arith.constant 0 : index
    %c3_434 = arith.constant 3 : index
    %c0_435 = arith.constant 0 : index
    %c1_436 = arith.constant 1 : index
    %690 = vector.load %arg4[%c0_433, %c3_434, %c0_435, %c1_436] : memref<1x4x20x20xf32, #tpu.memory_space<vmem>>, vector<1x1x16x16xf32>
    %691 = vector.shape_cast %690 : vector<1x1x16x16xf32> to vector<16x16xf32>
    %692 = vector.broadcast %689 : f32 to vector<16x16xf32>
    %693 = arith.mulf %692, %691 : vector<16x16xf32>
    %694 = arith.addf %685, %693 : vector<16x16xf32>
    %c75_i32_437 = arith.constant 75 : i32
    %695 = arith.addi %0, %c75_i32_437 : i32
    %c2_i32_438 = arith.constant 2 : i32
    %696 = arith.addi %695, %c2_i32_438 : i32
    %697 = arith.index_cast %696 : i32 to index
    %698 = memref.load %arg2[%697] : memref<800xf32, #tpu.memory_space<smem>>
    %c0_439 = arith.constant 0 : index
    %c3_440 = arith.constant 3 : index
    %c0_441 = arith.constant 0 : index
    %c2_442 = arith.constant 2 : index
    %699 = vector.load %arg4[%c0_439, %c3_440, %c0_441, %c2_442] : memref<1x4x20x20xf32, #tpu.memory_space<vmem>>, vector<1x1x16x16xf32>
    %700 = vector.shape_cast %699 : vector<1x1x16x16xf32> to vector<16x16xf32>
    %701 = vector.broadcast %698 : f32 to vector<16x16xf32>
    %702 = arith.mulf %701, %700 : vector<16x16xf32>
    %703 = arith.addf %694, %702 : vector<16x16xf32>
    %c75_i32_443 = arith.constant 75 : i32
    %704 = arith.addi %0, %c75_i32_443 : i32
    %c3_i32_444 = arith.constant 3 : i32
    %705 = arith.addi %704, %c3_i32_444 : i32
    %706 = arith.index_cast %705 : i32 to index
    %707 = memref.load %arg2[%706] : memref<800xf32, #tpu.memory_space<smem>>
    %c0_445 = arith.constant 0 : index
    %c3_446 = arith.constant 3 : index
    %c0_447 = arith.constant 0 : index
    %c3_448 = arith.constant 3 : index
    %708 = vector.load %arg4[%c0_445, %c3_446, %c0_447, %c3_448] : memref<1x4x20x20xf32, #tpu.memory_space<vmem>>, vector<1x1x16x16xf32>
    %709 = vector.shape_cast %708 : vector<1x1x16x16xf32> to vector<16x16xf32>
    %710 = vector.broadcast %707 : f32 to vector<16x16xf32>
    %711 = arith.mulf %710, %709 : vector<16x16xf32>
    %712 = arith.addf %703, %711 : vector<16x16xf32>
    %c75_i32_449 = arith.constant 75 : i32
    %713 = arith.addi %0, %c75_i32_449 : i32
    %c4_i32_450 = arith.constant 4 : i32
    %714 = arith.addi %713, %c4_i32_450 : i32
    %715 = arith.index_cast %714 : i32 to index
    %716 = memref.load %arg2[%715] : memref<800xf32, #tpu.memory_space<smem>>
    %c0_451 = arith.constant 0 : index
    %c3_452 = arith.constant 3 : index
    %c0_453 = arith.constant 0 : index
    %c4_454 = arith.constant 4 : index
    %717 = vector.load %arg4[%c0_451, %c3_452, %c0_453, %c4_454] : memref<1x4x20x20xf32, #tpu.memory_space<vmem>>, vector<1x1x16x16xf32>
    %718 = vector.shape_cast %717 : vector<1x1x16x16xf32> to vector<16x16xf32>
    %719 = vector.broadcast %716 : f32 to vector<16x16xf32>
    %720 = arith.mulf %719, %718 : vector<16x16xf32>
    %721 = arith.addf %712, %720 : vector<16x16xf32>
    %c80_i32 = arith.constant 80 : i32
    %722 = arith.addi %0, %c80_i32 : i32
    %c0_i32_455 = arith.constant 0 : i32
    %723 = arith.addi %722, %c0_i32_455 : i32
    %724 = arith.index_cast %723 : i32 to index
    %725 = memref.load %arg2[%724] : memref<800xf32, #tpu.memory_space<smem>>
    %c0_456 = arith.constant 0 : index
    %c3_457 = arith.constant 3 : index
    %c1_458 = arith.constant 1 : index
    %c0_459 = arith.constant 0 : index
    %726 = vector.load %arg4[%c0_456, %c3_457, %c1_458, %c0_459] : memref<1x4x20x20xf32, #tpu.memory_space<vmem>>, vector<1x1x16x16xf32>
    %727 = vector.shape_cast %726 : vector<1x1x16x16xf32> to vector<16x16xf32>
    %728 = vector.broadcast %725 : f32 to vector<16x16xf32>
    %729 = arith.mulf %728, %727 : vector<16x16xf32>
    %730 = arith.addf %721, %729 : vector<16x16xf32>
    %c80_i32_460 = arith.constant 80 : i32
    %731 = arith.addi %0, %c80_i32_460 : i32
    %c1_i32_461 = arith.constant 1 : i32
    %732 = arith.addi %731, %c1_i32_461 : i32
    %733 = arith.index_cast %732 : i32 to index
    %734 = memref.load %arg2[%733] : memref<800xf32, #tpu.memory_space<smem>>
    %c0_462 = arith.constant 0 : index
    %c3_463 = arith.constant 3 : index
    %c1_464 = arith.constant 1 : index
    %c1_465 = arith.constant 1 : index
    %735 = vector.load %arg4[%c0_462, %c3_463, %c1_464, %c1_465] : memref<1x4x20x20xf32, #tpu.memory_space<vmem>>, vector<1x1x16x16xf32>
    %736 = vector.shape_cast %735 : vector<1x1x16x16xf32> to vector<16x16xf32>
    %737 = vector.broadcast %734 : f32 to vector<16x16xf32>
    %738 = arith.mulf %737, %736 : vector<16x16xf32>
    %739 = arith.addf %730, %738 : vector<16x16xf32>
    %c80_i32_466 = arith.constant 80 : i32
    %740 = arith.addi %0, %c80_i32_466 : i32
    %c2_i32_467 = arith.constant 2 : i32
    %741 = arith.addi %740, %c2_i32_467 : i32
    %742 = arith.index_cast %741 : i32 to index
    %743 = memref.load %arg2[%742] : memref<800xf32, #tpu.memory_space<smem>>
    %c0_468 = arith.constant 0 : index
    %c3_469 = arith.constant 3 : index
    %c1_470 = arith.constant 1 : index
    %c2_471 = arith.constant 2 : index
    %744 = vector.load %arg4[%c0_468, %c3_469, %c1_470, %c2_471] : memref<1x4x20x20xf32, #tpu.memory_space<vmem>>, vector<1x1x16x16xf32>
    %745 = vector.shape_cast %744 : vector<1x1x16x16xf32> to vector<16x16xf32>
    %746 = vector.broadcast %743 : f32 to vector<16x16xf32>
    %747 = arith.mulf %746, %745 : vector<16x16xf32>
    %748 = arith.addf %739, %747 : vector<16x16xf32>
    %c80_i32_472 = arith.constant 80 : i32
    %749 = arith.addi %0, %c80_i32_472 : i32
    %c3_i32_473 = arith.constant 3 : i32
    %750 = arith.addi %749, %c3_i32_473 : i32
    %751 = arith.index_cast %750 : i32 to index
    %752 = memref.load %arg2[%751] : memref<800xf32, #tpu.memory_space<smem>>
    %c0_474 = arith.constant 0 : index
    %c3_475 = arith.constant 3 : index
    %c1_476 = arith.constant 1 : index
    %c3_477 = arith.constant 3 : index
    %753 = vector.load %arg4[%c0_474, %c3_475, %c1_476, %c3_477] : memref<1x4x20x20xf32, #tpu.memory_space<vmem>>, vector<1x1x16x16xf32>
    %754 = vector.shape_cast %753 : vector<1x1x16x16xf32> to vector<16x16xf32>
    %755 = vector.broadcast %752 : f32 to vector<16x16xf32>
    %756 = arith.mulf %755, %754 : vector<16x16xf32>
    %757 = arith.addf %748, %756 : vector<16x16xf32>
    %c80_i32_478 = arith.constant 80 : i32
    %758 = arith.addi %0, %c80_i32_478 : i32
    %c4_i32_479 = arith.constant 4 : i32
    %759 = arith.addi %758, %c4_i32_479 : i32
    %760 = arith.index_cast %759 : i32 to index
    %761 = memref.load %arg2[%760] : memref<800xf32, #tpu.memory_space<smem>>
    %c0_480 = arith.constant 0 : index
    %c3_481 = arith.constant 3 : index
    %c1_482 = arith.constant 1 : index
    %c4_483 = arith.constant 4 : index
    %762 = vector.load %arg4[%c0_480, %c3_481, %c1_482, %c4_483] : memref<1x4x20x20xf32, #tpu.memory_space<vmem>>, vector<1x1x16x16xf32>
    %763 = vector.shape_cast %762 : vector<1x1x16x16xf32> to vector<16x16xf32>
    %764 = vector.broadcast %761 : f32 to vector<16x16xf32>
    %765 = arith.mulf %764, %763 : vector<16x16xf32>
    %766 = arith.addf %757, %765 : vector<16x16xf32>
    %c85_i32 = arith.constant 85 : i32
    %767 = arith.addi %0, %c85_i32 : i32
    %c0_i32_484 = arith.constant 0 : i32
    %768 = arith.addi %767, %c0_i32_484 : i32
    %769 = arith.index_cast %768 : i32 to index
    %770 = memref.load %arg2[%769] : memref<800xf32, #tpu.memory_space<smem>>
    %c0_485 = arith.constant 0 : index
    %c3_486 = arith.constant 3 : index
    %c2_487 = arith.constant 2 : index
    %c0_488 = arith.constant 0 : index
    %771 = vector.load %arg4[%c0_485, %c3_486, %c2_487, %c0_488] : memref<1x4x20x20xf32, #tpu.memory_space<vmem>>, vector<1x1x16x16xf32>
    %772 = vector.shape_cast %771 : vector<1x1x16x16xf32> to vector<16x16xf32>
    %773 = vector.broadcast %770 : f32 to vector<16x16xf32>
    %774 = arith.mulf %773, %772 : vector<16x16xf32>
    %775 = arith.addf %766, %774 : vector<16x16xf32>
    %c85_i32_489 = arith.constant 85 : i32
    %776 = arith.addi %0, %c85_i32_489 : i32
    %c1_i32_490 = arith.constant 1 : i32
    %777 = arith.addi %776, %c1_i32_490 : i32
    %778 = arith.index_cast %777 : i32 to index
    %779 = memref.load %arg2[%778] : memref<800xf32, #tpu.memory_space<smem>>
    %c0_491 = arith.constant 0 : index
    %c3_492 = arith.constant 3 : index
    %c2_493 = arith.constant 2 : index
    %c1_494 = arith.constant 1 : index
    %780 = vector.load %arg4[%c0_491, %c3_492, %c2_493, %c1_494] : memref<1x4x20x20xf32, #tpu.memory_space<vmem>>, vector<1x1x16x16xf32>
    %781 = vector.shape_cast %780 : vector<1x1x16x16xf32> to vector<16x16xf32>
    %782 = vector.broadcast %779 : f32 to vector<16x16xf32>
    %783 = arith.mulf %782, %781 : vector<16x16xf32>
    %784 = arith.addf %775, %783 : vector<16x16xf32>
    %c85_i32_495 = arith.constant 85 : i32
    %785 = arith.addi %0, %c85_i32_495 : i32
    %c2_i32_496 = arith.constant 2 : i32
    %786 = arith.addi %785, %c2_i32_496 : i32
    %787 = arith.index_cast %786 : i32 to index
    %788 = memref.load %arg2[%787] : memref<800xf32, #tpu.memory_space<smem>>
    %c0_497 = arith.constant 0 : index
    %c3_498 = arith.constant 3 : index
    %c2_499 = arith.constant 2 : index
    %c2_500 = arith.constant 2 : index
    %789 = vector.load %arg4[%c0_497, %c3_498, %c2_499, %c2_500] : memref<1x4x20x20xf32, #tpu.memory_space<vmem>>, vector<1x1x16x16xf32>
    %790 = vector.shape_cast %789 : vector<1x1x16x16xf32> to vector<16x16xf32>
    %791 = vector.broadcast %788 : f32 to vector<16x16xf32>
    %792 = arith.mulf %791, %790 : vector<16x16xf32>
    %793 = arith.addf %784, %792 : vector<16x16xf32>
    %c85_i32_501 = arith.constant 85 : i32
    %794 = arith.addi %0, %c85_i32_501 : i32
    %c3_i32_502 = arith.constant 3 : i32
    %795 = arith.addi %794, %c3_i32_502 : i32
    %796 = arith.index_cast %795 : i32 to index
    %797 = memref.load %arg2[%796] : memref<800xf32, #tpu.memory_space<smem>>
    %c0_503 = arith.constant 0 : index
    %c3_504 = arith.constant 3 : index
    %c2_505 = arith.constant 2 : index
    %c3_506 = arith.constant 3 : index
    %798 = vector.load %arg4[%c0_503, %c3_504, %c2_505, %c3_506] : memref<1x4x20x20xf32, #tpu.memory_space<vmem>>, vector<1x1x16x16xf32>
    %799 = vector.shape_cast %798 : vector<1x1x16x16xf32> to vector<16x16xf32>
    %800 = vector.broadcast %797 : f32 to vector<16x16xf32>
    %801 = arith.mulf %800, %799 : vector<16x16xf32>
    %802 = arith.addf %793, %801 : vector<16x16xf32>
    %c85_i32_507 = arith.constant 85 : i32
    %803 = arith.addi %0, %c85_i32_507 : i32
    %c4_i32_508 = arith.constant 4 : i32
    %804 = arith.addi %803, %c4_i32_508 : i32
    %805 = arith.index_cast %804 : i32 to index
    %806 = memref.load %arg2[%805] : memref<800xf32, #tpu.memory_space<smem>>
    %c0_509 = arith.constant 0 : index
    %c3_510 = arith.constant 3 : index
    %c2_511 = arith.constant 2 : index
    %c4_512 = arith.constant 4 : index
    %807 = vector.load %arg4[%c0_509, %c3_510, %c2_511, %c4_512] : memref<1x4x20x20xf32, #tpu.memory_space<vmem>>, vector<1x1x16x16xf32>
    %808 = vector.shape_cast %807 : vector<1x1x16x16xf32> to vector<16x16xf32>
    %809 = vector.broadcast %806 : f32 to vector<16x16xf32>
    %810 = arith.mulf %809, %808 : vector<16x16xf32>
    %811 = arith.addf %802, %810 : vector<16x16xf32>
    %c90_i32 = arith.constant 90 : i32
    %812 = arith.addi %0, %c90_i32 : i32
    %c0_i32_513 = arith.constant 0 : i32
    %813 = arith.addi %812, %c0_i32_513 : i32
    %814 = arith.index_cast %813 : i32 to index
    %815 = memref.load %arg2[%814] : memref<800xf32, #tpu.memory_space<smem>>
    %c0_514 = arith.constant 0 : index
    %c3_515 = arith.constant 3 : index
    %c3_516 = arith.constant 3 : index
    %c0_517 = arith.constant 0 : index
    %816 = vector.load %arg4[%c0_514, %c3_515, %c3_516, %c0_517] : memref<1x4x20x20xf32, #tpu.memory_space<vmem>>, vector<1x1x16x16xf32>
    %817 = vector.shape_cast %816 : vector<1x1x16x16xf32> to vector<16x16xf32>
    %818 = vector.broadcast %815 : f32 to vector<16x16xf32>
    %819 = arith.mulf %818, %817 : vector<16x16xf32>
    %820 = arith.addf %811, %819 : vector<16x16xf32>
    %c90_i32_518 = arith.constant 90 : i32
    %821 = arith.addi %0, %c90_i32_518 : i32
    %c1_i32_519 = arith.constant 1 : i32
    %822 = arith.addi %821, %c1_i32_519 : i32
    %823 = arith.index_cast %822 : i32 to index
    %824 = memref.load %arg2[%823] : memref<800xf32, #tpu.memory_space<smem>>
    %c0_520 = arith.constant 0 : index
    %c3_521 = arith.constant 3 : index
    %c3_522 = arith.constant 3 : index
    %c1_523 = arith.constant 1 : index
    %825 = vector.load %arg4[%c0_520, %c3_521, %c3_522, %c1_523] : memref<1x4x20x20xf32, #tpu.memory_space<vmem>>, vector<1x1x16x16xf32>
    %826 = vector.shape_cast %825 : vector<1x1x16x16xf32> to vector<16x16xf32>
    %827 = vector.broadcast %824 : f32 to vector<16x16xf32>
    %828 = arith.mulf %827, %826 : vector<16x16xf32>
    %829 = arith.addf %820, %828 : vector<16x16xf32>
    %c90_i32_524 = arith.constant 90 : i32
    %830 = arith.addi %0, %c90_i32_524 : i32
    %c2_i32_525 = arith.constant 2 : i32
    %831 = arith.addi %830, %c2_i32_525 : i32
    %832 = arith.index_cast %831 : i32 to index
    %833 = memref.load %arg2[%832] : memref<800xf32, #tpu.memory_space<smem>>
    %c0_526 = arith.constant 0 : index
    %c3_527 = arith.constant 3 : index
    %c3_528 = arith.constant 3 : index
    %c2_529 = arith.constant 2 : index
    %834 = vector.load %arg4[%c0_526, %c3_527, %c3_528, %c2_529] : memref<1x4x20x20xf32, #tpu.memory_space<vmem>>, vector<1x1x16x16xf32>
    %835 = vector.shape_cast %834 : vector<1x1x16x16xf32> to vector<16x16xf32>
    %836 = vector.broadcast %833 : f32 to vector<16x16xf32>
    %837 = arith.mulf %836, %835 : vector<16x16xf32>
    %838 = arith.addf %829, %837 : vector<16x16xf32>
    %c90_i32_530 = arith.constant 90 : i32
    %839 = arith.addi %0, %c90_i32_530 : i32
    %c3_i32_531 = arith.constant 3 : i32
    %840 = arith.addi %839, %c3_i32_531 : i32
    %841 = arith.index_cast %840 : i32 to index
    %842 = memref.load %arg2[%841] : memref<800xf32, #tpu.memory_space<smem>>
    %c0_532 = arith.constant 0 : index
    %c3_533 = arith.constant 3 : index
    %c3_534 = arith.constant 3 : index
    %c3_535 = arith.constant 3 : index
    %843 = vector.load %arg4[%c0_532, %c3_533, %c3_534, %c3_535] : memref<1x4x20x20xf32, #tpu.memory_space<vmem>>, vector<1x1x16x16xf32>
    %844 = vector.shape_cast %843 : vector<1x1x16x16xf32> to vector<16x16xf32>
    %845 = vector.broadcast %842 : f32 to vector<16x16xf32>
    %846 = arith.mulf %845, %844 : vector<16x16xf32>
    %847 = arith.addf %838, %846 : vector<16x16xf32>
    %c90_i32_536 = arith.constant 90 : i32
    %848 = arith.addi %0, %c90_i32_536 : i32
    %c4_i32_537 = arith.constant 4 : i32
    %849 = arith.addi %848, %c4_i32_537 : i32
    %850 = arith.index_cast %849 : i32 to index
    %851 = memref.load %arg2[%850] : memref<800xf32, #tpu.memory_space<smem>>
    %c0_538 = arith.constant 0 : index
    %c3_539 = arith.constant 3 : index
    %c3_540 = arith.constant 3 : index
    %c4_541 = arith.constant 4 : index
    %852 = vector.load %arg4[%c0_538, %c3_539, %c3_540, %c4_541] : memref<1x4x20x20xf32, #tpu.memory_space<vmem>>, vector<1x1x16x16xf32>
    %853 = vector.shape_cast %852 : vector<1x1x16x16xf32> to vector<16x16xf32>
    %854 = vector.broadcast %851 : f32 to vector<16x16xf32>
    %855 = arith.mulf %854, %853 : vector<16x16xf32>
    %856 = arith.addf %847, %855 : vector<16x16xf32>
    %c95_i32 = arith.constant 95 : i32
    %857 = arith.addi %0, %c95_i32 : i32
    %c0_i32_542 = arith.constant 0 : i32
    %858 = arith.addi %857, %c0_i32_542 : i32
    %859 = arith.index_cast %858 : i32 to index
    %860 = memref.load %arg2[%859] : memref<800xf32, #tpu.memory_space<smem>>
    %c0_543 = arith.constant 0 : index
    %c3_544 = arith.constant 3 : index
    %c4_545 = arith.constant 4 : index
    %c0_546 = arith.constant 0 : index
    %861 = vector.load %arg4[%c0_543, %c3_544, %c4_545, %c0_546] : memref<1x4x20x20xf32, #tpu.memory_space<vmem>>, vector<1x1x16x16xf32>
    %862 = vector.shape_cast %861 : vector<1x1x16x16xf32> to vector<16x16xf32>
    %863 = vector.broadcast %860 : f32 to vector<16x16xf32>
    %864 = arith.mulf %863, %862 : vector<16x16xf32>
    %865 = arith.addf %856, %864 : vector<16x16xf32>
    %c95_i32_547 = arith.constant 95 : i32
    %866 = arith.addi %0, %c95_i32_547 : i32
    %c1_i32_548 = arith.constant 1 : i32
    %867 = arith.addi %866, %c1_i32_548 : i32
    %868 = arith.index_cast %867 : i32 to index
    %869 = memref.load %arg2[%868] : memref<800xf32, #tpu.memory_space<smem>>
    %c0_549 = arith.constant 0 : index
    %c3_550 = arith.constant 3 : index
    %c4_551 = arith.constant 4 : index
    %c1_552 = arith.constant 1 : index
    %870 = vector.load %arg4[%c0_549, %c3_550, %c4_551, %c1_552] : memref<1x4x20x20xf32, #tpu.memory_space<vmem>>, vector<1x1x16x16xf32>
    %871 = vector.shape_cast %870 : vector<1x1x16x16xf32> to vector<16x16xf32>
    %872 = vector.broadcast %869 : f32 to vector<16x16xf32>
    %873 = arith.mulf %872, %871 : vector<16x16xf32>
    %874 = arith.addf %865, %873 : vector<16x16xf32>
    %c95_i32_553 = arith.constant 95 : i32
    %875 = arith.addi %0, %c95_i32_553 : i32
    %c2_i32_554 = arith.constant 2 : i32
    %876 = arith.addi %875, %c2_i32_554 : i32
    %877 = arith.index_cast %876 : i32 to index
    %878 = memref.load %arg2[%877] : memref<800xf32, #tpu.memory_space<smem>>
    %c0_555 = arith.constant 0 : index
    %c3_556 = arith.constant 3 : index
    %c4_557 = arith.constant 4 : index
    %c2_558 = arith.constant 2 : index
    %879 = vector.load %arg4[%c0_555, %c3_556, %c4_557, %c2_558] : memref<1x4x20x20xf32, #tpu.memory_space<vmem>>, vector<1x1x16x16xf32>
    %880 = vector.shape_cast %879 : vector<1x1x16x16xf32> to vector<16x16xf32>
    %881 = vector.broadcast %878 : f32 to vector<16x16xf32>
    %882 = arith.mulf %881, %880 : vector<16x16xf32>
    %883 = arith.addf %874, %882 : vector<16x16xf32>
    %c95_i32_559 = arith.constant 95 : i32
    %884 = arith.addi %0, %c95_i32_559 : i32
    %c3_i32_560 = arith.constant 3 : i32
    %885 = arith.addi %884, %c3_i32_560 : i32
    %886 = arith.index_cast %885 : i32 to index
    %887 = memref.load %arg2[%886] : memref<800xf32, #tpu.memory_space<smem>>
    %c0_561 = arith.constant 0 : index
    %c3_562 = arith.constant 3 : index
    %c4_563 = arith.constant 4 : index
    %c3_564 = arith.constant 3 : index
    %888 = vector.load %arg4[%c0_561, %c3_562, %c4_563, %c3_564] : memref<1x4x20x20xf32, #tpu.memory_space<vmem>>, vector<1x1x16x16xf32>
    %889 = vector.shape_cast %888 : vector<1x1x16x16xf32> to vector<16x16xf32>
    %890 = vector.broadcast %887 : f32 to vector<16x16xf32>
    %891 = arith.mulf %890, %889 : vector<16x16xf32>
    %892 = arith.addf %883, %891 : vector<16x16xf32>
    %c95_i32_565 = arith.constant 95 : i32
    %893 = arith.addi %0, %c95_i32_565 : i32
    %c4_i32_566 = arith.constant 4 : i32
    %894 = arith.addi %893, %c4_i32_566 : i32
    %895 = arith.index_cast %894 : i32 to index
    %896 = memref.load %arg2[%895] : memref<800xf32, #tpu.memory_space<smem>>
    %c0_567 = arith.constant 0 : index
    %c3_568 = arith.constant 3 : index
    %c4_569 = arith.constant 4 : index
    %c4_570 = arith.constant 4 : index
    %897 = vector.load %arg4[%c0_567, %c3_568, %c4_569, %c4_570] : memref<1x4x20x20xf32, #tpu.memory_space<vmem>>, vector<1x1x16x16xf32>
    %898 = vector.shape_cast %897 : vector<1x1x16x16xf32> to vector<16x16xf32>
    %899 = vector.broadcast %896 : f32 to vector<16x16xf32>
    %900 = arith.mulf %899, %898 : vector<16x16xf32>
    %901 = arith.addf %892, %900 : vector<16x16xf32>
    %902 = arith.index_cast %arg1 : i32 to index
    %903 = memref.load %arg3[%902] : memref<8xf32, #tpu.memory_space<smem>>
    %904 = vector.broadcast %903 : f32 to vector<16x16xf32>
    %905 = arith.addf %901, %904 : vector<16x16xf32>
    %c0_571 = arith.constant 0 : index
    %c0_572 = arith.constant 0 : index
    %c0_573 = arith.constant 0 : index
    %c0_574 = arith.constant 0 : index
    %906 = vector.load %arg5[%c0_571, %c0_572, %c0_573, %c0_574] : memref<1x1x16x16xf32, #tpu.memory_space<vmem>>, vector<1x1x16x16xf32>
    %907 = vector.shape_cast %906 : vector<1x1x16x16xf32> to vector<16x16xf32>
    %908 = vector.shape_cast %905 : vector<16x16xf32> to vector<1x1x16x16xf32>
    tpu.vector_store %arg5[%c0_571, %c0_572, %c0_573, %c0_574], %908 {strides = array<i32>} : memref<1x1x16x16xf32, #tpu.memory_space<vmem>>, vector<1x1x16x16xf32>,
    return
  }
  func.func @transform_0(%arg0: i32, %arg1: i32) -> i32 {
    %c0_i32 = arith.constant 0 : i32
    %c0_i32_0 = arith.constant 0 : i32
    return %c0_i32 : i32
  }
  func.func @transform_1(%arg0: i32, %arg1: i32) -> i32 {
    %c0_i32 = arith.constant 0 : i32
    %c0_i32_0 = arith.constant 0 : i32
    return %c0_i32 : i32
  }
  func.func @transform_2(%arg0: i32, %arg1: i32) -> (i32, i32, i32, i32) {
    %c0_i32 = arith.constant 0 : i32
    %c0_i32_0 = arith.constant 0 : i32
    %c0_i32_1 = arith.constant 0 : i32
    %c0_i32_2 = arith.constant 0 : i32
    return %arg0, %c0_i32, %c0_i32_0, %c0_i32_1 : i32, i32, i32, i32
  }
  func.func @transform_3(%arg0: i32, %arg1: i32) -> (i32, i32, i32, i32) {
    %c0_i32 = arith.constant 0 : i32
    %c0_i32_0 = arith.constant 0 : i32
    %c0_i32_1 = arith.constant 0 : i32
    return %arg0, %arg1, %c0_i32, %c0_i32_0 : i32, i32, i32, i32
  }
}

</mosaic_0001>

<bundles_post_ra>
// kernel: tpu_custom_call.1
= control target key start
LH: loop header
LB: loop body
LE: loop exit
PB: predicated region body
PF: predicated region fallthrough
CT: control target
= control target key end

     0   :  { %8 = vsyncpa [#allocation4], 0  ;;  %s2996_s0 = inlined_call_operand.vmem [shape: f32[800], index: 0, kind: input, shape index: {}]   ;;  %s2997_s1 = inlined_call_operand.vmem [shape: f32[8], index: 1, kind: input, shape index: {}]   ;;  %s2998_s2 = inlined_call_operand.vmem [shape: f32[2,4,20,20], index: 2, kind: input, shape index: {}]   ;;  %s2999_s3 = inlined_call_operand.hbm [shape: f32[2,8,16,16], index: 3, kind: output, shape index: {}]  }
   0x1   :  { %9 = vsyncpa [#allocation6], 0 }
   0x2   :  { %10 = vsyncpa [#allocation3], 0 }
   0x3   :  { %12 = vsyncpa [#allocation3 + $0x1], 0  ;;  %s2021_s12 = smov 0   ;;  %s2023_s13 = smov 0  }
   0x4   :  { %s2025_s14 = smov 0   ;;  %s2027_s15 = smov 0  }
   0x5   :  { %s2029_s16 = smov 0   ;;  %s2031_s17 = smov 0  }
   0x6   :  { %s2033_s18 = smov 0   ;;  %s2035_s19 = smov 0  }
   0x7 LB: > { %s1714_s20 = sadd.s32 4294967295, %s1990_s19   ;;  %s1715_s21 = sadd.s32 4294967294, %s1990_s19   ;;  %s1990_s19 = sphi %s2035_s19, %s18_s19   ;;  %s1986_s18 = sphi %s2033_s18, %s3022_s18   ;;  %s1982_s17 = sphi %s2031_s17, %s3021_s17   ;;  %s1978_s16 = sphi %s2029_s16, %s3020_s16   ;;  %s1974_s15 = sphi %s2027_s15, %s3019_s15   ;;  %s1970_s14 = sphi %s2025_s14, %s3018_s14   ;;  %s1966_s13 = sphi %s2023_s13, %s3017_s13   ;;  %s1962_s12 = sphi %s2021_s12, %s3016_s12  }
   0x8   : > { %s27_s22 = sadd.s32 1, %s1982_s17  ;;  %s30_s23 = sadd.s32 1, %s1986_s18 }
   0x9   : > { %p28_p0 = scmp.ge.s32.totalorder %s27_s22, 8  ;;  %s107_s24 = sadd.s32 1, %s1970_s14 }
   0xa   : > { %p117_p1 = scmp.ne.s32.totalorder %s1970_s14, %s1966_s13  ;;  %p118_p2 = scmp.eq.s32.totalorder %s1714_s20, 15 }
   0xb   : > { %s3024_s22 = smov (%p28_p0, %s27_s22), 0  ;;  %s3026_s23 = smov (!%p28_p0, %s30_s23), %s1986_s18 }
   0xc   : > { %s103_s25 = ssub.s32 %s1982_s17, %s3024_s22  ;;  %p2073_p3 = por %p118_p2, %p117_p1 }
   0xd   : > { %p32_p4 = scmp.ge.s32.totalorder %s3026_s23, 2  ;;  %p123_p5 = scmp.ne.s32.totalorder %s1966_s13, %s1962_s12 }
   0xe   : > { %s3006_s26 = scalar_select %p2073_p3, 1, 0 }
   0xf   : > { %p124_p6 = scmp.eq.s32.totalorder %s1715_s21, 15  ;;  %p1716_p7 = scmp.ge.s32.totalorder %s1990_s19, 1 }
  0x10   : > { %s3028_s23 = smov (%p32_p4, %s3026_s23), 0  ;;  %p131_p9 = scmp.lt.s32.totalorder %s1990_s19, 17 }
  0x11   : > { %p2082_p8 = por %p124_p6, %p123_p5  ;;  %s102_s28 = ssub.s32 %s1986_s18, %s3028_s23 }
  0x12   : > { %s104_s29 = sor.u32 %s103_s25, %s102_s28  ;;  %p2089_p10 = pnand %p1716_p7, %p131_p9 }
  0x13   : > { %s3007_s27 = scalar_select %p2082_p8, 1, 0 }
  0x14   : > { %s3008_s30 = scalar_select %p2089_p10, 1, 0 }
  0x15   : > { %p105_p11 = scmp.eq.s32.totalorder %s104_s29, 0  ;;  %p2093_p12 = scmp.eq.s32.totalorder %s1714_s20, 0 }
  0x16   : > { %p1772_p13 = pneg %p2089_p10  ;;  %s144_s7 = sshll.u32 %s2996_s0, 4  ;;  %s145_s7 = int_to_ptr.vmem [resolvable:$true] %s144_s7 }
  0x17   : > { %s3009_s4 = scalar_select %p2093_p12, 1, 0 }
  0x18   : > { %s2103_s8 = scalar_select %p105_p11, %s1970_s14, %s107_s24  }
  0x19   : > { %p2107_p0 = pnand %p2093_p12, %p1772_p13  ;;  %s155_s20 = sshll.u32 %s2997_s1, 4  ;;  %s156_s20 = int_to_ptr.vmem [resolvable:$true] %s155_s20 }
  0x1a   : > { %s1860_s21 = scalar_lea.vmem %s145_s7, 112  ;;  %s1867_s24 = scalar_lea.vmem %s145_s7, 128 }
  0x1b   : > { %p1861_p1 = scmp.ne.s32.totalorder %s145_s7, %s1860_s21  ;;  %p1862_p2 = pneg %p2107_p0 }
  0x1c   : > { %p1868_p6 = scmp.lt.s32.totalorder %s145_s7, %s145_s7  ;;  %p1869_p7 = scmp.lt.s32.totalorder %s1867_s24, %s1860_s21 }
  0x1d   : > { %p1863_p4 = pnand %p1862_p2, %p1861_p1 }
  0x1e   : > { %p1870_p9 = por %p1869_p7, %p1868_p6 }
  0x1f   : > { %p1864_p5 = pneg %p1863_p4 }
  0x21   : > { %p1871_p11 = pnand %p1870_p9, %p1864_p5 }
  0x23   : > { %1874 = shalt.err (!%p1871_p11)
}
  0x24   : > { %s1992_s25 = smov [#allocation2]   ;;  %s1875_s28 = scalar_lea.vmem %s156_s20, 16 }
  0x25   : > { %1775 = dma.vmem_to_smem (!%p2107_p0), %s145_s7, 112, %s1992_s25, [#allocation4]  }
  0x26   : > { %p1876_p13 = scmp.ne.s32.totalorder %s156_s20, %s1875_s28  ;;  %p1883_p12 = scmp.lt.s32.totalorder %s156_s20, %s156_s20 }
  0x27   : > { %p1884_p1 = scmp.lt.s32.totalorder %s1875_s28, %s1875_s28 }
  0x28   : > { %p1878_p8 = pnand %p1876_p13, %p1862_p2 }
  0x29   : > { %p1885_p4 = por %p1884_p1, %p1883_p12 }
  0x2a   : > { %p1879_p3 = pneg %p1878_p8 }
  0x2c   : > { %p1886_p10 = pnand %p1885_p4, %p1879_p3 }
  0x2e   : > { %1889 = shalt.err (!%p1886_p10)
}
  0x2f   : > { %s1993_s29 = smov [#allocation5]   ;;  %p3011_p5 = scmp.ne.s32.totalorder %s3008_s30, 0 }
  0x30   : > { %1778 = dma.vmem_to_smem (!%p2107_p0), %s156_s20, 16, %s1993_s29, [#allocation6]  }
  0x31   : > { %176 = sbr.rel (%p3011_p5) target bundleno = 522 (0x20a), region = 32  ;;  %p3012_p6 = scmp.ne.s32.totalorder (!%p3011_p5), %s3009_s4, 0 }
  0x36   : > { %1949 = dma.done.wait (%p3012_p6), [#allocation4], 112  }
  0x37   : > { %1951 = vsyncadd (%p3012_p6), [#allocation4], 4294967184 }
  0x38   : > { %1953 = dma.done.wait (%p3012_p6), [#allocation6], 16  }
  0x39   : > { %1955 = vsyncadd (%p3012_p6), [#allocation6], 4294967280 }
  0x3a   : > { %186 = sfence }
  0x3b   : > { %p205_p3 = scmp.lt.s32.totalorder %s1978_s16, 1  ;;  %s2138_s5 = smul.u32 100, %s1974_s15  ;;  %vm1597_vm0 = vcmask 130048  }
  0x3c   : > { %s3004_s20 = smov 125   ;;  %p3014_p10 = scmp.ne.s32.totalorder %s3006_s26, 0 }
  0x3d   : > { %s206_s30 = scalar_select %p205_p3, %s1978_s16, 1 }
  0x3e   : > { %s234_s6 = sadd.s32 2, %s2138_s5  ;;  %s219_s7 = sadd.s32 1, %s2138_s5 }
  0x3f   : > { %s1761_s9 = smul.u32 96, %s206_s30  ;;  %s235_s10 = sld [smem:[#allocation2 + %s234_s6]] }
  0x40   : > { %s220_s11 = sld [smem:[#allocation2 + %s219_s7]]  ;;  %s249_s4 = sadd.s32 3, %s2138_s5 }
  0x41   : > { %s2147_s24 = scalar_lea.vmem %s2998_s2, %s1761_s9  ;;  %s250_s25 = sld [smem:[#allocation2 + %s249_s4]] }
  0x42   : > { %s264_s28 = sadd.s32 4, %s2138_s5  ;;  %v2151_v0 = vld [vmem:[%s2147_s24] sm:$0xff]  ;;  %v2154_v1 = vld [vmem:[%s2147_s24 + $0x8] sm:$0xff]  ;;  %s288_s30 = sadd.s32 6, %s2138_s5 }
  0x43   : > { %s265_s29 = sld [smem:[#allocation2 + %s264_s28]]  ;;  %s1994_s6 = smov 126   ;;  %v2174_v14 = vld [vmem:[%s2147_s24 + $0x9] sm:$0xff]  ;;  %v2177_v16 = vld [vmem:[%s2147_s24 + $0x1] sm:$0xff] }
  0x44   : > { %s1995_s7 = smov 127   ;;  %s289_s9 = sld [smem:[#allocation2 + %s288_s30]]  ;;  %v2200_v28 = vld [vmem:[%s2147_s24 + $0xa] sm:$0xff]  ;;  %v2203_v30 = vld [vmem:[%s2147_s24 + $0x2] sm:$0xff] }
  0x45   : > { %v236_v2 = vstv %s235_s10  ;;  %s303_s10 = sadd.s32 7, %s2138_s5  ;;  %s318_s4 = sadd.s32 8, %s2138_s5  ;;  %v2226_v42 = vld [vmem:[%s2147_s24 + $0xb] sm:$0xff]  ;;  %v2229_v44 = vld [vmem:[%s2147_s24 + $0x3] sm:$0xff] }
  0x46   : > { %v237_v3 = vmul.f32 %v236_v2, %v2151_v0  ;;  %v221_v4 = vstv %s220_s11  ;;  %v238_v6 = vmul.f32 %v236_v2, %v2154_v1  ;;  %s304_s11 = sld [smem:[#allocation2 + %s303_s10]]  ;;  %s1997_s28 = smov 124   ;;  %v2252_v56 = vld [vmem:[%s2147_s24 + $0xc] sm:$0xff]  ;;  %v2255_v58 = vld [vmem:[%s2147_s24 + $0x4] sm:$0xff] }
  0x47   : > { %v222_v5 = vmul.f32 %v221_v4, %v2151_v0  ;;  %v223_v7 = vmul.f32 %v221_v4, %v2154_v1  ;;  %v251_v8 = vstv %s250_s25  ;;  %s319_s21 = sld [smem:[#allocation2 + %s318_s4]]  ;;  %s333_s25 = sadd.s32 9, %s2138_s5 }
  0x48   : > { %241 = vrot.lane.b32.xlu1 %v237_v3, %s1994_s6  ;;  %v253_v9 = vmul.f32 %v251_v8, %v2154_v1  ;;  %v252_v10 = vmul.f32 %v251_v8, %v2151_v0  ;;  %s357_s30 = sadd.s32 11, %s2138_s5  ;;  %s372_s10 = sadd.s32 12, %s2138_s5  ;;  %v2278_v8 = vld [vmem:[%s2147_s24 + $0x20] sm:$0xff] }
  0x49   : > { %226 = vrot.lane.b32.xlu0 %v222_v5, %s1995_s7  ;;  %v266_v11 = vstv %s265_s29  ;;  %s334_s29 = sld [smem:[#allocation2 + %s333_s25]]  ;;  %s387_s4 = sadd.s32 13, %s2138_s5 }
  0x4a   : > { %v268_v12 = vmul.f32 %v266_v11, %v2154_v1  ;;  %v267_v13 = vmul.f32 %v266_v11, %v2151_v0  ;;  %v290_v15 = vstv %s289_s9  ;;  %s358_s9 = sld [smem:[#allocation2 + %s357_s30]]  ;;  %s402_s25 = sadd.s32 14, %s2138_s5 }
  0x4b   : > { %v292_v17 = vmul.f32 %v290_v15, %v2174_v14  ;;  %v291_v18 = vmul.f32 %v290_v15, %v2177_v16  ;;  %s426_s30 = sadd.s32 16, %s2138_s5 }
  0x4c   : > { %243 = vrot.lane.b32.xlu1 %v238_v6, %s1994_s6  ;;  %v305_v19 = vstv %s304_s11  ;;  %s373_s11 = sld [smem:[#allocation2 + %s372_s10]]  ;;  %s441_s10 = sadd.s32 17, %s2138_s5 }
  0x4d   : > { %228 = vrot.lane.b32.xlu0 %v223_v7, %s1995_s7  ;;  %v307_v20 = vmul.f32 %v305_v19, %v2174_v14  ;;  %v306_v21 = vmul.f32 %v305_v19, %v2177_v16  ;;  %v320_v22 = vstv %s319_s21  ;;  %s388_s21 = sld [smem:[#allocation2 + %s387_s4]]  ;;  %s456_s4 = sadd.s32 18, %s2138_s5 }
  0x4e   : > { %v322_v23 = vmul.f32 %v320_v22, %v2174_v14  ;;  %v321_v24 = vmul.f32 %v320_v22, %v2177_v16 }
  0x4f   : > { %v335_v25 = vstv %s334_s29  ;;  %s403_s29 = sld [smem:[#allocation2 + %s402_s25]]  ;;  %s471_s25 = sadd.s32 19, %s2138_s5 }
  0x50   : > { %258 = vrot.lane.b32.xlu1 %v253_v9, %s3004_s20  ;;  %v337_v26 = vmul.f32 %v335_v25, %v2174_v14  ;;  %v336_v27 = vmul.f32 %v335_v25, %v2177_v16  ;;  %v359_v29 = vstv %s358_s9  ;;  %s427_s9 = sld [smem:[#allocation2 + %s426_s30]]  ;;  %s495_s30 = sadd.s32 21, %s2138_s5 }
  0x51   : > { %256 = vrot.lane.b32.xlu0 %v252_v10, %s3004_s20  ;;  %v361_v31 = vmul.f32 %v359_v29, %v2200_v28  ;;  %v360_v32 = vmul.f32 %v359_v29, %v2203_v30  ;;  %v2281_v10 = vld [vmem:[%s2147_s24 + $0x18] sm:$0xff] }
  0x52   : > { %v374_v33 = vstv %s373_s11  ;;  %s442_s11 = sld [smem:[#allocation2 + %s441_s10]]  ;;  %s510_s10 = sadd.s32 22, %s2138_s5 }
  0x53   : > { %v376_v34 = vmul.f32 %v374_v33, %v2200_v28  ;;  %v375_v35 = vmul.f32 %v374_v33, %v2203_v30  ;;  %v389_v36 = vstv %s388_s21  ;;  %s457_s21 = sld [smem:[#allocation2 + %s456_s4]]  ;;  %s525_s4 = sadd.s32 23, %s2138_s5 }
  0x54   : > { %273 = vrot.lane.b32.xlu1 %v268_v12, %s1997_s28  ;;  %v391_v37 = vmul.f32 %v389_v36, %v2200_v28  ;;  %v390_v38 = vmul.f32 %v389_v36, %v2203_v30 }
  0x55   : > { %271 = vrot.lane.b32.xlu0 %v267_v13, %s1997_s28  ;;  %v404_v39 = vstv %s403_s29  ;;  %s472_s29 = sld [smem:[#allocation2 + %s471_s25]]  ;;  %s540_s25 = sadd.s32 24, %s2138_s5 }
  0x56   : > { %v406_v40 = vmul.f32 %v404_v39, %v2200_v28  ;;  %v405_v41 = vmul.f32 %v404_v39, %v2203_v30  ;;  %v428_v43 = vstv %s427_s9  ;;  %s496_s9 = sld [smem:[#allocation2 + %s495_s30]]  ;;  %s565_s30 = sadd.s32 26, %s2138_s5 }
  0x57   : > { %v430_v45 = vmul.f32 %v428_v43, %v2226_v42  ;;  %v429_v46 = vmul.f32 %v428_v43, %v2229_v44  ;;  %v2334_v43 = vld [vmem:[%s2147_s24 + $0x1a] sm:$0xff] }
  0x58   : > { %297 = vrot.lane.b32.xlu1 %v292_v17, %s1995_s7  ;;  %v443_v47 = vstv %s442_s11  ;;  %s511_s11 = sld [smem:[#allocation2 + %s510_s10]]  ;;  %s580_s10 = sadd.s32 27, %s2138_s5 }
  0x59   : > { %295 = vrot.lane.b32.xlu0 %v291_v18, %s1995_s7  ;;  %v445_v48 = vmul.f32 %v443_v47, %v2226_v42  ;;  %v444_v49 = vmul.f32 %v443_v47, %v2229_v44  ;;  %v458_v50 = vstv %s457_s21  ;;  %s526_s21 = sld [smem:[#allocation2 + %s525_s4]]  ;;  %s595_s4 = sadd.s32 28, %s2138_s5 }
  0x5a   : > { %v460_v51 = vmul.f32 %v458_v50, %v2226_v42  ;;  %v459_v52 = vmul.f32 %v458_v50, %v2229_v44 }
  0x5b   : > { %v473_v53 = vstv %s472_s29  ;;  %s541_s29 = sld [smem:[#allocation2 + %s540_s25]]  ;;  %s610_s25 = sadd.s32 29, %s2138_s5 }
  0x5c   : > { %312 = vrot.lane.b32.xlu1 %v307_v20, %s1994_s6  ;;  %v475_v54 = vmul.f32 %v473_v53, %v2226_v42  ;;  %v474_v55 = vmul.f32 %v473_v53, %v2229_v44  ;;  %v497_v57 = vstv %s496_s9  ;;  %s566_s9 = sld [smem:[#allocation2 + %s565_s30]]  ;;  %s634_s30 = sadd.s32 31, %s2138_s5 }
  0x5d   : > { %310 = vrot.lane.b32.xlu0 %v306_v21, %s1994_s6  ;;  %v499_v59 = vmul.f32 %v497_v57, %v2252_v56  ;;  %v498_v60 = vmul.f32 %v497_v57, %v2255_v58 }
  0x5e   : > { %v512_v61 = vstv %s511_s11  ;;  %s581_s11 = sld [smem:[#allocation2 + %s580_s10]]  ;;  %s649_s10 = sadd.s32 32, %s2138_s5 }
  0x5f   : > { %v514_v62 = vmul.f32 %v512_v61, %v2252_v56  ;;  %v513_v63 = vmul.f32 %v512_v61, %v2255_v58  ;;  %v527_v2 = vstv %s526_s21  ;;  %s596_s21 = sld [smem:[#allocation2 + %s595_s4]]  ;;  %s664_s4 = sadd.s32 33, %s2138_s5 }
  0x60   : > { %327 = vrot.lane.b32.xlu1 %v322_v23, %s3004_s20  ;;  %v529_v3 = vmul.f32 %v527_v2, %v2252_v56  ;;  %v528_v4 = vmul.f32 %v527_v2, %v2255_v58 }
  0x61   : > { %325 = vrot.lane.b32.xlu0 %v321_v24, %s3004_s20  ;;  %v542_v5 = vstv %s541_s29  ;;  %s611_s29 = sld [smem:[#allocation2 + %s610_s25]]  ;;  %v2304_v24 = vld [vmem:[%s2147_s24 + $0x21] sm:$0xff]  ;;  %s679_s25 = sadd.s32 34, %s2138_s5 }
  0x62   : > { %v544_v6 = vmul.f32 %v542_v5, %v2252_v56  ;;  %v543_v7 = vmul.f32 %v542_v5, %v2255_v58  ;;  %v567_v9 = vstv %s566_s9  ;;  %s635_s9 = sld [smem:[#allocation2 + %s634_s30]]  ;;  %s703_s30 = sadd.s32 36, %s2138_s5 }
  0x63   : > { %v569_v11 = vmul.f32 %v2278_v8, %v567_v9  ;;  %v568_v12 = vmul.f32 %v2281_v10, %v567_v9  ;;  %v2376_v9 = vld [vmem:[%s2147_s24 + $0x1b] sm:$0xff] }
  0x64   : > { %342 = vrot.lane.b32.xlu1 %v337_v26, %s1997_s28  ;;  %v582_v13 = vstv %s581_s11  ;;  %s650_s11 = sld [smem:[#allocation2 + %s649_s10]]  ;;  %v2307_v26 = vld [vmem:[%s2147_s24 + $0x19] sm:$0xff]  ;;  %s718_s10 = sadd.s32 37, %s2138_s5 }
  0x65   : > { %340 = vrot.lane.b32.xlu0 %v336_v27, %s1997_s28  ;;  %v584_v15 = vmul.f32 %v2278_v8, %v582_v13  ;;  %v583_v17 = vmul.f32 %v2281_v10, %v582_v13  ;;  %v597_v18 = vstv %s596_s21  ;;  %s665_s21 = sld [smem:[#allocation2 + %s664_s4]]  ;;  %s733_s4 = sadd.s32 38, %s2138_s5 }
  0x66   : > { %v599_v19 = vmul.f32 %v2278_v8, %v597_v18  ;;  %v598_v20 = vmul.f32 %v2281_v10, %v597_v18 }
  0x67   : > { %v612_v21 = vstv %s611_s29  ;;  %s680_s29 = sld [smem:[#allocation2 + %s679_s25]] }
  0x68   : > { %366 = vrot.lane.b32.xlu1 %v361_v31, %s1995_s7  ;;  %v614_v22 = vmul.f32 %v2278_v8, %v612_v21  ;;  %v613_v23 = vmul.f32 %v2281_v10, %v612_v21  ;;  %v636_v25 = vstv %s635_s9  ;;  %s704_s9 = sld [smem:[#allocation2 + %s703_s30]] }
  0x69   : > { %364 = vrot.lane.b32.xlu0 %v360_v32, %s1995_s7  ;;  %v638_v27 = vmul.f32 %v2304_v24, %v636_v25  ;;  %v637_v29 = vmul.f32 %v2307_v26, %v636_v25  ;;  %s734_s25 = sld [smem:[#allocation2 + %s733_s4]]  ;;  %s787_s4 = sadd.s32 42, %s2138_s5 }
  0x6a   : > { %v651_v31 = vstv %s650_s11  ;;  %s719_s11 = sld [smem:[#allocation2 + %s718_s10]]  ;;  %s772_s10 = sadd.s32 41, %s2138_s5 }
  0x6b   : > { %v653_v32 = vmul.f32 %v2304_v24, %v651_v31  ;;  %v652_v33 = vmul.f32 %v2307_v26, %v651_v31 }
  0x6c   : > { %381 = vrot.lane.b32.xlu1 %v376_v34, %s1994_s6  ;;  %v666_v34 = vstv %s665_s21  ;;  %s211_s21 = sld [smem:[#allocation2 + %s2138_s5]] }
  0x6d   : > { %379 = vrot.lane.b32.xlu0 %v375_v35, %s1994_s6  ;;  %v668_v35 = vmul.f32 %v2304_v24, %v666_v34  ;;  %v667_v36 = vmul.f32 %v2307_v26, %v666_v34 }
  0x70   : > { %396 = vrot.lane.b32.xlu1 %v391_v37, %s3004_s20  ;;  %v681_v37 = vstv %s680_s29  ;;  %s748_s29 = sadd.s32 39, %s2138_s5  ;;  %v720_v47 = vstv %s719_s11 }
  0x71   : > { %394 = vrot.lane.b32.xlu0 %v390_v38, %s3004_s20  ;;  %v683_v38 = vmul.f32 %v2304_v24, %v681_v37  ;;  %v682_v39 = vmul.f32 %v2307_v26, %v681_v37  ;;  %s2341_s30 = sld [smem:[#allocation2 + %s748_s29]]  ;;  %v721_v50 = vmul.f32 %v2334_v43, %v720_v47 }
  0x74   : > { %411 = vrot.lane.b32.xlu1 %v406_v40, %s1997_s28  ;;  %v2331_v40 = vld [vmem:[%s2147_s24 + $0x22] sm:$0xff] }
  0x75   : > { %409 = vrot.lane.b32.xlu0 %v405_v41, %s1997_s28  ;;  %v705_v41 = vstv %s704_s9  ;;  %s2349_s9 = sld [smem:[#allocation2 + %s772_s10]] }
  0x78   : > { %435 = vrot.lane.b32.xlu1 %v430_v45, %s1995_s7  ;;  %v707_v45 = vmul.f32 %v2331_v40, %v705_v41 }
  0x79   : > { %433 = vrot.lane.b32.xlu0 %v429_v46, %s1995_s7  ;;  %v706_v46 = vmul.f32 %v2334_v43, %v705_v41 }
  0x7c   : > { %450 = vrot.lane.b32.xlu1 %v445_v48, %s1994_s6  ;;  %v722_v48 = vmul.f32 %v2331_v40, %v720_v47  ;;  %v2413_v47 = vld [vmem:[%s2147_s24 + $0x24] sm:$0xff] }
  0x7d   : > { %448 = vrot.lane.b32.xlu0 %v444_v49, %s1994_s6  ;;  %v214_v49 = vstv %s211_s21  ;;  %s802_s21 = sadd.s32 43, %s2138_s5 }
  0x7e   : > { %s2372_s29 = sld [smem:[#allocation2 + %s802_s21]]  ;;  %s856_s21 = sadd.s32 47, %s2138_s5 }
  0x80   : > { %465 = vrot.lane.b32.xlu1 %v460_v51, %s3004_s20  ;;  %v735_v51 = vstv %s734_s25  ;;  %s3013_s25 = smov 125  }
  0x81   : > { %463 = vrot.lane.b32.xlu0 %v459_v52, %s3004_s20  ;;  %v737_v57 = vmul.f32 %v2331_v40, %v735_v51 }
  0x84   : > { %480 = vrot.lane.b32.xlu1 %v475_v54, %s1997_s28  ;;  %v215_v54 = vmul.f32 %v214_v49, %v2151_v0 }
  0x85   : > { %478 = vrot.lane.b32.xlu0 %v474_v55, %s1997_s28  ;;  %v216_v55 = vmul.f32 %v214_v49, %v2154_v1 }
  0x88   : > { %504 = vrot.lane.b32.xlu1 %v499_v59, %s1995_s7  ;;  %v736_v59 = vmul.f32 %v2334_v43, %v735_v51 }
  0x89   : > { %502 = vrot.lane.b32.xlu0 %v498_v60, %s1995_s7  ;;  %v750_v60 = vstv %s2341_s30  ;;  %s817_s30 = sadd.s32 44, %s2138_s5 }
  0x8a   : > { %v752_v1 = vmul.f32 %v2331_v40, %v750_v60  ;;  %v751_v2 = vmul.f32 %v2334_v43, %v750_v60  ;;  %s2385_s10 = sld [smem:[#allocation2 + %s817_s30]]  ;;  %s871_s30 = sadd.s32 48, %s2138_s5 }
  0x8c   : > { %519 = vrot.lane.b32.xlu1 %v514_v62, %s1994_s6 }
  0x8d   : > { %517 = vrot.lane.b32.xlu0 %v513_v63, %s1994_s6 }
  0x90   : > { %534 = vrot.lane.b32.xlu1 %v529_v3, %s3004_s20  ;;  %v2369_v3 = vld [vmem:[%s2147_s24 + $0x23] sm:$0xff]  ;;  %v819_v37 = vstv %s2385_s10  ;;  %s2416_s10 = sld [smem:[#allocation2 + %s871_s30]]  ;;  %s926_s30 = sadd.s32 52, %s2138_s5 }
  0x91   : > { %532 = vrot.lane.b32.xlu0 %v528_v4, %s3004_s20  ;;  %v774_v4 = vstv %s2349_s9  ;;  %s841_s9 = sadd.s32 46, %s2138_s5  ;;  %v821_v41 = vmul.f32 %v2369_v3, %v819_v37 }
  0x92   : > { %v776_v13 = vmul.f32 %v2369_v3, %v774_v4  ;;  %v775_v18 = vmul.f32 %v2376_v9, %v774_v4 }
  0x94   : > { %549 = vrot.lane.b32.xlu1 %v544_v6, %s1997_s28 }
  0x95   : > { %547 = vrot.lane.b32.xlu0 %v543_v7, %s1997_s28 }
  0x98   : > { %574 = vrot.lane.b32.xlu1 %v569_v11, %s1995_s7 }
  0x99   : > { %572 = vrot.lane.b32.xlu0 %v568_v12, %s1995_s7 }
  0x9c   : > { %589 = vrot.lane.b32.xlu1 %v584_v15, %s1994_s6 }
  0x9d   : > { %587 = vrot.lane.b32.xlu0 %v583_v17, %s1994_s6 }
  0xa0   : > { %604 = vrot.lane.b32.xlu1 %v599_v19, %s3004_s20 }
  0xa1   : > { %602 = vrot.lane.b32.xlu0 %v598_v20, %s3004_s20 }
  0xa4   : > { %619 = vrot.lane.b32.xlu1 %v614_v22, %s1997_s28 }
  0xa5   : > { %617 = vrot.lane.b32.xlu0 %v613_v23, %s1997_s28 }
  0xa8   : > { %643 = vrot.lane.b32.xlu1 %v638_v27, %s1995_s7 }
  0xa9   : > { %641 = vrot.lane.b32.xlu0 %v637_v29, %s1995_s7 }
  0xac   : > { %658 = vrot.lane.b32.xlu1 %v653_v32, %s1994_s6  ;;  %v804_v32 = vstv %s2372_s29  ;;  %s2405_s29 = sld [smem:[#allocation2 + %s856_s21]] }
  0xad   : > { %656 = vrot.lane.b32.xlu0 %v652_v33, %s1994_s6 }
  0xb0   : > { %673 = vrot.lane.b32.xlu1 %v668_v35, %s3004_s20  ;;  %v806_v35 = vmul.f32 %v2369_v3, %v804_v32 }
  0xb1   : > { %671 = vrot.lane.b32.xlu0 %v667_v36, %s3004_s20  ;;  %s279_s20 = sadd.s32 5, %s2138_s5  ;;  %v805_v36 = vmul.f32 %v2376_v9, %v804_v32  ;;  %v2464_v32 = vld [vmem:[%s2147_s24 + $0x30] sm:$0xff] }
  0xb2   : > { %s2351_s11 = sld [smem:[#allocation2 + %s279_s20]] }
  0xb3   : > { %s2361_s20 = sld [smem:[#allocation2 + %s787_s4]] }
  0xb4   : > { %688 = vrot.lane.b32.xlu1 %v683_v38, %s1997_s28  ;;  %s2395_s4 = sld [smem:[#allocation2 + %s841_s9]]  ;;  %s886_s9 = sadd.s32 49, %s2138_s5 }
  0xb5   : > { %686 = vrot.lane.b32.xlu0 %v682_v39, %s1997_s28 }
  0xb8   : > { %712 = vrot.lane.b32.xlu1 %v707_v45, %s1995_s7  ;;  %v283_v7 = vstv %s2351_s11  ;;  %s348_s11 = sadd.s32 10, %s2138_s5 }
  0xb9   : > { %710 = vrot.lane.b32.xlu0 %v706_v46, %s1995_s7  ;;  %v285_v17 = vmul.f32 %v283_v7, %v2174_v14  ;;  %v789_v19 = vstv %s2361_s20  ;;  %v284_v22 = vmul.f32 %v283_v7, %v2177_v16  ;;  %s2397_s20 = sld [smem:[#allocation2 + %s348_s11]]  ;;  %v820_v46 = vmul.f32 %v2376_v9, %v819_v37 }
  0xba   : > { %v242_v52 = vpop.permute.xlu1 %241  ;;  %v791_v14 = vmul.f32 %v2369_v3, %v789_v19  ;;  %v790_v31 = vmul.f32 %v2376_v9, %v789_v19  ;;  %s2429_s11 = sld [smem:[#allocation2 + %s886_s9]]  ;;  %s941_s9 = sadd.s32 53, %s2138_s5 }
  0xbb   : > { %v227_v53 = vpop.permute.xlu0 %226 }
  0xbc   : > { %727 = vrot.lane.b32.xlu1 %v722_v48, %s1994_s6  ;;  %v232_v62 = vadd.f32 %v227_v53, %v215_v54  ;;  %v843_v48 = vstv %s2395_s4  ;;  %s911_s4 = sadd.s32 51, %s2138_s5 }
  0xbd   : > { %725 = vrot.lane.b32.xlu0 %v721_v50, %s1994_s6  ;;  %s2439_s21 = sld [smem:[#allocation2 + %s911_s4]]  ;;  %s956_s4 = sadd.s32 54, %s2138_s5 }
  0xbe   : > { %v244_v61 = vpop.permute.xlu1 %243  ;;  %v247_v12 = vadd.f32 %v242_v52, %v232_v62  ;;  %v2420_v52 = vld [vmem:[%s2147_s24 + $0x1c] sm:$0xff] }
  0xbf   : > { %v229_v0 = vpop.permute.xlu0 %228  ;;  %v352_v51 = vstv %s2397_s20  ;;  %s417_s20 = sadd.s32 15, %s2138_s5 }
  0xc0   : > { %v233_v63 = vadd.f32 %v229_v0, %v216_v55  ;;  %742 = vrot.lane.b32.xlu1 %v737_v57, %s3013_s25  ;;  %v845_v57 = vmul.f32 %v2413_v47, %v843_v48  ;;  %v354_v60 = vmul.f32 %v352_v51, %v2200_v28  ;;  %v858_v0 = vstv %s2405_s29  ;;  %s2441_s29 = sld [smem:[#allocation2 + %s417_s20]] }
  0xc1   : > { %740 = vrot.lane.b32.xlu0 %v736_v59, %s3013_s25  ;;  %v860_v28 = vmul.f32 %v2413_v47, %v858_v0  ;;  %v859_v7 = vmul.f32 %v2420_v52, %v858_v0  ;;  %s2473_s20 = sld [smem:[#allocation2 + %s956_s4]]  ;;  %s1010_s4 = sadd.s32 58, %s2138_s5 }
  0xc2   : > { %v248_v5 = vadd.f32 %v244_v61, %v233_v63  ;;  %v259_v6 = vpop.permute.xlu1 %258  ;;  %v844_v61 = vmul.f32 %v2420_v52, %v843_v48 }
  0xc3   : > { %v257_v11 = vpop.permute.xlu0 %256 }
  0xc4   : > { %757 = vrot.lane.b32.xlu1 %v752_v1, %s1997_s28  ;;  %v263_v15 = vadd.f32 %v259_v6, %v248_v5  ;;  %v262_v20 = vadd.f32 %v257_v11, %v247_v12  ;;  %v353_v1 = vmul.f32 %v352_v51, %v2203_v30  ;;  %v873_v11 = vstv %s2416_s10  ;;  %s2449_s10 = sld [smem:[#allocation2 + %s926_s30]] }
  0xc5   : > { %755 = vrot.lane.b32.xlu0 %v751_v2, %s1997_s28 }
  0xc6   : > { %v274_v21 = vpop.permute.xlu1 %273 }
  0xc7   : > { %v278_v23 = vadd.f32 %v274_v21, %v263_v15  ;;  %v272_v25 = vpop.permute.xlu0 %271  ;;  %v875_v15 = vmul.f32 %v2413_v47, %v873_v11 }
  0xc8   : > { %v277_v27 = vadd.f32 %v272_v25, %v262_v20  ;;  %781 = vrot.lane.b32.xlu1 %v776_v13, %s1995_s7  ;;  %v2457_v25 = vld [vmem:[%s2147_s24 + $0x38] sm:$0xff] }
  0xc9   : > { %v287_v29 = vadd.f32 %v285_v17, %v278_v23  ;;  %779 = vrot.lane.b32.xlu0 %v775_v18, %s1995_s7  ;;  %v874_v17 = vmul.f32 %v2420_v52, %v873_v11  ;;  %v888_v18 = vstv %s2429_s11  ;;  %s2460_s11 = sld [smem:[#allocation2 + %s941_s9]]  ;;  %s995_s9 = sadd.s32 57, %s2138_s5  ;;  %v2508_v11 = vld [vmem:[%s2147_s24 + $0x31] sm:$0xff] }
  0xca   : > { %v286_v16 = vadd.f32 %v284_v22, %v277_v27  ;;  %v298_v33 = vpop.permute.xlu1 %297  ;;  %v890_v21 = vmul.f32 %v2413_v47, %v888_v18  ;;  %v889_v23 = vmul.f32 %v2420_v52, %v888_v18  ;;  %v913_v27 = vstv %s2439_s21  ;;  %s980_s21 = sadd.s32 56, %s2138_s5 }
  0xcb   : > { %v296_v34 = vpop.permute.xlu0 %295  ;;  %v302_v45 = vadd.f32 %v298_v33, %v287_v29  ;;  %s2483_s30 = sld [smem:[#allocation2 + %s980_s21]]  ;;  %s1025_s21 = sadd.s32 59, %s2138_s5 }
  0xcc   : > { %796 = vrot.lane.b32.xlu1 %v791_v14, %s1994_s6  ;;  %v301_v49 = vadd.f32 %v296_v34, %v286_v16 }
  0xcd   : > { %794 = vrot.lane.b32.xlu0 %v790_v31, %s1994_s6  ;;  %v421_v31 = vstv %s2441_s29  ;;  %s486_s29 = sadd.s32 20, %s2138_s5 }
  0xce   : > { %v313_v38 = vpop.permute.xlu1 %312  ;;  %v423_v37 = vmul.f32 %v421_v31, %v2226_v42 }
  0xcf   : > { %v311_v39 = vpop.permute.xlu0 %310  ;;  %v317_v53 = vadd.f32 %v313_v38, %v302_v45  ;;  %v914_v38 = vmul.f32 %v2464_v32, %v913_v27 }
  0xd0   : > { %811 = vrot.lane.b32.xlu1 %v806_v35, %s3013_s25  ;;  %v316_v55 = vadd.f32 %v311_v39, %v301_v49  ;;  %v915_v35 = vmul.f32 %v2457_v25, %v913_v27  ;;  %v928_v39 = vstv %s2449_s10  ;;  %s2485_s10 = sld [smem:[#allocation2 + %s486_s29]] }
  0xd1   : > { %809 = vrot.lane.b32.xlu0 %v805_v36, %s3013_s25  ;;  %v930_v42 = vmul.f32 %v2457_v25, %v928_v39  ;;  %s2517_s29 = sld [smem:[#allocation2 + %s1025_s21]]  ;;  %s1079_s21 = sadd.s32 63, %s2138_s5 }
  0xd2   : > { %v328_v50 = vpop.permute.xlu1 %327 }
  0xd3   : > { %v326_v54 = vpop.permute.xlu0 %325  ;;  %v332_v59 = vadd.f32 %v328_v50, %v317_v53  ;;  %v929_v53 = vmul.f32 %v2464_v32, %v928_v39 }
  0xd4   : > { %826 = vrot.lane.b32.xlu1 %v821_v41, %s1997_s28  ;;  %v331_v62 = vadd.f32 %v326_v54, %v316_v55  ;;  %v943_v54 = vstv %s2460_s11  ;;  %s2493_s11 = sld [smem:[#allocation2 + %s995_s9]] }
  0xd5   : > { %824 = vrot.lane.b32.xlu0 %v820_v46, %s1997_s28  ;;  %v422_v46 = vmul.f32 %v421_v31, %v2229_v44 }
  0xd6   : > { %v343_v63 = vpop.permute.xlu1 %342 }
  0xd7   : > { %v347_v2 = vadd.f32 %v343_v63, %v332_v59  ;;  %v341_v4 = vpop.permute.xlu0 %340  ;;  %v945_v59 = vmul.f32 %v2457_v25, %v943_v54 }
  0xd8   : > { %v346_v5 = vadd.f32 %v341_v4, %v331_v62  ;;  %850 = vrot.lane.b32.xlu1 %v845_v57, %s1995_s7  ;;  %v2501_v4 = vld [vmem:[%s2147_s24 + $0x39] sm:$0xff] }
  0xd9   : > { %v356_v6 = vadd.f32 %v354_v60, %v347_v2  ;;  %848 = vrot.lane.b32.xlu0 %v844_v61, %s1995_s7  ;;  %v944_v60 = vmul.f32 %v2464_v32, %v943_v54  ;;  %v958_v61 = vstv %s2473_s20  ;;  %s2504_s20 = sld [smem:[#allocation2 + %s1010_s4]]  ;;  %s1064_s4 = sadd.s32 62, %s2138_s5  ;;  %v2552_v54 = vld [vmem:[%s2147_s24 + $0x32] sm:$0xff] }
  0xda   : > { %v355_v30 = vadd.f32 %v353_v1, %v346_v5  ;;  %v367_v12 = vpop.permute.xlu1 %366  ;;  %v960_v63 = vmul.f32 %v2457_v25, %v958_v61  ;;  %v959_v2 = vmul.f32 %v2464_v32, %v958_v61  ;;  %v982_v5 = vstv %s2483_s30  ;;  %s1049_s30 = sadd.s32 61, %s2138_s5 }
  0xdb   : > { %v365_v13 = vpop.permute.xlu0 %364  ;;  %v371_v22 = vadd.f32 %v367_v12, %v356_v6  ;;  %s2527_s9 = sld [smem:[#allocation2 + %s1049_s30]]  ;;  %s1094_s30 = sadd.s32 64, %s2138_s5 }
  0xdc   : > { %865 = vrot.lane.b32.xlu1 %v860_v28, %s1994_s6  ;;  %v370_v14 = vadd.f32 %v365_v13, %v355_v30 }
  0xdd   : > { %863 = vrot.lane.b32.xlu0 %v859_v7, %s1994_s6  ;;  %v490_v7 = vstv %s2485_s10  ;;  %s555_s10 = sadd.s32 25, %s2138_s5 }
  0xde   : > { %v382_v19 = vpop.permute.xlu1 %381  ;;  %v492_v18 = vmul.f32 %v490_v7, %v2252_v56 }
  0xdf   : > { %v380_v20 = vpop.permute.xlu0 %379  ;;  %v386_v16 = vadd.f32 %v382_v19, %v371_v22  ;;  %v983_v19 = vmul.f32 %v2508_v11, %v982_v5 }
  0xe0   : > { %880 = vrot.lane.b32.xlu1 %v875_v15, %s3013_s25  ;;  %v385_v34 = vadd.f32 %v380_v20, %v370_v14  ;;  %v984_v15 = vmul.f32 %v2501_v4, %v982_v5  ;;  %v997_v20 = vstv %s2493_s11  ;;  %s2529_s11 = sld [smem:[#allocation2 + %s555_s10]] }
  0xe1   : > { %878 = vrot.lane.b32.xlu0 %v874_v17, %s3013_s25  ;;  %v999_v56 = vmul.f32 %v2501_v4, %v997_v20  ;;  %s2561_s10 = sld [smem:[#allocation2 + %s1094_s30]]  ;;  %s1148_s30 = sadd.s32 68, %s2138_s5 }
  0xe2   : > { %v397_v29 = vpop.permute.xlu1 %396 }
  0xe3   : > { %v395_v33 = vpop.permute.xlu0 %394  ;;  %v401_v36 = vadd.f32 %v397_v29, %v386_v16  ;;  %v998_v16 = vmul.f32 %v2508_v11, %v997_v20 }
  0xe4   : > { %895 = vrot.lane.b32.xlu1 %v890_v21, %s1997_s28  ;;  %v400_v41 = vadd.f32 %v395_v33, %v385_v34  ;;  %v1012_v33 = vstv %s2504_s20  ;;  %s2537_s20 = sld [smem:[#allocation2 + %s1064_s4]] }
  0xe5   : > { %893 = vrot.lane.b32.xlu0 %v889_v23, %s1997_s28  ;;  %v491_v23 = vmul.f32 %v490_v7, %v2255_v58 }
  0xe6   : > { %v412_v45 = vpop.permute.xlu1 %411 }
  0xe7   : > { %v416_v48 = vadd.f32 %v412_v45, %v401_v36  ;;  %v410_v49 = vpop.permute.xlu0 %409  ;;  %v1014_v36 = vmul.f32 %v2501_v4, %v1012_v33 }
  0xe8   : > { %v415_v50 = vadd.f32 %v410_v49, %v400_v41  ;;  %920 = vrot.lane.b32.xlu1 %v915_v35, %s1995_s7  ;;  %v2545_v49 = vld [vmem:[%s2147_s24 + $0x3a] sm:$0xff] }
  0xe9   : > { %v425_v51 = vadd.f32 %v423_v37, %v416_v48  ;;  %918 = vrot.lane.b32.xlu0 %v914_v38, %s1995_s7  ;;  %v1013_v37 = vmul.f32 %v2508_v11, %v1012_v33  ;;  %v1027_v38 = vstv %s2517_s29  ;;  %s2548_s29 = sld [smem:[#allocation2 + %s1079_s21]]  ;;  %s1133_s21 = sadd.s32 67, %s2138_s5  ;;  %v2596_v33 = vld [vmem:[%s2147_s24 + $0x33] sm:$0xff] }
  0xea   : > { %v424_v44 = vadd.f32 %v422_v46, %v415_v50  ;;  %v436_v55 = vpop.permute.xlu1 %435  ;;  %v1029_v45 = vmul.f32 %v2501_v4, %v1027_v38  ;;  %v1028_v48 = vmul.f32 %v2508_v11, %v1027_v38  ;;  %v1051_v50 = vstv %s2527_s9  ;;  %s1118_s9 = sadd.s32 66, %s2138_s5 }
  0xeb   : > { %v434_v57 = vpop.permute.xlu0 %433  ;;  %v440_v1 = vadd.f32 %v436_v55, %v425_v51  ;;  %s2571_s4 = sld [smem:[#allocation2 + %s1118_s9]]  ;;  %s1163_s9 = sadd.s32 69, %s2138_s5 }
  0xec   : > { %935 = vrot.lane.b32.xlu1 %v930_v42, %s1994_s6  ;;  %v439_v28 = vadd.f32 %v434_v57, %v424_v44 }
  0xed   : > { %933 = vrot.lane.b32.xlu0 %v929_v53, %s1994_s6  ;;  %v560_v53 = vstv %s2529_s11  ;;  %s625_s11 = sadd.s32 30, %s2138_s5 }
  0xee   : > { %v451_v0 = vpop.permute.xlu1 %450  ;;  %v562_v61 = vmul.f32 %v2278_v8, %v560_v53 }
  0xef   : > { %v449_v62 = vpop.permute.xlu0 %448  ;;  %v455_v30 = vadd.f32 %v451_v0, %v440_v1  ;;  %v1052_v0 = vmul.f32 %v2552_v54, %v1051_v50 }
  0xf0   : > { %950 = vrot.lane.b32.xlu1 %v945_v59, %s3013_s25  ;;  %v454_v13 = vadd.f32 %v449_v62, %v439_v28  ;;  %v1053_v59 = vmul.f32 %v2545_v49, %v1051_v50  ;;  %v1066_v62 = vstv %s2537_s20  ;;  %s2573_s20 = sld [smem:[#allocation2 + %s625_s11]] }
  0xf1   : > { %948 = vrot.lane.b32.xlu0 %v944_v60, %s3013_s25  ;;  %v1068_v8 = vmul.f32 %v2545_v49, %v1066_v62  ;;  %s2605_s11 = sld [smem:[#allocation2 + %s1163_s9]]  ;;  %s1217_s9 = sadd.s32 73, %s2138_s5 }
  0xf2   : > { %v466_v6 = vpop.permute.xlu1 %465 }
  0xf3   : > { %v464_v12 = vpop.permute.xlu0 %463  ;;  %v470_v17 = vadd.f32 %v466_v6, %v455_v30  ;;  %v1067_v30 = vmul.f32 %v2552_v54, %v1066_v62 }
  0xf4   : > { %965 = vrot.lane.b32.xlu1 %v960_v63, %s1997_s28  ;;  %v469_v21 = vadd.f32 %v464_v12, %v454_v13  ;;  %v1081_v12 = vstv %s2548_s29  ;;  %s2581_s29 = sld [smem:[#allocation2 + %s1133_s21]]  ;;  %s1202_s21 = sadd.s32 72, %s2138_s5 }
  0xf5   : > { %963 = vrot.lane.b32.xlu0 %v959_v2, %s1997_s28  ;;  %v561_v2 = vmul.f32 %v2281_v10, %v560_v53 }
  0xf6   : > { %v481_v22 = vpop.permute.xlu1 %480 }
  0xf7   : > { %v485_v27 = vadd.f32 %v481_v22, %v470_v17  ;;  %v479_v14 = vpop.permute.xlu0 %478  ;;  %v1083_v17 = vmul.f32 %v2545_v49, %v1081_v12 }
  0xf8   : > { %v484_v29 = vadd.f32 %v479_v14, %v469_v21  ;;  %989 = vrot.lane.b32.xlu1 %v984_v15, %s1995_s7  ;;  %v2589_v14 = vld [vmem:[%s2147_s24 + $0x3b] sm:$0xff] }
  0xf9   : > { %v494_v31 = vadd.f32 %v492_v18, %v485_v27  ;;  %987 = vrot.lane.b32.xlu0 %v983_v19, %s1995_s7  ;;  %v1082_v18 = vmul.f32 %v2552_v54, %v1081_v12  ;;  %v1096_v19 = vstv %s2561_s10  ;;  %s2592_s10 = sld [smem:[#allocation2 + %s1148_s30]] }
  0xfa   : > { %v493_v58 = vadd.f32 %v491_v23, %v484_v29  ;;  %v505_v34 = vpop.permute.xlu1 %504  ;;  %v1098_v22 = vmul.f32 %v2545_v49, %v1096_v19  ;;  %v1097_v27 = vmul.f32 %v2552_v54, %v1096_v19  ;;  %v1120_v29 = vstv %s2571_s4  ;;  %s1187_s4 = sadd.s32 71, %s2138_s5  ;;  %s2623_s30 = sld [smem:[#allocation2 + %s1202_s21]] }
  0xfb   : > { %v503_v35 = vpop.permute.xlu0 %502  ;;  %v509_v46 = vadd.f32 %v505_v34, %v494_v31  ;;  %s1257_s21 = sadd.s32 76, %s2138_s5 }
  0xfc   : > { %1004 = vrot.lane.b32.xlu1 %v999_v56, %s1994_s6  ;;  %v508_v42 = vadd.f32 %v503_v35, %v493_v58 }
  0xfd   : > { %1002 = vrot.lane.b32.xlu0 %v998_v16, %s1994_s6  ;;  %v629_v16 = vstv %s2573_s20  ;;  %s2614_s20 = sld [smem:[#allocation2 + %s1187_s4]]  ;;  %s1232_s4 = sadd.s32 74, %s2138_s5 }
  0xfe   : > { %v520_v39 = vpop.permute.xlu1 %519  ;;  %v631_v38 = vmul.f32 %v2304_v24, %v629_v16 }
  0xff   : > { %v518_v41 = vpop.permute.xlu0 %517  ;;  %v524_v44 = vadd.f32 %v520_v39, %v509_v46  ;;  %v1121_v39 = vmul.f32 %v2596_v33, %v1120_v29 }
 0x100   : > { %1019 = vrot.lane.b32.xlu1 %v1014_v36, %s3013_s25  ;;  %v523_v57 = vadd.f32 %v518_v41, %v508_v42  ;;  %v1122_v36 = vmul.f32 %v2589_v14, %v1120_v29  ;;  %v1135_v41 = vstv %s2581_s29  ;;  %s694_s29 = sadd.s32 35, %s2138_s5 }
 0x101   : > { %1017 = vrot.lane.b32.xlu0 %v1013_v37, %s3013_s25  ;;  %v1137_v24 = vmul.f32 %v2589_v14, %v1135_v41 }
 0x102   : > { %v535_v51 = vpop.permute.xlu1 %534 }
 0x103   : > { %v533_v55 = vpop.permute.xlu0 %532  ;;  %v539_v60 = vadd.f32 %v535_v51, %v524_v44  ;;  %v1136_v44 = vmul.f32 %v2596_v33, %v1135_v41 }
 0x104   : > { %1034 = vrot.lane.b32.xlu1 %v1029_v45, %s1997_s28  ;;  %v538_v63 = vadd.f32 %v533_v55, %v523_v57  ;;  %v1150_v55 = vstv %s2592_s10  ;;  %s2625_s10 = sld [smem:[#allocation2 + %s694_s29]]  ;;  %s763_s29 = sadd.s32 40, %s2138_s5 }
 0x105   : > { %1032 = vrot.lane.b32.xlu0 %v1028_v48, %s1997_s28  ;;  %v630_v48 = vmul.f32 %v2307_v26, %v629_v16 }
 0x106   : > { %v550_v1 = vpop.permute.xlu1 %549 }
 0x107   : > { %v554_v5 = vadd.f32 %v550_v1, %v539_v60  ;;  %v548_v28 = vpop.permute.xlu0 %547  ;;  %v1152_v60 = vmul.f32 %v2589_v14, %v1150_v55 }
 0x108   : > { %v553_v6 = vadd.f32 %v548_v28, %v538_v63  ;;  %1058 = vrot.lane.b32.xlu1 %v1053_v59, %s1995_s7  ;;  %v1189_v28 = vstv %s2614_s20  ;;  %s2647_s20 = sld [smem:[#allocation2 + %s1232_s4]]  ;;  %s1287_s4 = sadd.s32 78, %s2138_s5 }
 0x109   : > { %v564_v7 = vadd.f32 %v562_v61, %v554_v5  ;;  %1056 = vrot.lane.b32.xlu0 %v1052_v0, %s1995_s7  ;;  %v1151_v61 = vmul.f32 %v2596_v33, %v1150_v55  ;;  %v1165_v0 = vstv %s2605_s11  ;;  %v2633_v5 = vld [vmem:[%s2147_s24 + $0x3c] sm:$0xff]  ;;  %s2636_s11 = sld [smem:[#allocation2 + %s1217_s9]]  ;;  %s1272_s9 = sadd.s32 77, %s2138_s5  ;;  %v2684_v55 = vld [vmem:[%s2147_s24 + $0x48] sm:$0xff] }
 0x10a   : > { %v563_v10 = vadd.f32 %v561_v2, %v553_v6  ;;  %v575_v13 = vpop.permute.xlu1 %574  ;;  %v1167_v1 = vmul.f32 %v2589_v14, %v1165_v0  ;;  %v1166_v2 = vmul.f32 %v2596_v33, %v1165_v0  ;;  %v698_v19 = vstv %s2625_s10  ;;  %s2661_s10 = sld [smem:[#allocation2 + %s763_s29]] }
 0x10b   : > { %v573_v15 = vpop.permute.xlu0 %572  ;;  %v579_v23 = vadd.f32 %v575_v13, %v564_v7  ;;  %v700_v29 = vmul.f32 %v2331_v40, %v698_v19 }
 0x10c   : > { %1073 = vrot.lane.b32.xlu1 %v1068_v8, %s1994_s6  ;;  %v578_v56 = vadd.f32 %v573_v15, %v563_v10  ;;  %v2639_v8 = vld [vmem:[%s2147_s24 + $0x34] sm:$0xff]  ;;  %v1191_v10 = vmul.f32 %v2633_v5, %v1189_v28 }
 0x10d   : > { %1071 = vrot.lane.b32.xlu0 %v1067_v30, %s1994_s6  ;;  %v1190_v15 = vmul.f32 %v2639_v8, %v1189_v28 }
 0x10e   : > { %v590_v20 = vpop.permute.xlu1 %589 }
 0x10f   : > { %v588_v21 = vpop.permute.xlu0 %587  ;;  %v594_v58 = vadd.f32 %v590_v20, %v579_v23  ;;  %v1219_v16 = vstv %s2636_s11  ;;  %s2669_s11 = sld [smem:[#allocation2 + %s1272_s9]] }
 0x110   : > { %1088 = vrot.lane.b32.xlu1 %v1083_v17, %s3013_s25  ;;  %v593_v35 = vadd.f32 %v588_v21, %v578_v56  ;;  %v1204_v17 = vstv %s2623_s30  ;;  %s2658_s30 = sld [smem:[#allocation2 + %s1257_s21]]  ;;  %v1221_v40 = vmul.f32 %v2633_v5, %v1219_v16  ;;  %s1302_s21 = sadd.s32 79, %s2138_s5 }
 0x111   : > { %1086 = vrot.lane.b32.xlu0 %v1082_v18, %s3013_s25  ;;  %s2693_s29 = sld [smem:[#allocation2 + %s1302_s21]]  ;;  %s1356_s21 = sadd.s32 83, %s2138_s5 }
 0x112   : > { %v605_v31 = vpop.permute.xlu1 %604 }
 0x113   : > { %v603_v34 = vpop.permute.xlu0 %602  ;;  %v609_v37 = vadd.f32 %v605_v31, %v594_v58  ;;  %v1205_v31 = vmul.f32 %v2639_v8, %v1204_v17  ;;  %v699_v58 = vmul.f32 %v2334_v43, %v698_v19 }
 0x114   : > { %1103 = vrot.lane.b32.xlu1 %v1098_v22, %s1997_s28  ;;  %v608_v45 = vadd.f32 %v603_v34, %v593_v35 }
 0x115   : > { %1101 = vrot.lane.b32.xlu0 %v1097_v27, %s1997_s28  ;;  %v1206_v27 = vmul.f32 %v2633_v5, %v1204_v17 }
 0x116   : > { %v620_v46 = vpop.permute.xlu1 %619 }
 0x117   : > { %v624_v50 = vadd.f32 %v620_v46, %v609_v37  ;;  %v618_v42 = vpop.permute.xlu0 %617 }
 0x118   : > { %v623_v51 = vadd.f32 %v618_v42, %v608_v45  ;;  %1127 = vrot.lane.b32.xlu1 %v1122_v36, %s1995_s7  ;;  %v2677_v42 = vld [vmem:[%s2147_s24 + $0x50] sm:$0xff] }
 0x119   : > { %v633_v53 = vadd.f32 %v631_v38, %v624_v50  ;;  %1125 = vrot.lane.b32.xlu0 %v1121_v39, %s1995_s7  ;;  %v1220_v38 = vmul.f32 %v2639_v8, %v1219_v16  ;;  %v1234_v39 = vstv %s2647_s20  ;;  %s2680_s20 = sld [smem:[#allocation2 + %s1287_s4]]  ;;  %s1341_s4 = sadd.s32 82, %s2138_s5 }
 0x11a   : > { %v632_v26 = vadd.f32 %v630_v48, %v623_v51  ;;  %v644_v57 = vpop.permute.xlu1 %643  ;;  %v1236_v46 = vmul.f32 %v2633_v5, %v1234_v39  ;;  %v1235_v50 = vmul.f32 %v2639_v8, %v1234_v39  ;;  %v1259_v51 = vstv %s2658_s30  ;;  %s1326_s30 = sadd.s32 81, %s2138_s5 }
 0x11b   : > { %v642_v59 = vpop.permute.xlu0 %641  ;;  %v648_v7 = vadd.f32 %v644_v57, %v633_v53  ;;  %s2703_s9 = sld [smem:[#allocation2 + %s1326_s30]]  ;;  %s1371_s30 = sadd.s32 84, %s2138_s5 }
 0x11c   : > { %1142 = vrot.lane.b32.xlu1 %v1137_v24, %s1994_s6  ;;  %v647_v12 = vadd.f32 %v642_v59, %v632_v26 }
 0x11d   : > { %1140 = vrot.lane.b32.xlu0 %v1136_v44, %s1994_s6  ;;  %v767_v44 = vstv %s2661_s10  ;;  %s832_s10 = sadd.s32 45, %s2138_s5 }
 0x11e   : > { %v659_v62 = vpop.permute.xlu1 %658  ;;  %v769_v0 = vmul.f32 %v2369_v3, %v767_v44  ;;  %v768_v28 = vmul.f32 %v2376_v9, %v767_v44 }
 0x11f   : > { %v657_v63 = vpop.permute.xlu0 %656  ;;  %v663_v13 = vadd.f32 %v659_v62, %v648_v7  ;;  %v1260_v62 = vmul.f32 %v2684_v55, %v1259_v51 }
 0x120   : > { %1157 = vrot.lane.b32.xlu1 %v1152_v60, %s3013_s25  ;;  %v662_v18 = vadd.f32 %v657_v63, %v647_v12  ;;  %v1261_v60 = vmul.f32 %v2677_v42, %v1259_v51  ;;  %v1274_v63 = vstv %s2669_s11  ;;  %s2705_s11 = sld [smem:[#allocation2 + %s832_s10]] }
 0x121   : > { %1155 = vrot.lane.b32.xlu0 %v1151_v61, %s3013_s25  ;;  %v1276_v3 = vmul.f32 %v2677_v42, %v1274_v63  ;;  %s2737_s10 = sld [smem:[#allocation2 + %s1371_s30]]  ;;  %s1440_s30 = sadd.s32 89, %s2138_s5 }
 0x122   : > { %v674_v6 = vpop.permute.xlu1 %673 }
 0x123   : > { %v672_v30 = vpop.permute.xlu0 %671  ;;  %v678_v21 = vadd.f32 %v674_v6, %v663_v13  ;;  %v1289_v13 = vstv %s2680_s20  ;;  %s2713_s20 = sld [smem:[#allocation2 + %s1341_s4]]  ;;  %s1410_s4 = sadd.s32 87, %s2138_s5 }
 0x124   : > { %1172 = vrot.lane.b32.xlu1 %v1167_v1, %s1997_s28  ;;  %v677_v23 = vadd.f32 %v672_v30, %v662_v18 }
 0x125   : > { %1170 = vrot.lane.b32.xlu0 %v1166_v2, %s1997_s28 }
 0x126   : > { %v689_v20 = vpop.permute.xlu1 %688 }
 0x127   : > { %v687_v22 = vpop.permute.xlu0 %686  ;;  %v693_v56 = vadd.f32 %v689_v20, %v678_v21  ;;  %v1291_v20 = vmul.f32 %v2677_v42, %v1289_v13  ;;  %v1290_v21 = vmul.f32 %v2684_v55, %v1289_v13 }
 0x128   : > { %1196 = vrot.lane.b32.xlu1 %v1191_v10, %s1995_s7  ;;  %v692_v34 = vadd.f32 %v687_v22, %v677_v23  ;;  %v1275_v10 = vmul.f32 %v2684_v55, %v1274_v63  ;;  %v1304_v22 = vstv %s2693_s29  ;;  %s2724_s29 = sld [smem:[#allocation2 + %s1356_s21]]  ;;  %s1425_s21 = sadd.s32 88, %s2138_s5 }
 0x129   : > { %1194 = vrot.lane.b32.xlu0 %v1190_v15, %s1995_s7  ;;  %v702_v37 = vadd.f32 %v700_v29, %v693_v56  ;;  %v1305_v16 = vmul.f32 %v2684_v55, %v1304_v22 }
 0x12a   : > { %v713_v35 = vpop.permute.xlu1 %712  ;;  %v701_v43 = vadd.f32 %v699_v58, %v692_v34  ;;  %v2721_v58 = vld [vmem:[%s2147_s24 + $0x51] sm:$0xff]  ;;  %v1328_v34 = vstv %s2703_s9  ;;  %s1395_s9 = sadd.s32 86, %s2138_s5 }
 0x12b   : > { %v711_v36 = vpop.permute.xlu0 %710  ;;  %v717_v48 = vadd.f32 %v713_v35, %v702_v37 }
 0x12c   : > { %1211 = vrot.lane.b32.xlu1 %v1206_v27, %s1994_s6  ;;  %v716_v24 = vadd.f32 %v711_v36, %v701_v43  ;;  %v836_v36 = vstv %s2705_s11  ;;  %v1330_v43 = vmul.f32 %v2721_v58, %v1328_v34  ;;  %s2746_s11 = sld [smem:[#allocation2 + %s1395_s9]]  ;;  %s1464_s9 = sadd.s32 91, %s2138_s5 }
 0x12d   : > { %1209 = vrot.lane.b32.xlu0 %v1205_v31, %s1994_s6  ;;  %v1306_v31 = vmul.f32 %v2677_v42, %v1304_v22 }
 0x12e   : > { %v728_v41 = vpop.permute.xlu1 %727 }
 0x12f   : > { %v726_v45 = vpop.permute.xlu0 %725  ;;  %v732_v26 = vadd.f32 %v728_v41, %v717_v48  ;;  %v838_v41 = vmul.f32 %v2413_v47, %v836_v36 }
 0x130   : > { %1226 = vrot.lane.b32.xlu1 %v1221_v40, %s3013_s25  ;;  %v731_v59 = vadd.f32 %v726_v45, %v716_v24  ;;  %v2728_v40 = vld [vmem:[%s2147_s24 + $0x49] sm:$0xff] }
 0x131   : > { %1224 = vrot.lane.b32.xlu0 %v1220_v38, %s3013_s25  ;;  %v1329_v45 = vmul.f32 %v2728_v40, %v1328_v34 }
 0x132   : > { %v743_v53 = vpop.permute.xlu1 %742 }
 0x133   : > { %v741_v57 = vpop.permute.xlu0 %740  ;;  %v747_v61 = vadd.f32 %v743_v53, %v732_v26 }
 0x134   : > { %1241 = vrot.lane.b32.xlu1 %v1236_v46, %s1997_s28  ;;  %v746_v1 = vadd.f32 %v741_v57, %v731_v59  ;;  %v1343_v46 = vstv %s2713_s20  ;;  %v1358_v57 = vstv %s2724_s29  ;;  %s1411_s20 = sld [smem:[#allocation2 + %s1410_s4]]  ;;  %s1479_s4 = sadd.s32 92, %s2138_s5 }
 0x135   : > { %1239 = vrot.lane.b32.xlu0 %v1235_v50, %s1997_s28  ;;  %v837_v50 = vmul.f32 %v2420_v52, %v836_v36  ;;  %v1345_v44 = vmul.f32 %v2721_v58, %v1343_v46  ;;  %v1344_v47 = vmul.f32 %v2728_v40, %v1343_v46  ;;  %v1359_v63 = vmul.f32 %v2728_v40, %v1358_v57  ;;  %s1426_s29 = sld [smem:[#allocation2 + %s1425_s21]] }
 0x136   : > { %v758_v2 = vpop.permute.xlu1 %757  ;;  %s2790_s21 = sld [smem:[#allocation2 + %s1479_s4]]  ;;  %s1533_s4 = sadd.s32 96, %s2138_s5 }
 0x137   : > { %v762_v6 = vadd.f32 %v758_v2, %v747_v61  ;;  %v756_v7 = vpop.permute.xlu0 %755 }
 0x138   : > { %v761_v30 = vadd.f32 %v756_v7, %v746_v1  ;;  %1266 = vrot.lane.b32.xlu1 %v1261_v60, %s1995_s7  ;;  %v1373_v1 = vstv %s2737_s10  ;;  %s1441_s10 = sld [smem:[#allocation2 + %s1440_s30]] }
 0x139   : > { %v771_v12 = vadd.f32 %v769_v0, %v762_v6  ;;  %1264 = vrot.lane.b32.xlu0 %v1260_v62, %s1995_s7  ;;  %v1360_v62 = vmul.f32 %v2721_v58, %v1358_v57 }
 0x13a   : > { %v770_v9 = vadd.f32 %v768_v28, %v761_v30  ;;  %v782_v15 = vpop.permute.xlu1 %781  ;;  %v1375_v30 = vmul.f32 %v2721_v58, %v1373_v1 }
 0x13b   : > { %v786_v17 = vadd.f32 %v782_v15, %v771_v12  ;;  %v780_v18 = vpop.permute.xlu0 %779  ;;  %v2764_v12 = vld [vmem:[%s2147_s24 + $0x52] sm:$0xff] }
 0x13c   : > { %v785_v19 = vadd.f32 %v780_v18, %v770_v9  ;;  %1281 = vrot.lane.b32.xlu1 %v1276_v3, %s1994_s6  ;;  %v1374_v3 = vmul.f32 %v2728_v40, %v1373_v1  ;;  %v2768_v9 = vld [vmem:[%s2147_s24 + $0x4a] sm:$0xff] }
 0x13d   : > { %1279 = vrot.lane.b32.xlu0 %v1275_v10, %s1994_s6  ;;  %v1397_v10 = vstv %s2746_s11  ;;  %s1465_s11 = sld [smem:[#allocation2 + %s1464_s9]]  ;;  %s1509_s9 = sadd.s32 94, %s2138_s5 }
 0x13e   : > { %v797_v23 = vpop.permute.xlu1 %796  ;;  %v1398_v18 = vmul.f32 %v2768_v9, %v1397_v10  ;;  %v1442_v34 = vstv %s1441_s10 }
 0x13f   : > { %v801_v27 = vadd.f32 %v797_v23, %v786_v17  ;;  %v795_v29 = vpop.permute.xlu0 %794  ;;  %v1399_v17 = vmul.f32 %v2764_v12, %v1397_v10 }
 0x140   : > { %v800_v56 = vadd.f32 %v795_v29, %v785_v19  ;;  %1296 = vrot.lane.b32.xlu1 %v1291_v20, %s3013_s25  ;;  %v1412_v19 = vstv %s1411_s20  ;;  %s901_s20 = sadd.s32 50, %s2138_s5 }
 0x141   : > { %1294 = vrot.lane.b32.xlu0 %v1290_v21, %s3013_s25  ;;  %v1414_v22 = vmul.f32 %v2764_v12, %v1412_v19  ;;  %v1413_v23 = vmul.f32 %v2768_v9, %v1412_v19  ;;  %s2797_s30 = sld [smem:[#allocation2 + %s901_s20]] }
 0x142   : > { %v812_v35 = vpop.permute.xlu1 %811  ;;  %s2833_s20 = sld [smem:[#allocation2 + %s1533_s4]]  ;;  %s1578_s4 = sadd.s32 99, %s2138_s5 }
 0x143   : > { %v816_v37 = vadd.f32 %v812_v35, %v801_v27  ;;  %v810_v38 = vpop.permute.xlu0 %809  ;;  %v1427_v27 = vstv %s1426_s29  ;;  %s1494_s29 = sadd.s32 93, %s2138_s5 }
 0x144   : > { %v815_v39 = vadd.f32 %v810_v38, %v800_v56  ;;  %1311 = vrot.lane.b32.xlu1 %v1306_v31, %s1997_s28  ;;  %v1429_v31 = vmul.f32 %v2764_v12, %v1427_v27  ;;  %v1443_v38 = vmul.f32 %v2768_v9, %v1442_v34  ;;  %s2806_s10 = sld [smem:[#allocation2 + %s1494_s29]]  ;;  %s971_s29 = sadd.s32 55, %s2138_s5 }
 0x145   : > { %1309 = vrot.lane.b32.xlu0 %v1305_v16, %s1997_s28  ;;  %v1428_v16 = vmul.f32 %v2768_v9, %v1427_v27 }
 0x146   : > { %v827_v48 = vpop.permute.xlu1 %826 }
 0x147   : > { %v831_v51 = vadd.f32 %v827_v48, %v816_v37  ;;  %v825_v24 = vpop.permute.xlu0 %824  ;;  %v1444_v37 = vmul.f32 %v2764_v12, %v1442_v34 }
 0x148   : > { %v830_v53 = vadd.f32 %v825_v24, %v815_v39  ;;  %1335 = vrot.lane.b32.xlu1 %v1330_v43, %s1995_s7  ;;  %v2804_v39 = vld [vmem:[%s2147_s24 + $0x53] sm:$0xff]  ;;  %v1466_v43 = vstv %s1465_s11  ;;  %s2821_s11 = sld [smem:[#allocation2 + %s1509_s9]]  ;;  %s1563_s9 = sadd.s32 98, %s2138_s5 }
 0x149   : > { %v840_v26 = vadd.f32 %v838_v41, %v831_v51  ;;  %1333 = vrot.lane.b32.xlu0 %v1329_v45, %s1995_s7  ;;  %v2811_v45 = vld [vmem:[%s2147_s24 + $0x4b] sm:$0xff]  ;;  %v1468_v48 = vmul.f32 %v2804_v39, %v1466_v43  ;;  %v1481_v51 = vstv %s2790_s21  ;;  %s1548_s21 = sadd.s32 97, %s2138_s5 }
 0x14a   : > { %v839_v59 = vadd.f32 %v837_v50, %v830_v53  ;;  %v851_v52 = vpop.permute.xlu1 %850  ;;  %v1467_v50 = vmul.f32 %v2811_v45, %v1466_v43  ;;  %v1482_v57 = vmul.f32 %v2811_v45, %v1481_v51 }
 0x14b   : > { %v855_v60 = vadd.f32 %v851_v52, %v840_v26  ;;  %v849_v61 = vpop.permute.xlu0 %848  ;;  %v1483_v26 = vmul.f32 %v2804_v39, %v1481_v51 }
 0x14c   : > { %v854_v0 = vadd.f32 %v849_v61, %v839_v59  ;;  %1350 = vrot.lane.b32.xlu1 %v1345_v44, %s1994_s6  ;;  %v906_v44 = vstv %s2797_s30  ;;  %v1496_v59 = vstv %s2806_s10  ;;  %s2849_s30 = sld [smem:[#allocation2 + %s1548_s21]] }
 0x14d   : > { %1348 = vrot.lane.b32.xlu0 %v1344_v47, %s1994_s6  ;;  %v908_v61 = vmul.f32 %v2457_v25, %v906_v44  ;;  %s2851_s10 = sld [smem:[#allocation2 + %s971_s29]]  ;;  %s1247_s29 = sadd.s32 75, %s2138_s5 }
 0x14e   : > { %v866_v2 = vpop.permute.xlu1 %865 }
 0x14f   : > { %v2755_v28 = vadd.f32 %v866_v2, %v855_v60  ;;  %v864_v6 = vpop.permute.xlu0 %863  ;;  %v1498_v2 = vmul.f32 %v2804_v39, %v1496_v59 }
 0x150   : > { %v2757_v7 = vadd.f32 %v864_v6, %v854_v0  ;;  %1365 = vrot.lane.b32.xlu1 %v1360_v62, %s3013_s25  ;;  %v1511_v6 = vstv %s2821_s11  ;;  %s2862_s11 = sld [smem:[#allocation2 + %s1563_s9]] }
 0x151   : > { %1363 = vrot.lane.b32.xlu0 %v1359_v63, %s3013_s25  ;;  %v907_v63 = vmul.f32 %v2464_v32, %v906_v44  ;;  %v1512_v10 = vmul.f32 %v2811_v45, %v1511_v6 }
 0x152   : > { %v881_v13 = vpop.permute.xlu1 %880 }
 0x153   : > { %v879_v15 = vpop.permute.xlu0 %878  ;;  %v885_v47 = vadd.f32 %v881_v13, %v2755_v28  ;;  %v1497_v28 = vmul.f32 %v2811_v45, %v1496_v59  ;;  %v2859_v13 = vld [vmem:[%s2147_s24 + $0x54] sm:$0xff] }
 0x154   : > { %1380 = vrot.lane.b32.xlu1 %v1375_v30, %s1997_s28  ;;  %v884_v52 = vadd.f32 %v879_v15, %v2757_v7  ;;  %v1535_v15 = vstv %s2833_s20  ;;  %s1040_s20 = sadd.s32 60, %s2138_s5 }
 0x155   : > { %1378 = vrot.lane.b32.xlu0 %v1374_v3, %s1997_s28  ;;  %v1513_v3 = vmul.f32 %v2804_v39, %v1511_v6  ;;  %s2891_s21 = sld [smem:[#allocation2 + %s1040_s20]] }
 0x156   : > { %v896_v20 = vpop.permute.xlu1 %895 }
 0x157   : > { %v894_v21 = vpop.permute.xlu0 %893  ;;  %v900_v0 = vadd.f32 %v896_v20, %v885_v47 }
 0x158   : > { %1404 = vrot.lane.b32.xlu1 %v1399_v17, %s1995_s7  ;;  %v899_v1 = vadd.f32 %v894_v21, %v884_v52 }
 0x159   : > { %1402 = vrot.lane.b32.xlu0 %v1398_v18, %s1995_s7  ;;  %v910_v32 = vadd.f32 %v908_v61, %v900_v0  ;;  %v2865_v18 = vld [vmem:[%s2147_s24 + $0x4c] sm:$0xff]  ;;  %s2876_s24 = sld [smem:[#allocation2 + %s1578_s4]] }
 0x15a   : > { %v2780_v29 = vpop.permute.xlu1 %920  ;;  %v909_v30 = vadd.f32 %v907_v63, %v899_v1  ;;  %v1536_v27 = vmul.f32 %v2865_v18, %v1535_v15 }
 0x15b   : > { %v2783_v56 = vpop.permute.xlu0 %918  ;;  %v925_v19 = vadd.f32 %v2780_v29, %v910_v32  ;;  %v1044_v6 = vstv %s2891_s21  ;;  %s1524_s21 = sadd.s32 95, %s2138_s5 }
 0x15c   : > { %1419 = vrot.lane.b32.xlu1 %v1414_v22, %s1994_s6  ;;  %v924_v21 = vadd.f32 %v2783_v56, %v909_v30  ;;  %v1537_v22 = vmul.f32 %v2859_v13, %v1535_v15 }
 0x15d   : > { %1417 = vrot.lane.b32.xlu0 %v1413_v23, %s1994_s6 }
 0x15e   : > { %v2792_v35 = vpop.permute.xlu1 %935 }
 0x15f   : > { %v2795_v36 = vpop.permute.xlu0 %933  ;;  %v940_v23 = vadd.f32 %v2792_v35, %v925_v19  ;;  %v1580_v47 = vstv %s2876_s24  ;;  %v1045_v19 = vmul.f32 %v2552_v54, %v1044_v6  ;;  %s1455_s24 = sadd.s32 90, %s2138_s5 }
 0x160   : > { %1434 = vrot.lane.b32.xlu1 %v1429_v31, %s3013_s25  ;;  %v1550_v31 = vstv %s2849_s30  ;;  %v939_v29 = vadd.f32 %v2795_v36, %v924_v21  ;;  %v1581_v61 = vmul.f32 %v2865_v18, %v1580_v47  ;;  %s1248_s30 = sld [smem:[#allocation2 + %s1247_s29]]  ;;  %s1757_s29 = sshll.u32 %s1978_s16, 4 }
 0x161   : > { %1432 = vrot.lane.b32.xlu0 %v1428_v16, %s3013_s25  ;;  %v975_v16 = vstv %s2851_s10  ;;  %v1552_v35 = vmul.f32 %v2859_v13, %v1550_v31  ;;  %v1551_v36 = vmul.f32 %v2865_v18, %v1550_v31  ;;  %s1317_s10 = sadd.s32 80, %s2138_s5  ;;  %s1456_s20 = sld [smem:[#allocation2 + %s1455_s24]] }
 0x162   : > { %v2808_v41 = vpop.permute.xlu1 %950  ;;  %v977_v43 = vmul.f32 %v2501_v4, %v975_v16  ;;  %v976_v51 = vmul.f32 %v2508_v11, %v975_v16  ;;  %s1318_s9 = sld [smem:[#allocation2 + %s1317_s10]] }
 0x163   : > { %v2814_v46 = vpop.permute.xlu0 %948  ;;  %v955_v56 = vadd.f32 %v2808_v41, %v940_v23 }
 0x164   : > { %1449 = vrot.lane.b32.xlu1 %v1444_v37, %s1997_s28 }
 0x165   : > { %1447 = vrot.lane.b32.xlu0 %v1443_v38, %s1997_s28  ;;  %v954_v38 = vadd.f32 %v2814_v46, %v939_v29 }
 0x166   : > { %v966_v24 = vpop.permute.xlu1 %965 }
 0x167   : > { %v2824_v53 = vpop.permute.xlu0 %963 }
 0x168   : > { %1473 = vrot.lane.b32.xlu1 %v1468_v48, %s1995_s7  ;;  %v970_v48 = vadd.f32 %v966_v24, %v955_v56  ;;  %v969_v41 = vadd.f32 %v2824_v53, %v954_v38  ;;  %v1582_v53 = vmul.f32 %v2859_v13, %v1580_v47 }
 0x169   : > { %1471 = vrot.lane.b32.xlu0 %v1467_v50, %s1995_s7  ;;  %v1565_v50 = vstv %s2862_s11  ;;  %s1386_s11 = sadd.s32 85, %s2138_s5 }
 0x16a   : > { %v2836_v60 = vpop.permute.xlu1 %989  ;;  %v1567_v4 = vmul.f32 %v2859_v13, %v1565_v50  ;;  %v1566_v24 = vmul.f32 %v2865_v18, %v1565_v50  ;;  %s1387_s4 = sld [smem:[#allocation2 + %s1386_s11]] }
 0x16b   : > { %v2841_v62 = vpop.permute.xlu0 %987 }
 0x16c   : > { %1488 = vrot.lane.b32.xlu1 %v1483_v26, %s1994_s6  ;;  %v979_v26 = vadd.f32 %v977_v43, %v970_v48 }
 0x16d   : > { %1486 = vrot.lane.b32.xlu0 %v1482_v57, %s1994_s6  ;;  %v978_v57 = vadd.f32 %v976_v51, %v969_v41 }
 0x16e   : > { %v1005_v25 = vpop.permute.xlu1 %1004  ;;  %v994_v52 = vadd.f32 %v2836_v60, %v979_v26  ;;  %v1046_v60 = vmul.f32 %v2545_v49, %v1044_v6 }
 0x16f   : > { %v1003_v7 = vpop.permute.xlu0 %1002  ;;  %v993_v0 = vadd.f32 %v2841_v62, %v978_v57 }
 0x170   : > { %1503 = vrot.lane.b32.xlu1 %v1498_v2, %s3013_s25  ;;  %v1009_v1 = vadd.f32 %v1005_v25, %v994_v52 }
 0x171   : > { %1501 = vrot.lane.b32.xlu0 %v1497_v28, %s3013_s25  ;;  %v1008_v28 = vadd.f32 %v1003_v7, %v993_v0 }
 0x172   : > { %v1020_v17 = vpop.permute.xlu1 %1019 }
 0x173   : > { %v1018_v20 = vpop.permute.xlu0 %1017  ;;  %v1024_v32 = vadd.f32 %v1020_v17, %v1009_v1 }
 0x174   : > { %1518 = vrot.lane.b32.xlu1 %v1513_v3, %s1997_s28  ;;  %v1023_v30 = vadd.f32 %v1018_v20, %v1008_v28 }
 0x175   : > { %1516 = vrot.lane.b32.xlu0 %v1512_v10, %s1997_s28 }
 0x176   : > { %v1035_v34 = vpop.permute.xlu1 %1034 }
 0x177   : > { %v1033_v37 = vpop.permute.xlu0 %1032  ;;  %v1039_v10 = vadd.f32 %v1035_v34, %v1024_v32 }
 0x178   : > { %1542 = vrot.lane.b32.xlu1 %v1537_v22, %s1995_s7  ;;  %v1038_v62 = vadd.f32 %v1033_v37, %v1023_v30 }
 0x179   : > { %1540 = vrot.lane.b32.xlu0 %v1536_v27, %s1995_s7  ;;  %v1048_v21 = vadd.f32 %v1046_v60, %v1039_v10 }
 0x17a   : > { %v1059_v44 = vpop.permute.xlu1 %1058  ;;  %v1047_v22 = vadd.f32 %v1045_v19, %v1038_v62  ;;  %v1252_v19 = vstv %s1248_s30 }
 0x17b   : > { %v1057_v46 = vpop.permute.xlu0 %1056  ;;  %v1063_v17 = vadd.f32 %v1059_v44, %v1048_v21 }
 0x17c   : > { %1557 = vrot.lane.b32.xlu1 %v1552_v35, %s1994_s6  ;;  %v1062_v31 = vadd.f32 %v1057_v46, %v1047_v22 }
 0x17d   : > { %1555 = vrot.lane.b32.xlu0 %v1551_v36, %s1994_s6  ;;  %s1109_s6 = sadd.s32 65, %s2138_s5 }
 0x17e   : > { %v1074_v59 = vpop.permute.xlu1 %1073  ;;  %s1110_s7 = sld [smem:[#allocation2 + %s1109_s6]] }
 0x17f   : > { %v1072_v11 = vpop.permute.xlu0 %1071  ;;  %v1078_v20 = vadd.f32 %v1074_v59, %v1063_v17  ;;  %s1525_s6 = sld [smem:[#allocation2 + %s1524_s21]]  ;;  %s1998_s21 = smov [#allocation7]  }
 0x180   : > { %1572 = vrot.lane.b32.xlu1 %v1567_v4, %s3013_s25  ;;  %v1077_v29 = vadd.f32 %v1072_v11, %v1062_v31 }
 0x181   : > { %1570 = vrot.lane.b32.xlu0 %v1566_v24, %s3013_s25 }
 0x182   : > { %v1089_v63 = vpop.permute.xlu1 %1088 }
 0x183   : > { %v1087_v2 = vpop.permute.xlu0 %1086  ;;  %v1093_v34 = vadd.f32 %v1089_v63, %v1078_v20 }
 0x184   : > { %1587 = vrot.lane.b32.xlu1 %v1582_v53, %s1997_s28  ;;  %v1113_v16 = vstv %s1110_s7  ;;  %v1092_v38 = vadd.f32 %v1087_v2, %v1077_v29  ;;  %s1593_s7 = sld [smem:[#allocation5 + %s1974_s15]] }
 0x185   : > { %1585 = vrot.lane.b32.xlu0 %v1581_v61, %s1997_s28  ;;  %v1115_v54 = vmul.f32 %v2589_v14, %v1113_v16  ;;  %s1178_s28 = sadd.s32 70, %s2138_s5  ;;  %v1114_v43 = vmul.f32 %v2596_v33, %v1113_v16  ;;  %s202_s5 = sand.u32 1, %s1966_s13  }
 0x186   : > { %v1104_v3 = vpop.permute.xlu1 %1103  ;;  %s1179_s25 = sld [smem:[#allocation2 + %s1178_s28]]  ;;  %s1723_s28 = sshll.u32 %s202_s5, 4 }
 0x187   : > { %v1102_v15 = vpop.permute.xlu0 %1101  ;;  %v1108_v35 = vadd.f32 %v1104_v3, %v1093_v34  ;;  %s204_s10 = scalar_lea.vmem [#allocation7], %s1723_s28  ;;  %s2945_s24 = scalar_lea.sflag [#allocation3], %s202_s5 }
 0x188   : > { %v1107_v37 = vadd.f32 %v1102_v15, %v1092_v38 }
 0x189   : > { %v1117_v50 = vadd.f32 %v1115_v54, %v1108_v35 }
 0x18a   : > { %v1128_v25 = vpop.permute.xlu1 %1127  ;;  %v1116_v51 = vadd.f32 %v1114_v43, %v1107_v37  ;;  %v1321_v37 = vstv %s1318_s9  ;;  %s1616_s9 = sshll.u32 %s204_s10, 4  ;;  %s2941_s9 = int_to_ptr.vmem [resolvable:$true] %s1616_s9 }
 0x18b   : > { %v1126_v7 = vpop.permute.xlu0 %1125  ;;  %v1132_v46 = vadd.f32 %v1128_v25, %v1117_v50 }
 0x18c   : > { %v1131_v4 = vadd.f32 %v1126_v7, %v1116_v51  ;;  %v1182_v59 = vstv %s1179_s25  ;;  %s1756_s25 = sshll.u32 %s1974_s15, 1 }
 0x18d   : > { %v1184_v33 = vmul.f32 %v2633_v5, %v1182_v59  ;;  %v1183_v63 = vmul.f32 %v2639_v8, %v1182_v59  ;;  %v1254_v8 = vmul.f32 %v2677_v42, %v1252_v19  ;;  %s1613_s30 = sadd.s32 %s1757_s29, %s1756_s25 }
 0x18e   : > { %v1143_v23 = vpop.permute.xlu1 %1142  ;;  %s1758_s11 = sshll.u32 %s1613_s30, 7 }
 0x18f   : > { %v1141_v27 = vpop.permute.xlu0 %1140  ;;  %v1147_v24 = vadd.f32 %v1143_v23, %v1132_v46  ;;  %v1253_v23 = vmul.f32 %v2684_v55, %v1252_v19  ;;  %v1323_v55 = vmul.f32 %v2721_v58, %v1321_v37 }
 0x190   : > { %v1146_v57 = vadd.f32 %v1141_v27, %v1131_v4 }
 0x192   : > { %v1158_v49 = vpop.permute.xlu1 %1157 }
 0x193   : > { %v1156_v56 = vpop.permute.xlu0 %1155  ;;  %v1162_v14 = vadd.f32 %v1158_v49, %v1147_v24 }
 0x194   : > { %v1161_v11 = vadd.f32 %v1156_v56, %v1146_v57 }
 0x196   : > { %v1173_v48 = vpop.permute.xlu1 %1172 }
 0x197   : > { %v1171_v36 = vpop.permute.xlu0 %1170  ;;  %v1177_v52 = vadd.f32 %v1173_v48, %v1162_v14 }
 0x198   : > { %v1176_v0 = vadd.f32 %v1171_v36, %v1161_v11 }
 0x199   : > { %v1186_v2 = vadd.f32 %v1184_v33, %v1177_v52 }
 0x19a   : > { %v1197_v41 = vpop.permute.xlu1 %1196  ;;  %v1185_v6 = vadd.f32 %v1183_v63, %v1176_v0 }
 0x19b   : > { %v1195_v44 = vpop.permute.xlu0 %1194  ;;  %v1201_v30 = vadd.f32 %v1197_v41, %v1186_v2  ;;  %v1322_v41 = vmul.f32 %v2728_v40, %v1321_v37 }
 0x19c   : > { %v1200_v60 = vadd.f32 %v1195_v44, %v1185_v6 }
 0x19e   : > { %v1212_v26 = vpop.permute.xlu1 %1211 }
 0x19f   : > { %v1210_v47 = vpop.permute.xlu0 %1209  ;;  %v1216_v10 = vadd.f32 %v1212_v26, %v1201_v30 }
 0x1a0   : > { %v1215_v15 = vadd.f32 %v1210_v47, %v1200_v60 }
 0x1a2   : > { %v1227_v53 = vpop.permute.xlu1 %1226 }
 0x1a3   : > { %v1225_v61 = vpop.permute.xlu0 %1224  ;;  %v1231_v5 = vadd.f32 %v1227_v53, %v1216_v10  ;;  %v1390_v53 = vstv %s1387_s4  ;;  %s2939_s4 = scalar_lea.hbm %s2999_s3, %s1758_s11 }
 0x1a4   : > { %v1230_v21 = vadd.f32 %v1225_v61, %v1215_v15  ;;  %v1392_v40 = vmul.f32 %v2764_v12, %v1390_v53 }
 0x1a6   : > { %v1242_v1 = vpop.permute.xlu1 %1241 }
 0x1a7   : > { %v1240_v28 = vpop.permute.xlu0 %1239  ;;  %v1246_v7 = vadd.f32 %v1242_v1, %v1231_v5  ;;  %v1391_v1 = vmul.f32 %v2768_v9, %v1390_v53 }
 0x1a8   : > { %v1245_v22 = vadd.f32 %v1240_v28, %v1230_v21 }
 0x1a9   : > { %v1256_v31 = vadd.f32 %v1254_v8, %v1246_v7 }
 0x1aa   : > { %v1267_v32 = vpop.permute.xlu1 %1266  ;;  %v1255_v20 = vadd.f32 %v1253_v23, %v1245_v22 }
 0x1ab   : > { %v1265_v3 = vpop.permute.xlu0 %1264  ;;  %v1271_v49 = vadd.f32 %v1267_v32, %v1256_v31 }
 0x1ac   : > { %v1270_v34 = vadd.f32 %v1265_v3, %v1255_v20 }
 0x1ae   : > { %v1282_v62 = vpop.permute.xlu1 %1281 }
 0x1af   : > { %v1280_v25 = vpop.permute.xlu0 %1279  ;;  %v1286_v38 = vadd.f32 %v1282_v62, %v1271_v49 }
 0x1b0   : > { %v1285_v54 = vadd.f32 %v1280_v25, %v1270_v34  ;;  %v1459_v25 = vstv %s1456_s20  ;;  %s1890_s20 = scalar_lea.vmem %s2941_s9, 256 }
 0x1b1   : > { %v1461_v9 = vmul.f32 %v2804_v39, %v1459_v25  ;;  %v1528_v39 = vstv %s1525_s6  ;;  %p1891_p8 = scmp.ne.s32.totalorder %s2941_s9, %s1890_s20  ;;  %s1894_s6 = sshll.u32 %s1998_s21, 4  ;;  %s1895_s6 = int_to_ptr.vmem [resolvable:$false] %s1894_s6 }
 0x1b2   : > { %v1297_v17 = vpop.permute.xlu1 %1296  ;;  %p1897_p2 = scmp.lt.s32.totalorder %s2941_s9, %s1895_s6 }
 0x1b3   : > { %v1295_v27 = vpop.permute.xlu0 %1294  ;;  %v1301_v42 = vadd.f32 %v1297_v17, %v1286_v38  ;;  %v1460_v17 = vmul.f32 %v2811_v45, %v1459_v25  ;;  %p1892_p12 = pnand %p1891_p8, %p3014_p10 }
 0x1b4   : > { %v1300_v43 = vadd.f32 %v1295_v27, %v1285_v54 }
 0x1b5   : > { %p1893_p0 = pneg %p1892_p12 }
 0x1b6   : > { %v1312_v29 = vpop.permute.xlu1 %1311 }
 0x1b7   : > { %v1310_v16 = vpop.permute.xlu0 %1309  ;;  %v1316_v36 = vadd.f32 %v1312_v29, %v1301_v42 }
 0x1b8   : > { %v1315_v51 = vadd.f32 %v1310_v16, %v1300_v43 }
 0x1b9   : > { %v1325_v46 = vadd.f32 %v1323_v55, %v1316_v36 }
 0x1ba   : > { %v1336_v56 = vpop.permute.xlu1 %1335  ;;  %v1324_v26 = vadd.f32 %v1322_v41, %v1315_v51 }
 0x1bb   : > { %v1334_v35 = vpop.permute.xlu0 %1333  ;;  %v1340_v47 = vadd.f32 %v1336_v56, %v1325_v46 }
 0x1bc   : > { %v1339_v59 = vadd.f32 %v1334_v35, %v1324_v26 }
 0x1be   : > { %v1351_v48 = vpop.permute.xlu1 %1350 }
 0x1bf   : > { %v1349_v50 = vpop.permute.xlu0 %1348  ;;  %v1355_v14 = vadd.f32 %v1351_v48, %v1340_v47  ;;  %v1530_v48 = vmul.f32 %v2859_v13, %v1528_v39 }
 0x1c0   : > { %v1354_v11 = vadd.f32 %v1349_v50, %v1339_v59  ;;  %v1529_v50 = vmul.f32 %v2865_v18, %v1528_v39 }
 0x1c2   : > { %v1366_v44 = vpop.permute.xlu1 %1365 }
 0x1c3   : > { %v1364_v4 = vpop.permute.xlu0 %1363  ;;  %v1370_v58 = vadd.f32 %v1366_v44, %v1355_v14 }
 0x1c4   : > { %v1369_v61 = vadd.f32 %v1364_v4, %v1354_v11  ;;  %v1594_v11 = vstv %s1593_s7  ;;  %s1896_s7 = scalar_lea.vmem %s1895_s6, 512 }
 0x1c5   : > { %p1898_p7 = scmp.lt.s32.totalorder %s1896_s7, %s1890_s20 }
 0x1c6   : > { %v1381_v24 = vpop.permute.xlu1 %1380 }
 0x1c7   : > { %v1379_v57 = vpop.permute.xlu0 %1378  ;;  %v1385_v0 = vadd.f32 %v1381_v24, %v1370_v58  ;;  %p1899_p9 = por %p1898_p7, %p1897_p2 }
 0x1c8   : > { %v1384_v63 = vadd.f32 %v1379_v57, %v1369_v61 }
 0x1c9   : > { %v1394_v6 = vadd.f32 %v1392_v40, %v1385_v0  ;;  %p1900_p11 = pnand %p1899_p9, %p1893_p0 }
 0x1ca   : > { %v1405_v52 = vpop.permute.xlu1 %1404  ;;  %v1393_v32 = vadd.f32 %v1391_v1, %v1384_v63 }
 0x1cb   : > { %v1403_v33 = vpop.permute.xlu0 %1402  ;;  %v1409_v60 = vadd.f32 %v1405_v52, %v1394_v6 }
 0x1cc   : > { %v1408_v10 = vadd.f32 %v1403_v33, %v1393_v32 }
 0x1ce   : > { %v1420_v2 = vpop.permute.xlu1 %1419 }
 0x1cf   : > { %v1418_v28 = vpop.permute.xlu0 %1417  ;;  %v1424_v19 = vadd.f32 %v1420_v2, %v1409_v60 }
 0x1d0   : > { %v1423_v5 = vadd.f32 %v1418_v28, %v1408_v10 }
 0x1d2   : > { %v1435_v30 = vpop.permute.xlu1 %1434 }
 0x1d3   : > { %v1433_v3 = vpop.permute.xlu0 %1432  ;;  %v1439_v12 = vadd.f32 %v1435_v30, %v1424_v19 }
 0x1d4   : > { %v1438_v21 = vadd.f32 %v1433_v3, %v1423_v5 }
 0x1d6   : > { %v1450_v15 = vpop.permute.xlu1 %1449 }
 0x1d7   : > { %v1448_v62 = vpop.permute.xlu0 %1447  ;;  %v1454_v8 = vadd.f32 %v1450_v15, %v1439_v12 }
 0x1d8   : > { %v1453_v23 = vadd.f32 %v1448_v62, %v1438_v21 }
 0x1d9   : > { %v1463_v31 = vadd.f32 %v1461_v9, %v1454_v8 }
 0x1da   : > { %v1474_v7 = vpop.permute.xlu1 %1473  ;;  %v1462_v29 = vadd.f32 %v1460_v17, %v1453_v23 }
 0x1db   : > { %v1472_v22 = vpop.permute.xlu0 %1471  ;;  %v1478_v49 = vadd.f32 %v1474_v7, %v1463_v31 }
 0x1dc   : > { %v1477_v56 = vadd.f32 %v1472_v22, %v1462_v29 }
 0x1de   : > { %v1489_v27 = vpop.permute.xlu1 %1488 }
 0x1df   : > { %v1487_v20 = vpop.permute.xlu0 %1486  ;;  %v1493_v38 = vadd.f32 %v1489_v27, %v1478_v49 }
 0x1e0   : > { %v1492_v35 = vadd.f32 %v1487_v20, %v1477_v56 }
 0x1e2   : > { %v1504_v16 = vpop.permute.xlu1 %1503 }
 0x1e3   : > { %v1502_v34 = vpop.permute.xlu0 %1501  ;;  %v1508_v37 = vadd.f32 %v1504_v16, %v1493_v38 }
 0x1e4   : > { %v1507_v45 = vadd.f32 %v1502_v34, %v1492_v35 }
 0x1e6   : > { %v1519_v54 = vpop.permute.xlu1 %1518 }
 0x1e7   : > { %v1517_v42 = vpop.permute.xlu0 %1516  ;;  %v1523_v43 = vadd.f32 %v1519_v54, %v1508_v37 }
 0x1e8   : > { %v1522_v36 = vadd.f32 %v1517_v42, %v1507_v45 }
 0x1e9   : > { %v1532_v41 = vadd.f32 %v1530_v48, %v1523_v43 }
 0x1ea   : > { %v1543_v55 = vpop.permute.xlu1 %1542  ;;  %v1531_v44 = vadd.f32 %v1529_v50, %v1522_v36 }
 0x1eb   : > { %v1541_v51 = vpop.permute.xlu0 %1540  ;;  %v1547_v26 = vadd.f32 %v1543_v55, %v1532_v41 }
 0x1ec   : > { %v1546_v24 = vadd.f32 %v1541_v51, %v1531_v44 }
 0x1ee   : > { %v1558_v46 = vpop.permute.xlu1 %1557 }
 0x1ef   : > { %v1556_v4 = vpop.permute.xlu0 %1555  ;;  %v1562_v57 = vadd.f32 %v1558_v46, %v1547_v26 }
 0x1f0   : > { %v1561_v59 = vadd.f32 %v1556_v4, %v1546_v24 }
 0x1f2   : > { %v1573_v47 = vpop.permute.xlu1 %1572 }
 0x1f3   : > { %v1571_v13 = vpop.permute.xlu0 %1570  ;;  %v1577_v14 = vadd.f32 %v1573_v47, %v1562_v57 }
 0x1f4   : > { %v1576_v18 = vadd.f32 %v1571_v13, %v1561_v59 }
 0x1f6   : > { %v1588_v53 = vpop.permute.xlu1 %1587 }
 0x1f7   : > { %v1592_v52 = vadd.f32 %v1588_v53, %v1577_v14  ;;  %v1586_v58 = vpop.permute.xlu0 %1585 }
 0x1f8   : > { %v1591_v33 = vadd.f32 %v1586_v58, %v1576_v18 }
 0x1f9   : > { %v1596_v61 = vadd.f32 %v1594_v11, %v1592_v52 }
 0x1fa   : > { %v1595_v0 = vadd.f32 %v1594_v11, %v1591_v33 }
 0x1fb   : > { %1599 = vst.msk [vmem:[%s204_s10 + $0x8] sm:$0xff] %vm1597_vm0, %v1596_v61 }
 0x1fc   : > { %1598 = vst.msk [vmem:[%s204_s10] sm:$0xff] %vm1597_vm0, %v1595_v0 }
 0x1fd   : > { %1903 = shalt.err (!%p1900_p11)
}
 0x1fe   : > { %s1904_s5 = scalar_lea.hbm %s2939_s4, 256  ;;  %s1908_s29 = scalar_lea.hbm %s2999_s3, 4096 }
 0x1ff   : > { %p1905_p13 = scmp.ne.s32.totalorder %s2939_s4, %s1904_s5  ;;  %p1909_p5 = scmp.lt.s32.totalorder %s2939_s4, %s2999_s3 }
 0x200   : > { %p1910_p6 = scmp.lt.s32.totalorder %s1908_s29, %s1904_s5 }
 0x201   : > { %p1906_p1 = pnand %p1905_p13, %p3014_p10 }
 0x202   : > { %p1911_p3 = por %p1910_p6, %p1909_p5 }
 0x203   : > { %p1907_p4 = pneg %p1906_p1 }
 0x205   : > { %p1912_p8 = pnand %p1911_p3, %p1907_p4 }
 0x207   : > { %1915 = shalt.err (!%p1912_p8)
}
 0x208   : > { %s1999_s11 = smov 128   ;;  %s2000_s15 = smov 8  }
 0x209   : > { %1770 = dma.vmem_to_hbm [thread:$0]  (%p3014_p10), %s2941_s9, 256, %s2939_s4, %s2945_s24, %s1999_s11, %s1999_s11, %s2000_s15  }
 0x20a PF: > { %p1787_p12 = scmp.ge.s32.totalorder %s1990_s19, 2  ;;  %s1631_s16 = sand.u32 1, %s1962_s12  }
 0x20b   : > { %p3015_p0 = scmp.ne.s32.totalorder %s3007_s27, 0  ;;  %s1632_s20 = scalar_lea.sflag [#allocation3], %s1631_s16 }
 0x20d   : > { %p1780_p2 = pnand %p1787_p12, %p3015_p0 }
 0x20f   : > { %p1781_p7 = pneg %p1780_p2 }
 0x211   : > { %1957 = dma.done.wait (%p1781_p7), %s1632_s20, 256  }
 0x212   : > { %1959 = vsyncadd (%p1781_p7), %s1632_s20, 4294967040  ;;  %s18_s19 = sadd.s32 1, %s1990_s19   ;;  %s3016_s12 = smov %s1966_s13 }
 0x213   : > { %p15_p9 = scmp.ge.s32.totalorder %s18_s19, 18   ;;  %s3017_s13 = smov %s1970_s14 }
 0x214   : > { %s3018_s14 = smov %s2103_s8  ;;  %s3019_s15 = smov %s1982_s17 }
 0x215   : > { %s3020_s16 = smov %s1986_s18  ;;  %s3021_s17 = smov %s3024_s22 }
 0x216   : > { %s3022_s18 = smov %s3028_s23  ;;  %17 = sbr.rel (!%p15_p9) target bundleno = 7 (0x7), region = 79 }
 0x21b   :  { %1637 = vsyncpa [#allocation3], 1 }
 0x21c   :  { %1639 = vsyncpa [#allocation3 + $0x1], 1 }
 0x21d   :  { %1640 = vsyncpa [#allocation4], 1 }
 0x21e   :  { %1642 = vsyncpa [#allocation4 + $0x1], 1 }
 0x21f   :  { %1643 = vsyncpa [#allocation6], 1 }

</bundles_post_ra>
